<compile_context>
chip_gen: v6e
topology: v6e:2x2x1
jax: 0.10.0
libtpu: 0.0.40
codegen_flags: <defaults>
</compile_context>

<pallas_src>
import jax
import jax.numpy as jnp
from jax.experimental import pallas as pl
from jax.experimental.pallas import tpu as pltpu


# ------------------------------ fused kernel ---------------------------------
def encoder_kernel(xs_e_ref, xs_o_ref, w1_ref, b1_ref, w2_ref, b2_ref,
                   w3_ref, b3_ref, out_ref,
                   p1_ref, a1_ref, p2_ref, a2_ref, p3_ref):
    f32 = jnp.float32

    # -------- conv1: 4->32, k=8, s=4  (== k=2, s=1 over the space-to-depth(4) input) --
    # xs_e / xs_o hold the even / odd columns of the s2d input (1,13,{7,6},64).
    # p1[oh, 0:6,  K] = patches for even output columns (ow = 2*m)
    # p1[oh, 6:12, K] = patches for odd  output columns (ow = 2*m + 1)
    # K = (ki*2 + kj)*64 + s2d_channel
    for t, (ki, kj) in enumerate(((0, 0), (0, 1), (1, 0), (1, 1))):
        lo = t * 64
        hi = lo + 64
        if kj == 0:
            p1_ref[:, 0:6, lo:hi] = xs_e_ref[0, ki:ki + 12, 0:6, :]
            p1_ref[:, 6:12, lo:hi] = xs_o_ref[0, ki:ki + 12, 0:6, :]
        else:
            p1_ref[:, 0:6, lo:hi] = xs_o_ref[0, ki:ki + 12, 0:6, :]
            p1_ref[:, 6:12, lo:hi] = xs_e_ref[0, ki:ki + 12, 1:7, :]

    w1 = w1_ref[...]            # (256, 32)
    b1 = b1_ref[...]            # (1, 32)
    for oh in range(12):        # conv1 output rows: one (12,256)x(256,32) MXU op each
        r = jnp.dot(p1_ref[oh], w1, preferred_element_type=f32) + b1   # (12, 32)
        ph = oh % 2
        # a1 layout: a1[hb, wb, ph*64 + pw*32 + c] == conv1_out[2*hb+ph, 2*wb+pw, c]
        a1_ref[oh // 2, :, ph * 64:ph * 64 + 32] = r[0:6, :]           # even columns
        a1_ref[oh // 2, :, ph * 64 + 32:ph * 64 + 64] = r[6:12, :]     # odd  columns

    # -------- conv2: 32->64, k=4, s=2 (stride fully absorbed by the a1 parity layout) -
    # p2[i, j, (dhb*2+dwb)*128 + (ph*64+pw*32+c)] = a1[i+dhb, j+dwb, ph*64+pw*32+c]
    for dhb in range(2):
        for dwb in range(2):
            k0 = (dhb * 2 + dwb) * 128
            p2_ref[:, :, k0:k0 + 128] = a1_ref[dhb:dhb + 5, dwb:dwb + 5, :]

    w2 = w2_ref[...]            # (512, 64)
    b2 = b2_ref[...]            # (1, 64)
    for i in range(5):          # conv2 output rows: (5,512)x(512,64)
        a2_ref[i] = jnp.dot(p2_ref[i], w2, preferred_element_type=f32) + b2   # (5, 64)

    # -------- conv3: 64->64, k=3, s=1, emitted channel-major (NCHW flatten order) -----
    for di in range(3):
        for dj in range(3):
            k0 = (di * 3 + dj) * 64
            p3_ref[:, :, k0:k0 + 64] = a2_ref[di:di + 3, dj:dj + 3, :]

    w3 = w3_ref[...]            # (64, 576)  [c_out, (di, dj, c_in)]
    b3 = b3_ref[...]            # (64, 1)
    for i in range(3):          # conv3 output rows
        # (64, 576) . (3, 576)^T -> (64, 3): channel-major, matches NCHW flatten order.
        r = jax.lax.dot_general(
            w3, p3_ref[i],
            dimension_numbers=(((1,), (1,)), ((), ())),
            preferred_element_type=f32,
        ) + b3
        out_ref[0, :, 3 * i:3 * i + 3] = r


# ------------------------------ Encoder forward -------------------------------
def encoder_forward(x_nchw, params):
    N, C, H, W = x_nchw.shape
    assert (C, H, W) == (4, 52, 52), "kernel is specialized to 4x52x52 inputs"

    # Layout plumbing (cheap XLA ops on the 86 KB input and tiny weights).
    # space-to-depth(4): xs[n, hb, wb, dy*16 + dx*4 + c] = x[n, c, 4*hb+dy, 4*wb+dx]
    xs = x_nchw.reshape(N, 4, 13, 4, 13, 4)
    xs = jnp.transpose(xs, (0, 2, 4, 3, 5, 1)).reshape(N, 13, 13, 64)
    xs_e = xs[:, :, 0::2, :]     # (N, 13, 7, 64) even columns
    xs_o = xs[:, :, 1::2, :]     # (N, 13, 6, 64) odd columns

    w1, b1 = params["w1"], params["b1"]
    w2, b2 = params["w2"], params["b2"]
    w3, b3 = params["w3"], params["b3"]

    # conv1 weight -> (K=256, 32), K ordered (ki, kj, dy, dx, c)
    w1m = jnp.transpose(w1.reshape(32, 4, 2, 4, 2, 4), (2, 4, 3, 5, 1, 0)).reshape(256, 32)
    # conv2 weight -> (K=512, 64), K ordered (dhb, dwb, ph, pw, c) with di=2*dhb+ph, dj=2*dwb+pw
    w2m = jnp.transpose(w2.reshape(64, 32, 2, 2, 2, 2), (2, 4, 3, 5, 1, 0)).reshape(512, 64)
    # conv3 weight -> (64, K=576), K ordered (di, dj, c)
    w3m = jnp.transpose(w3, (0, 2, 3, 1)).reshape(64, 576)

    y = pl.pallas_call(
        encoder_kernel,
        out_shape=jax.ShapeDtypeStruct((N, 64, 9), jnp.float32),
        grid=(N,),
        in_specs=[
            pl.BlockSpec((1, 13, 7, 64), lambda n: (n, 0, 0, 0)),
            pl.BlockSpec((1, 13, 6, 64), lambda n: (n, 0, 0, 0)),
            pl.BlockSpec((256, 32), lambda n: (0, 0)),
            pl.BlockSpec((1, 32), lambda n: (0, 0)),
            pl.BlockSpec((512, 64), lambda n: (0, 0)),
            pl.BlockSpec((1, 64), lambda n: (0, 0)),
            pl.BlockSpec((64, 576), lambda n: (0, 0)),
            pl.BlockSpec((64, 1), lambda n: (0, 0)),
        ],
        out_specs=pl.BlockSpec((1, 64, 9), lambda n: (n, 0, 0)),
        scratch_shapes=[
            pltpu.VMEM((12, 12, 256), jnp.float32),  # p1: conv1 patches (even|odd cols)
            pltpu.VMEM((6, 6, 128), jnp.float32),    # a1: conv1 output, row+col parity packed
            pltpu.VMEM((5, 5, 512), jnp.float32),    # p2: conv2 patches
            pltpu.VMEM((5, 5, 64), jnp.float32),     # a2: conv2 output (NHWC)
            pltpu.VMEM((3, 3, 576), jnp.float32),    # p3: conv3 patches
        ],
        compiler_params=pltpu.CompilerParams(dimension_semantics=("parallel",)),
    )(xs_e, xs_o, w1m, b1.reshape(1, 32), w2m, b2.reshape(1, 64), w3m, b3.reshape(64, 1))

    # y[n, c, h*3 + w] is already NCHW-flattened -> both outputs are free reshapes.
    out = y.reshape(N, 64, 3, 3)
    embedding = y.reshape(N, 64 * 3 * 3)[None, :, :]
    return out, embedding


# ------------------------------ reference (lax) -------------------------------
def ref_forward(x_nchw, params):
    def conv(x, w, b, s):
        y = jax.lax.conv_general_dilated(
            x, w, (s, s), "VALID",
            dimension_numbers=("NCHW", "OIHW", "NCHW"),
            precision=jax.lax.Precision.HIGHEST,
        )
        return y + b[None, :, None, None]

    y = conv(x_nchw, params["w1"], params["b1"], 4)
    y = conv(y, params["w2"], params["b2"], 2)
    y = conv(y, params["w3"], params["b3"], 1)
    emb = y.reshape(y.shape[0], -1)[None, ...]
    return y, emb


# ------------------------------ params ----------------------------------------
def init_params(key):
    ks = jax.random.split(key, 6)

    def u(k, shape, fan_in):
        bound = 1.0 / jnp.sqrt(jnp.float32(fan_in))
        return jax.random.uniform(k, shape, jnp.float32, -bound, bound)

    return {
        "w1": u(ks[0], (32, 4, 8, 8), 4 * 8 * 8),
        "b1": u(ks[1], (32,), 4 * 8 * 8),
        "w2": u(ks[2], (64, 32, 4, 4), 32 * 4 * 4),
        "b2": u(ks[3], (64,), 32 * 4 * 4),
        "w3": u(ks[4], (64, 64, 3, 3), 64 * 3 * 3),
        "b3": u(ks[5], (64,), 64 * 3 * 3),
    }


if __name__ == "__main__":
    key = jax.random.PRNGKey(0)
    pkey, xkey = jax.random.split(key)
    params = init_params(pkey)

    # Small input consistent with the conv stack: 52x52 -> 12x12 -> 5x5 -> 3x3
    x = jax.random.normal(xkey, (2, 4, 52, 52), dtype=jnp.float32)

    out, embedding = jax.jit(encoder_forward)(x, params)
    out = jax.block_until_ready(out)
    embedding = jax.block_until_ready(embedding)

    assert out.shape == (2, 64, 3, 3), out.shape
    assert embedding.shape == (1, 2, 64 * 3 * 3), embedding.shape

    # sanity check against XLA's conv
    ref_out, ref_emb = ref_forward(x, params)
    assert jnp.allclose(out, ref_out, atol=1e-3, rtol=1e-3)
    assert jnp.allclose(embedding, ref_emb, atol=1e-3, rtol=1e-3)

    print("KERNEL_OK")
</pallas_src>

<mosaic_0001>
module attributes {stable_mosaic.version = 11 : i64} {
  func.func @encoder_kernel(%arg0: i32, %arg1: memref<1x13x7x64xf32, #tpu.memory_space<vmem>>, %arg2: memref<1x13x6x64xf32, #tpu.memory_space<vmem>>, %arg3: memref<256x32xf32, #tpu.memory_space<vmem>>, %arg4: memref<1x32xf32, #tpu.memory_space<vmem>>, %arg5: memref<512x64xf32, #tpu.memory_space<vmem>>, %arg6: memref<1x64xf32, #tpu.memory_space<vmem>>, %arg7: memref<64x576xf32, #tpu.memory_space<vmem>>, %arg8: memref<64x1xf32, #tpu.memory_space<vmem>>, %arg9: memref<1x64x9xf32, #tpu.memory_space<vmem>>, %arg10: memref<12x12x256xf32, #tpu.memory_space<vmem>>, %arg11: memref<6x6x128xf32, #tpu.memory_space<vmem>>, %arg12: memref<5x5x512xf32, #tpu.memory_space<vmem>>, %arg13: memref<5x5x64xf32, #tpu.memory_space<vmem>>, %arg14: memref<3x3x576xf32, #tpu.memory_space<vmem>>) attributes {dimension_semantics = [#tpu.dimension_semantics<parallel>], iteration_bounds = array<i64: 2>, scalar_prefetch = 0 : i64, scratch_operands = 5 : i64, tpu.core_type = #tpu.core_type<tc>, window_params = [{transform_indices = @transform_0, window_bounds = array<i64: 1, 13, 7, 64>}, {transform_indices = @transform_1, window_bounds = array<i64: 1, 13, 6, 64>}, {pipeline_mode = #tpu.pipeline_mode<synchronous>, transform_indices = @transform_2, window_bounds = array<i64: 256, 32>}, {pipeline_mode = #tpu.pipeline_mode<synchronous>, transform_indices = @transform_3, window_bounds = array<i64: 1, 32>}, {pipeline_mode = #tpu.pipeline_mode<synchronous>, transform_indices = @transform_4, window_bounds = array<i64: 512, 64>}, {pipeline_mode = #tpu.pipeline_mode<synchronous>, transform_indices = @transform_5, window_bounds = array<i64: 1, 64>}, {pipeline_mode = #tpu.pipeline_mode<synchronous>, transform_indices = @transform_6, window_bounds = array<i64: 64, 576>}, {pipeline_mode = #tpu.pipeline_mode<synchronous>, transform_indices = @transform_7, window_bounds = array<i64: 64, 1>}, {transform_indices = @transform_8, window_bounds = array<i64: 1, 64, 9>}]} {
    %c0 = arith.constant 0 : index
    %c0_0 = arith.constant 0 : index
    %c0_1 = arith.constant 0 : index
    %c0_2 = arith.constant 0 : index
    %0 = vector.load %arg1[%c0, %c0_0, %c0_1, %c0_2] : memref<1x13x7x64xf32, #tpu.memory_space<vmem>>, vector<1x12x6x64xf32>
    %1 = vector.shape_cast %0 : vector<1x12x6x64xf32> to vector<12x6x64xf32>
    %c0_3 = arith.constant 0 : index
    %c0_4 = arith.constant 0 : index
    %c0_5 = arith.constant 0 : index
    %2 = vector.load %arg10[%c0_3, %c0_4, %c0_5] : memref<12x12x256xf32, #tpu.memory_space<vmem>>, vector<12x6x64xf32>
    tpu.vector_store %arg10[%c0_3, %c0_4, %c0_5], %1 {strides = array<i32>} : memref<12x12x256xf32, #tpu.memory_space<vmem>>, vector<12x6x64xf32>,
    %c0_6 = arith.constant 0 : index
    %c0_7 = arith.constant 0 : index
    %c0_8 = arith.constant 0 : index
    %c0_9 = arith.constant 0 : index
    %3 = vector.load %arg2[%c0_6, %c0_7, %c0_8, %c0_9] : memref<1x13x6x64xf32, #tpu.memory_space<vmem>>, vector<1x12x6x64xf32>
    %4 = vector.shape_cast %3 : vector<1x12x6x64xf32> to vector<12x6x64xf32>
    %c0_10 = arith.constant 0 : index
    %c6 = arith.constant 6 : index
    %c0_11 = arith.constant 0 : index
    %5 = vector.load %arg10[%c0_10, %c6, %c0_11] : memref<12x12x256xf32, #tpu.memory_space<vmem>>, vector<12x6x64xf32>
    tpu.vector_store %arg10[%c0_10, %c6, %c0_11], %4 {strides = array<i32>} : memref<12x12x256xf32, #tpu.memory_space<vmem>>, vector<12x6x64xf32>,
    %c0_12 = arith.constant 0 : index
    %c0_13 = arith.constant 0 : index
    %c0_14 = arith.constant 0 : index
    %c0_15 = arith.constant 0 : index
    %6 = vector.load %arg2[%c0_12, %c0_13, %c0_14, %c0_15] : memref<1x13x6x64xf32, #tpu.memory_space<vmem>>, vector<1x12x6x64xf32>
    %7 = vector.shape_cast %6 : vector<1x12x6x64xf32> to vector<12x6x64xf32>
    %c0_16 = arith.constant 0 : index
    %c0_17 = arith.constant 0 : index
    %c64 = arith.constant 64 : index
    %8 = vector.load %arg10[%c0_16, %c0_17, %c64] : memref<12x12x256xf32, #tpu.memory_space<vmem>>, vector<12x6x64xf32>
    tpu.vector_store %arg10[%c0_16, %c0_17, %c64], %7 {strides = array<i32>} : memref<12x12x256xf32, #tpu.memory_space<vmem>>, vector<12x6x64xf32>,
    %c0_18 = arith.constant 0 : index
    %c0_19 = arith.constant 0 : index
    %c1 = arith.constant 1 : index
    %c0_20 = arith.constant 0 : index
    %9 = vector.load %arg1[%c0_18, %c0_19, %c1, %c0_20] : memref<1x13x7x64xf32, #tpu.memory_space<vmem>>, vector<1x12x6x64xf32>
    %10 = vector.shape_cast %9 : vector<1x12x6x64xf32> to vector<12x6x64xf32>
    %c0_21 = arith.constant 0 : index
    %c6_22 = arith.constant 6 : index
    %c64_23 = arith.constant 64 : index
    %11 = vector.load %arg10[%c0_21, %c6_22, %c64_23] : memref<12x12x256xf32, #tpu.memory_space<vmem>>, vector<12x6x64xf32>
    tpu.vector_store %arg10[%c0_21, %c6_22, %c64_23], %10 {strides = array<i32>} : memref<12x12x256xf32, #tpu.memory_space<vmem>>, vector<12x6x64xf32>,
    %c0_24 = arith.constant 0 : index
    %c1_25 = arith.constant 1 : index
    %c0_26 = arith.constant 0 : index
    %c0_27 = arith.constant 0 : index
    %12 = vector.load %arg1[%c0_24, %c1_25, %c0_26, %c0_27] : memref<1x13x7x64xf32, #tpu.memory_space<vmem>>, vector<1x12x6x64xf32>
    %13 = vector.shape_cast %12 : vector<1x12x6x64xf32> to vector<12x6x64xf32>
    %c0_28 = arith.constant 0 : index
    %c0_29 = arith.constant 0 : index
    %c128 = arith.constant 128 : index
    %14 = vector.load %arg10[%c0_28, %c0_29, %c128] : memref<12x12x256xf32, #tpu.memory_space<vmem>>, vector<12x6x64xf32>
    tpu.vector_store %arg10[%c0_28, %c0_29, %c128], %13 {strides = array<i32>} : memref<12x12x256xf32, #tpu.memory_space<vmem>>, vector<12x6x64xf32>,
    %c0_30 = arith.constant 0 : index
    %c1_31 = arith.constant 1 : index
    %c0_32 = arith.constant 0 : index
    %c0_33 = arith.constant 0 : index
    %15 = vector.load %arg2[%c0_30, %c1_31, %c0_32, %c0_33] : memref<1x13x6x64xf32, #tpu.memory_space<vmem>>, vector<1x12x6x64xf32>
    %16 = vector.shape_cast %15 : vector<1x12x6x64xf32> to vector<12x6x64xf32>
    %c0_34 = arith.constant 0 : index
    %c6_35 = arith.constant 6 : index
    %c128_36 = arith.constant 128 : index
    %17 = vector.load %arg10[%c0_34, %c6_35, %c128_36] : memref<12x12x256xf32, #tpu.memory_space<vmem>>, vector<12x6x64xf32>
    tpu.vector_store %arg10[%c0_34, %c6_35, %c128_36], %16 {strides = array<i32>} : memref<12x12x256xf32, #tpu.memory_space<vmem>>, vector<12x6x64xf32>,
    %c0_37 = arith.constant 0 : index
    %c1_38 = arith.constant 1 : index
    %c0_39 = arith.constant 0 : index
    %c0_40 = arith.constant 0 : index
    %18 = vector.load %arg2[%c0_37, %c1_38, %c0_39, %c0_40] : memref<1x13x6x64xf32, #tpu.memory_space<vmem>>, vector<1x12x6x64xf32>
    %19 = vector.shape_cast %18 : vector<1x12x6x64xf32> to vector<12x6x64xf32>
    %c0_41 = arith.constant 0 : index
    %c0_42 = arith.constant 0 : index
    %c192 = arith.constant 192 : index
    %20 = vector.load %arg10[%c0_41, %c0_42, %c192] : memref<12x12x256xf32, #tpu.memory_space<vmem>>, vector<12x6x64xf32>
    tpu.vector_store %arg10[%c0_41, %c0_42, %c192], %19 {strides = array<i32>} : memref<12x12x256xf32, #tpu.memory_space<vmem>>, vector<12x6x64xf32>,
    %c0_43 = arith.constant 0 : index
    %c1_44 = arith.constant 1 : index
    %c1_45 = arith.constant 1 : index
    %c0_46 = arith.constant 0 : index
    %21 = vector.load %arg1[%c0_43, %c1_44, %c1_45, %c0_46] : memref<1x13x7x64xf32, #tpu.memory_space<vmem>>, vector<1x12x6x64xf32>
    %22 = vector.shape_cast %21 : vector<1x12x6x64xf32> to vector<12x6x64xf32>
    %c0_47 = arith.constant 0 : index
    %c6_48 = arith.constant 6 : index
    %c192_49 = arith.constant 192 : index
    %23 = vector.load %arg10[%c0_47, %c6_48, %c192_49] : memref<12x12x256xf32, #tpu.memory_space<vmem>>, vector<12x6x64xf32>
    tpu.vector_store %arg10[%c0_47, %c6_48, %c192_49], %22 {strides = array<i32>} : memref<12x12x256xf32, #tpu.memory_space<vmem>>, vector<12x6x64xf32>,
    %c0_50 = arith.constant 0 : index
    %c0_51 = arith.constant 0 : index
    %24 = vector.load %arg3[%c0_50, %c0_51] : memref<256x32xf32, #tpu.memory_space<vmem>>, vector<256x32xf32>
    %c0_52 = arith.constant 0 : index
    %c0_53 = arith.constant 0 : index
    %25 = vector.load %arg4[%c0_52, %c0_53] : memref<1x32xf32, #tpu.memory_space<vmem>>, vector<1x32xf32>
    %c0_54 = arith.constant 0 : index
    %c0_55 = arith.constant 0 : index
    %c0_56 = arith.constant 0 : index
    %26 = vector.load %arg10[%c0_54, %c0_55, %c0_56] : memref<12x12x256xf32, #tpu.memory_space<vmem>>, vector<1x12x256xf32>
    %27 = vector.shape_cast %26 : vector<1x12x256xf32> to vector<12x256xf32>
    %cst = arith.constant dense<0.000000e+00> : vector<12x32xf32>
    %28 = tpu.matmul %27, %24, %cst {dimension_numbers = #tpu.dot_dimension_numbers<[1], [0], [0], [1], [0, 0, 1, 1], [], []>} : vector<12x256xf32>, vector<256x32xf32>, vector<12x32xf32> -> vector<12x32xf32>
    %29 = vector.broadcast %25 : vector<1x32xf32> to vector<12x32xf32>
    %30 = arith.addf %28, %29 : vector<12x32xf32>
    %31 = vector.extract_strided_slice %30 {offsets = [0, 0], sizes = [6, 32], strides = [1, 1]} : vector<12x32xf32> to vector<6x32xf32>
    %c0_57 = arith.constant 0 : index
    %c0_58 = arith.constant 0 : index
    %c0_59 = arith.constant 0 : index
    %32 = vector.load %arg11[%c0_57, %c0_58, %c0_59] : memref<6x6x128xf32, #tpu.memory_space<vmem>>, vector<1x6x32xf32>
    %33 = vector.shape_cast %32 : vector<1x6x32xf32> to vector<6x32xf32>
    %34 = vector.shape_cast %31 : vector<6x32xf32> to vector<1x6x32xf32>
    tpu.vector_store %arg11[%c0_57, %c0_58, %c0_59], %34 {strides = array<i32>} : memref<6x6x128xf32, #tpu.memory_space<vmem>>, vector<1x6x32xf32>,
    %35 = vector.extract_strided_slice %30 {offsets = [6, 0], sizes = [6, 32], strides = [1, 1]} : vector<12x32xf32> to vector<6x32xf32>
    %c0_60 = arith.constant 0 : index
    %c0_61 = arith.constant 0 : index
    %c32 = arith.constant 32 : index
    %36 = vector.load %arg11[%c0_60, %c0_61, %c32] : memref<6x6x128xf32, #tpu.memory_space<vmem>>, vector<1x6x32xf32>
    %37 = vector.shape_cast %36 : vector<1x6x32xf32> to vector<6x32xf32>
    %38 = vector.shape_cast %35 : vector<6x32xf32> to vector<1x6x32xf32>
    tpu.vector_store %arg11[%c0_60, %c0_61, %c32], %38 {strides = array<i32>} : memref<6x6x128xf32, #tpu.memory_space<vmem>>, vector<1x6x32xf32>,
    %c1_62 = arith.constant 1 : index
    %c0_63 = arith.constant 0 : index
    %c0_64 = arith.constant 0 : index
    %39 = vector.load %arg10[%c1_62, %c0_63, %c0_64] : memref<12x12x256xf32, #tpu.memory_space<vmem>>, vector<1x12x256xf32>
    %40 = vector.shape_cast %39 : vector<1x12x256xf32> to vector<12x256xf32>
    %cst_65 = arith.constant dense<0.000000e+00> : vector<12x32xf32>
    %41 = tpu.matmul %40, %24, %cst_65 {dimension_numbers = #tpu.dot_dimension_numbers<[1], [0], [0], [1], [0, 0, 1, 1], [], []>} : vector<12x256xf32>, vector<256x32xf32>, vector<12x32xf32> -> vector<12x32xf32>
    %42 = vector.broadcast %25 : vector<1x32xf32> to vector<12x32xf32>
    %43 = arith.addf %41, %42 : vector<12x32xf32>
    %44 = vector.extract_strided_slice %43 {offsets = [0, 0], sizes = [6, 32], strides = [1, 1]} : vector<12x32xf32> to vector<6x32xf32>
    %c0_66 = arith.constant 0 : index
    %c0_67 = arith.constant 0 : index
    %c64_68 = arith.constant 64 : index
    %45 = vector.load %arg11[%c0_66, %c0_67, %c64_68] : memref<6x6x128xf32, #tpu.memory_space<vmem>>, vector<1x6x32xf32>
    %46 = vector.shape_cast %45 : vector<1x6x32xf32> to vector<6x32xf32>
    %47 = vector.shape_cast %44 : vector<6x32xf32> to vector<1x6x32xf32>
    tpu.vector_store %arg11[%c0_66, %c0_67, %c64_68], %47 {strides = array<i32>} : memref<6x6x128xf32, #tpu.memory_space<vmem>>, vector<1x6x32xf32>,
    %48 = vector.extract_strided_slice %43 {offsets = [6, 0], sizes = [6, 32], strides = [1, 1]} : vector<12x32xf32> to vector<6x32xf32>
    %c0_69 = arith.constant 0 : index
    %c0_70 = arith.constant 0 : index
    %c96 = arith.constant 96 : index
    %49 = vector.load %arg11[%c0_69, %c0_70, %c96] : memref<6x6x128xf32, #tpu.memory_space<vmem>>, vector<1x6x32xf32>
    %50 = vector.shape_cast %49 : vector<1x6x32xf32> to vector<6x32xf32>
    %51 = vector.shape_cast %48 : vector<6x32xf32> to vector<1x6x32xf32>
    tpu.vector_store %arg11[%c0_69, %c0_70, %c96], %51 {strides = array<i32>} : memref<6x6x128xf32, #tpu.memory_space<vmem>>, vector<1x6x32xf32>,
    %c2 = arith.constant 2 : index
    %c0_71 = arith.constant 0 : index
    %c0_72 = arith.constant 0 : index
    %52 = vector.load %arg10[%c2, %c0_71, %c0_72] : memref<12x12x256xf32, #tpu.memory_space<vmem>>, vector<1x12x256xf32>
    %53 = vector.shape_cast %52 : vector<1x12x256xf32> to vector<12x256xf32>
    %cst_73 = arith.constant dense<0.000000e+00> : vector<12x32xf32>
    %54 = tpu.matmul %53, %24, %cst_73 {dimension_numbers = #tpu.dot_dimension_numbers<[1], [0], [0], [1], [0, 0, 1, 1], [], []>} : vector<12x256xf32>, vector<256x32xf32>, vector<12x32xf32> -> vector<12x32xf32>
    %55 = vector.broadcast %25 : vector<1x32xf32> to vector<12x32xf32>
    %56 = arith.addf %54, %55 : vector<12x32xf32>
    %57 = vector.extract_strided_slice %56 {offsets = [0, 0], sizes = [6, 32], strides = [1, 1]} : vector<12x32xf32> to vector<6x32xf32>
    %c1_74 = arith.constant 1 : index
    %c0_75 = arith.constant 0 : index
    %c0_76 = arith.constant 0 : index
    %58 = vector.load %arg11[%c1_74, %c0_75, %c0_76] : memref<6x6x128xf32, #tpu.memory_space<vmem>>, vector<1x6x32xf32>
    %59 = vector.shape_cast %58 : vector<1x6x32xf32> to vector<6x32xf32>
    %60 = vector.shape_cast %57 : vector<6x32xf32> to vector<1x6x32xf32>
    tpu.vector_store %arg11[%c1_74, %c0_75, %c0_76], %60 {strides = array<i32>} : memref<6x6x128xf32, #tpu.memory_space<vmem>>, vector<1x6x32xf32>,
    %61 = vector.extract_strided_slice %56 {offsets = [6, 0], sizes = [6, 32], strides = [1, 1]} : vector<12x32xf32> to vector<6x32xf32>
    %c1_77 = arith.constant 1 : index
    %c0_78 = arith.constant 0 : index
    %c32_79 = arith.constant 32 : index
    %62 = vector.load %arg11[%c1_77, %c0_78, %c32_79] : memref<6x6x128xf32, #tpu.memory_space<vmem>>, vector<1x6x32xf32>
    %63 = vector.shape_cast %62 : vector<1x6x32xf32> to vector<6x32xf32>
    %64 = vector.shape_cast %61 : vector<6x32xf32> to vector<1x6x32xf32>
    tpu.vector_store %arg11[%c1_77, %c0_78, %c32_79], %64 {strides = array<i32>} : memref<6x6x128xf32, #tpu.memory_space<vmem>>, vector<1x6x32xf32>,
    %c3 = arith.constant 3 : index
    %c0_80 = arith.constant 0 : index
    %c0_81 = arith.constant 0 : index
    %65 = vector.load %arg10[%c3, %c0_80, %c0_81] : memref<12x12x256xf32, #tpu.memory_space<vmem>>, vector<1x12x256xf32>
    %66 = vector.shape_cast %65 : vector<1x12x256xf32> to vector<12x256xf32>
    %cst_82 = arith.constant dense<0.000000e+00> : vector<12x32xf32>
    %67 = tpu.matmul %66, %24, %cst_82 {dimension_numbers = #tpu.dot_dimension_numbers<[1], [0], [0], [1], [0, 0, 1, 1], [], []>} : vector<12x256xf32>, vector<256x32xf32>, vector<12x32xf32> -> vector<12x32xf32>
    %68 = vector.broadcast %25 : vector<1x32xf32> to vector<12x32xf32>
    %69 = arith.addf %67, %68 : vector<12x32xf32>
    %70 = vector.extract_strided_slice %69 {offsets = [0, 0], sizes = [6, 32], strides = [1, 1]} : vector<12x32xf32> to vector<6x32xf32>
    %c1_83 = arith.constant 1 : index
    %c0_84 = arith.constant 0 : index
    %c64_85 = arith.constant 64 : index
    %71 = vector.load %arg11[%c1_83, %c0_84, %c64_85] : memref<6x6x128xf32, #tpu.memory_space<vmem>>, vector<1x6x32xf32>
    %72 = vector.shape_cast %71 : vector<1x6x32xf32> to vector<6x32xf32>
    %73 = vector.shape_cast %70 : vector<6x32xf32> to vector<1x6x32xf32>
    tpu.vector_store %arg11[%c1_83, %c0_84, %c64_85], %73 {strides = array<i32>} : memref<6x6x128xf32, #tpu.memory_space<vmem>>, vector<1x6x32xf32>,
    %74 = vector.extract_strided_slice %69 {offsets = [6, 0], sizes = [6, 32], strides = [1, 1]} : vector<12x32xf32> to vector<6x32xf32>
    %c1_86 = arith.constant 1 : index
    %c0_87 = arith.constant 0 : index
    %c96_88 = arith.constant 96 : index
    %75 = vector.load %arg11[%c1_86, %c0_87, %c96_88] : memref<6x6x128xf32, #tpu.memory_space<vmem>>, vector<1x6x32xf32>
    %76 = vector.shape_cast %75 : vector<1x6x32xf32> to vector<6x32xf32>
    %77 = vector.shape_cast %74 : vector<6x32xf32> to vector<1x6x32xf32>
    tpu.vector_store %arg11[%c1_86, %c0_87, %c96_88], %77 {strides = array<i32>} : memref<6x6x128xf32, #tpu.memory_space<vmem>>, vector<1x6x32xf32>,
    %c4 = arith.constant 4 : index
    %c0_89 = arith.constant 0 : index
    %c0_90 = arith.constant 0 : index
    %78 = vector.load %arg10[%c4, %c0_89, %c0_90] : memref<12x12x256xf32, #tpu.memory_space<vmem>>, vector<1x12x256xf32>
    %79 = vector.shape_cast %78 : vector<1x12x256xf32> to vector<12x256xf32>
    %cst_91 = arith.constant dense<0.000000e+00> : vector<12x32xf32>
    %80 = tpu.matmul %79, %24, %cst_91 {dimension_numbers = #tpu.dot_dimension_numbers<[1], [0], [0], [1], [0, 0, 1, 1], [], []>} : vector<12x256xf32>, vector<256x32xf32>, vector<12x32xf32> -> vector<12x32xf32>
    %81 = vector.broadcast %25 : vector<1x32xf32> to vector<12x32xf32>
    %82 = arith.addf %80, %81 : vector<12x32xf32>
    %83 = vector.extract_strided_slice %82 {offsets = [0, 0], sizes = [6, 32], strides = [1, 1]} : vector<12x32xf32> to vector<6x32xf32>
    %c2_92 = arith.constant 2 : index
    %c0_93 = arith.constant 0 : index
    %c0_94 = arith.constant 0 : index
    %84 = vector.load %arg11[%c2_92, %c0_93, %c0_94] : memref<6x6x128xf32, #tpu.memory_space<vmem>>, vector<1x6x32xf32>
    %85 = vector.shape_cast %84 : vector<1x6x32xf32> to vector<6x32xf32>
    %86 = vector.shape_cast %83 : vector<6x32xf32> to vector<1x6x32xf32>
    tpu.vector_store %arg11[%c2_92, %c0_93, %c0_94], %86 {strides = array<i32>} : memref<6x6x128xf32, #tpu.memory_space<vmem>>, vector<1x6x32xf32>,
    %87 = vector.extract_strided_slice %82 {offsets = [6, 0], sizes = [6, 32], strides = [1, 1]} : vector<12x32xf32> to vector<6x32xf32>
    %c2_95 = arith.constant 2 : index
    %c0_96 = arith.constant 0 : index
    %c32_97 = arith.constant 32 : index
    %88 = vector.load %arg11[%c2_95, %c0_96, %c32_97] : memref<6x6x128xf32, #tpu.memory_space<vmem>>, vector<1x6x32xf32>
    %89 = vector.shape_cast %88 : vector<1x6x32xf32> to vector<6x32xf32>
    %90 = vector.shape_cast %87 : vector<6x32xf32> to vector<1x6x32xf32>
    tpu.vector_store %arg11[%c2_95, %c0_96, %c32_97], %90 {strides = array<i32>} : memref<6x6x128xf32, #tpu.memory_space<vmem>>, vector<1x6x32xf32>,
    %c5 = arith.constant 5 : index
    %c0_98 = arith.constant 0 : index
    %c0_99 = arith.constant 0 : index
    %91 = vector.load %arg10[%c5, %c0_98, %c0_99] : memref<12x12x256xf32, #tpu.memory_space<vmem>>, vector<1x12x256xf32>
    %92 = vector.shape_cast %91 : vector<1x12x256xf32> to vector<12x256xf32>
    %cst_100 = arith.constant dense<0.000000e+00> : vector<12x32xf32>
    %93 = tpu.matmul %92, %24, %cst_100 {dimension_numbers = #tpu.dot_dimension_numbers<[1], [0], [0], [1], [0, 0, 1, 1], [], []>} : vector<12x256xf32>, vector<256x32xf32>, vector<12x32xf32> -> vector<12x32xf32>
    %94 = vector.broadcast %25 : vector<1x32xf32> to vector<12x32xf32>
    %95 = arith.addf %93, %94 : vector<12x32xf32>
    %96 = vector.extract_strided_slice %95 {offsets = [0, 0], sizes = [6, 32], strides = [1, 1]} : vector<12x32xf32> to vector<6x32xf32>
    %c2_101 = arith.constant 2 : index
    %c0_102 = arith.constant 0 : index
    %c64_103 = arith.constant 64 : index
    %97 = vector.load %arg11[%c2_101, %c0_102, %c64_103] : memref<6x6x128xf32, #tpu.memory_space<vmem>>, vector<1x6x32xf32>
    %98 = vector.shape_cast %97 : vector<1x6x32xf32> to vector<6x32xf32>
    %99 = vector.shape_cast %96 : vector<6x32xf32> to vector<1x6x32xf32>
    tpu.vector_store %arg11[%c2_101, %c0_102, %c64_103], %99 {strides = array<i32>} : memref<6x6x128xf32, #tpu.memory_space<vmem>>, vector<1x6x32xf32>,
    %100 = vector.extract_strided_slice %95 {offsets = [6, 0], sizes = [6, 32], strides = [1, 1]} : vector<12x32xf32> to vector<6x32xf32>
    %c2_104 = arith.constant 2 : index
    %c0_105 = arith.constant 0 : index
    %c96_106 = arith.constant 96 : index
    %101 = vector.load %arg11[%c2_104, %c0_105, %c96_106] : memref<6x6x128xf32, #tpu.memory_space<vmem>>, vector<1x6x32xf32>
    %102 = vector.shape_cast %101 : vector<1x6x32xf32> to vector<6x32xf32>
    %103 = vector.shape_cast %100 : vector<6x32xf32> to vector<1x6x32xf32>
    tpu.vector_store %arg11[%c2_104, %c0_105, %c96_106], %103 {strides = array<i32>} : memref<6x6x128xf32, #tpu.memory_space<vmem>>, vector<1x6x32xf32>,
    %c6_107 = arith.constant 6 : index
    %c0_108 = arith.constant 0 : index
    %c0_109 = arith.constant 0 : index
    %104 = vector.load %arg10[%c6_107, %c0_108, %c0_109] : memref<12x12x256xf32, #tpu.memory_space<vmem>>, vector<1x12x256xf32>
    %105 = vector.shape_cast %104 : vector<1x12x256xf32> to vector<12x256xf32>
    %cst_110 = arith.constant dense<0.000000e+00> : vector<12x32xf32>
    %106 = tpu.matmul %105, %24, %cst_110 {dimension_numbers = #tpu.dot_dimension_numbers<[1], [0], [0], [1], [0, 0, 1, 1], [], []>} : vector<12x256xf32>, vector<256x32xf32>, vector<12x32xf32> -> vector<12x32xf32>
    %107 = vector.broadcast %25 : vector<1x32xf32> to vector<12x32xf32>
    %108 = arith.addf %106, %107 : vector<12x32xf32>
    %109 = vector.extract_strided_slice %108 {offsets = [0, 0], sizes = [6, 32], strides = [1, 1]} : vector<12x32xf32> to vector<6x32xf32>
    %c3_111 = arith.constant 3 : index
    %c0_112 = arith.constant 0 : index
    %c0_113 = arith.constant 0 : index
    %110 = vector.load %arg11[%c3_111, %c0_112, %c0_113] : memref<6x6x128xf32, #tpu.memory_space<vmem>>, vector<1x6x32xf32>
    %111 = vector.shape_cast %110 : vector<1x6x32xf32> to vector<6x32xf32>
    %112 = vector.shape_cast %109 : vector<6x32xf32> to vector<1x6x32xf32>
    tpu.vector_store %arg11[%c3_111, %c0_112, %c0_113], %112 {strides = array<i32>} : memref<6x6x128xf32, #tpu.memory_space<vmem>>, vector<1x6x32xf32>,
    %113 = vector.extract_strided_slice %108 {offsets = [6, 0], sizes = [6, 32], strides = [1, 1]} : vector<12x32xf32> to vector<6x32xf32>
    %c3_114 = arith.constant 3 : index
    %c0_115 = arith.constant 0 : index
    %c32_116 = arith.constant 32 : index
    %114 = vector.load %arg11[%c3_114, %c0_115, %c32_116] : memref<6x6x128xf32, #tpu.memory_space<vmem>>, vector<1x6x32xf32>
    %115 = vector.shape_cast %114 : vector<1x6x32xf32> to vector<6x32xf32>
    %116 = vector.shape_cast %113 : vector<6x32xf32> to vector<1x6x32xf32>
    tpu.vector_store %arg11[%c3_114, %c0_115, %c32_116], %116 {strides = array<i32>} : memref<6x6x128xf32, #tpu.memory_space<vmem>>, vector<1x6x32xf32>,
    %c7 = arith.constant 7 : index
    %c0_117 = arith.constant 0 : index
    %c0_118 = arith.constant 0 : index
    %117 = vector.load %arg10[%c7, %c0_117, %c0_118] : memref<12x12x256xf32, #tpu.memory_space<vmem>>, vector<1x12x256xf32>
    %118 = vector.shape_cast %117 : vector<1x12x256xf32> to vector<12x256xf32>
    %cst_119 = arith.constant dense<0.000000e+00> : vector<12x32xf32>
    %119 = tpu.matmul %118, %24, %cst_119 {dimension_numbers = #tpu.dot_dimension_numbers<[1], [0], [0], [1], [0, 0, 1, 1], [], []>} : vector<12x256xf32>, vector<256x32xf32>, vector<12x32xf32> -> vector<12x32xf32>
    %120 = vector.broadcast %25 : vector<1x32xf32> to vector<12x32xf32>
    %121 = arith.addf %119, %120 : vector<12x32xf32>
    %122 = vector.extract_strided_slice %121 {offsets = [0, 0], sizes = [6, 32], strides = [1, 1]} : vector<12x32xf32> to vector<6x32xf32>
    %c3_120 = arith.constant 3 : index
    %c0_121 = arith.constant 0 : index
    %c64_122 = arith.constant 64 : index
    %123 = vector.load %arg11[%c3_120, %c0_121, %c64_122] : memref<6x6x128xf32, #tpu.memory_space<vmem>>, vector<1x6x32xf32>
    %124 = vector.shape_cast %123 : vector<1x6x32xf32> to vector<6x32xf32>
    %125 = vector.shape_cast %122 : vector<6x32xf32> to vector<1x6x32xf32>
    tpu.vector_store %arg11[%c3_120, %c0_121, %c64_122], %125 {strides = array<i32>} : memref<6x6x128xf32, #tpu.memory_space<vmem>>, vector<1x6x32xf32>,
    %126 = vector.extract_strided_slice %121 {offsets = [6, 0], sizes = [6, 32], strides = [1, 1]} : vector<12x32xf32> to vector<6x32xf32>
    %c3_123 = arith.constant 3 : index
    %c0_124 = arith.constant 0 : index
    %c96_125 = arith.constant 96 : index
    %127 = vector.load %arg11[%c3_123, %c0_124, %c96_125] : memref<6x6x128xf32, #tpu.memory_space<vmem>>, vector<1x6x32xf32>
    %128 = vector.shape_cast %127 : vector<1x6x32xf32> to vector<6x32xf32>
    %129 = vector.shape_cast %126 : vector<6x32xf32> to vector<1x6x32xf32>
    tpu.vector_store %arg11[%c3_123, %c0_124, %c96_125], %129 {strides = array<i32>} : memref<6x6x128xf32, #tpu.memory_space<vmem>>, vector<1x6x32xf32>,
    %c8 = arith.constant 8 : index
    %c0_126 = arith.constant 0 : index
    %c0_127 = arith.constant 0 : index
    %130 = vector.load %arg10[%c8, %c0_126, %c0_127] : memref<12x12x256xf32, #tpu.memory_space<vmem>>, vector<1x12x256xf32>
    %131 = vector.shape_cast %130 : vector<1x12x256xf32> to vector<12x256xf32>
    %cst_128 = arith.constant dense<0.000000e+00> : vector<12x32xf32>
    %132 = tpu.matmul %131, %24, %cst_128 {dimension_numbers = #tpu.dot_dimension_numbers<[1], [0], [0], [1], [0, 0, 1, 1], [], []>} : vector<12x256xf32>, vector<256x32xf32>, vector<12x32xf32> -> vector<12x32xf32>
    %133 = vector.broadcast %25 : vector<1x32xf32> to vector<12x32xf32>
    %134 = arith.addf %132, %133 : vector<12x32xf32>
    %135 = vector.extract_strided_slice %134 {offsets = [0, 0], sizes = [6, 32], strides = [1, 1]} : vector<12x32xf32> to vector<6x32xf32>
    %c4_129 = arith.constant 4 : index
    %c0_130 = arith.constant 0 : index
    %c0_131 = arith.constant 0 : index
    %136 = vector.load %arg11[%c4_129, %c0_130, %c0_131] : memref<6x6x128xf32, #tpu.memory_space<vmem>>, vector<1x6x32xf32>
    %137 = vector.shape_cast %136 : vector<1x6x32xf32> to vector<6x32xf32>
    %138 = vector.shape_cast %135 : vector<6x32xf32> to vector<1x6x32xf32>
    tpu.vector_store %arg11[%c4_129, %c0_130, %c0_131], %138 {strides = array<i32>} : memref<6x6x128xf32, #tpu.memory_space<vmem>>, vector<1x6x32xf32>,
    %139 = vector.extract_strided_slice %134 {offsets = [6, 0], sizes = [6, 32], strides = [1, 1]} : vector<12x32xf32> to vector<6x32xf32>
    %c4_132 = arith.constant 4 : index
    %c0_133 = arith.constant 0 : index
    %c32_134 = arith.constant 32 : index
    %140 = vector.load %arg11[%c4_132, %c0_133, %c32_134] : memref<6x6x128xf32, #tpu.memory_space<vmem>>, vector<1x6x32xf32>
    %141 = vector.shape_cast %140 : vector<1x6x32xf32> to vector<6x32xf32>
    %142 = vector.shape_cast %139 : vector<6x32xf32> to vector<1x6x32xf32>
    tpu.vector_store %arg11[%c4_132, %c0_133, %c32_134], %142 {strides = array<i32>} : memref<6x6x128xf32, #tpu.memory_space<vmem>>, vector<1x6x32xf32>,
    %c9 = arith.constant 9 : index
    %c0_135 = arith.constant 0 : index
    %c0_136 = arith.constant 0 : index
    %143 = vector.load %arg10[%c9, %c0_135, %c0_136] : memref<12x12x256xf32, #tpu.memory_space<vmem>>, vector<1x12x256xf32>
    %144 = vector.shape_cast %143 : vector<1x12x256xf32> to vector<12x256xf32>
    %cst_137 = arith.constant dense<0.000000e+00> : vector<12x32xf32>
    %145 = tpu.matmul %144, %24, %cst_137 {dimension_numbers = #tpu.dot_dimension_numbers<[1], [0], [0], [1], [0, 0, 1, 1], [], []>} : vector<12x256xf32>, vector<256x32xf32>, vector<12x32xf32> -> vector<12x32xf32>
    %146 = vector.broadcast %25 : vector<1x32xf32> to vector<12x32xf32>
    %147 = arith.addf %145, %146 : vector<12x32xf32>
    %148 = vector.extract_strided_slice %147 {offsets = [0, 0], sizes = [6, 32], strides = [1, 1]} : vector<12x32xf32> to vector<6x32xf32>
    %c4_138 = arith.constant 4 : index
    %c0_139 = arith.constant 0 : index
    %c64_140 = arith.constant 64 : index
    %149 = vector.load %arg11[%c4_138, %c0_139, %c64_140] : memref<6x6x128xf32, #tpu.memory_space<vmem>>, vector<1x6x32xf32>
    %150 = vector.shape_cast %149 : vector<1x6x32xf32> to vector<6x32xf32>
    %151 = vector.shape_cast %148 : vector<6x32xf32> to vector<1x6x32xf32>
    tpu.vector_store %arg11[%c4_138, %c0_139, %c64_140], %151 {strides = array<i32>} : memref<6x6x128xf32, #tpu.memory_space<vmem>>, vector<1x6x32xf32>,
    %152 = vector.extract_strided_slice %147 {offsets = [6, 0], sizes = [6, 32], strides = [1, 1]} : vector<12x32xf32> to vector<6x32xf32>
    %c4_141 = arith.constant 4 : index
    %c0_142 = arith.constant 0 : index
    %c96_143 = arith.constant 96 : index
    %153 = vector.load %arg11[%c4_141, %c0_142, %c96_143] : memref<6x6x128xf32, #tpu.memory_space<vmem>>, vector<1x6x32xf32>
    %154 = vector.shape_cast %153 : vector<1x6x32xf32> to vector<6x32xf32>
    %155 = vector.shape_cast %152 : vector<6x32xf32> to vector<1x6x32xf32>
    tpu.vector_store %arg11[%c4_141, %c0_142, %c96_143], %155 {strides = array<i32>} : memref<6x6x128xf32, #tpu.memory_space<vmem>>, vector<1x6x32xf32>,
    %c10 = arith.constant 10 : index
    %c0_144 = arith.constant 0 : index
    %c0_145 = arith.constant 0 : index
    %156 = vector.load %arg10[%c10, %c0_144, %c0_145] : memref<12x12x256xf32, #tpu.memory_space<vmem>>, vector<1x12x256xf32>
    %157 = vector.shape_cast %156 : vector<1x12x256xf32> to vector<12x256xf32>
    %cst_146 = arith.constant dense<0.000000e+00> : vector<12x32xf32>
    %158 = tpu.matmul %157, %24, %cst_146 {dimension_numbers = #tpu.dot_dimension_numbers<[1], [0], [0], [1], [0, 0, 1, 1], [], []>} : vector<12x256xf32>, vector<256x32xf32>, vector<12x32xf32> -> vector<12x32xf32>
    %159 = vector.broadcast %25 : vector<1x32xf32> to vector<12x32xf32>
    %160 = arith.addf %158, %159 : vector<12x32xf32>
    %161 = vector.extract_strided_slice %160 {offsets = [0, 0], sizes = [6, 32], strides = [1, 1]} : vector<12x32xf32> to vector<6x32xf32>
    %c5_147 = arith.constant 5 : index
    %c0_148 = arith.constant 0 : index
    %c0_149 = arith.constant 0 : index
    %162 = vector.load %arg11[%c5_147, %c0_148, %c0_149] : memref<6x6x128xf32, #tpu.memory_space<vmem>>, vector<1x6x32xf32>
    %163 = vector.shape_cast %162 : vector<1x6x32xf32> to vector<6x32xf32>
    %164 = vector.shape_cast %161 : vector<6x32xf32> to vector<1x6x32xf32>
    tpu.vector_store %arg11[%c5_147, %c0_148, %c0_149], %164 {strides = array<i32>} : memref<6x6x128xf32, #tpu.memory_space<vmem>>, vector<1x6x32xf32>,
    %165 = vector.extract_strided_slice %160 {offsets = [6, 0], sizes = [6, 32], strides = [1, 1]} : vector<12x32xf32> to vector<6x32xf32>
    %c5_150 = arith.constant 5 : index
    %c0_151 = arith.constant 0 : index
    %c32_152 = arith.constant 32 : index
    %166 = vector.load %arg11[%c5_150, %c0_151, %c32_152] : memref<6x6x128xf32, #tpu.memory_space<vmem>>, vector<1x6x32xf32>
    %167 = vector.shape_cast %166 : vector<1x6x32xf32> to vector<6x32xf32>
    %168 = vector.shape_cast %165 : vector<6x32xf32> to vector<1x6x32xf32>
    tpu.vector_store %arg11[%c5_150, %c0_151, %c32_152], %168 {strides = array<i32>} : memref<6x6x128xf32, #tpu.memory_space<vmem>>, vector<1x6x32xf32>,
    %c11 = arith.constant 11 : index
    %c0_153 = arith.constant 0 : index
    %c0_154 = arith.constant 0 : index
    %169 = vector.load %arg10[%c11, %c0_153, %c0_154] : memref<12x12x256xf32, #tpu.memory_space<vmem>>, vector<1x12x256xf32>
    %170 = vector.shape_cast %169 : vector<1x12x256xf32> to vector<12x256xf32>
    %cst_155 = arith.constant dense<0.000000e+00> : vector<12x32xf32>
    %171 = tpu.matmul %170, %24, %cst_155 {dimension_numbers = #tpu.dot_dimension_numbers<[1], [0], [0], [1], [0, 0, 1, 1], [], []>} : vector<12x256xf32>, vector<256x32xf32>, vector<12x32xf32> -> vector<12x32xf32>
    %172 = vector.broadcast %25 : vector<1x32xf32> to vector<12x32xf32>
    %173 = arith.addf %171, %172 : vector<12x32xf32>
    %174 = vector.extract_strided_slice %173 {offsets = [0, 0], sizes = [6, 32], strides = [1, 1]} : vector<12x32xf32> to vector<6x32xf32>
    %c5_156 = arith.constant 5 : index
    %c0_157 = arith.constant 0 : index
    %c64_158 = arith.constant 64 : index
    %175 = vector.load %arg11[%c5_156, %c0_157, %c64_158] : memref<6x6x128xf32, #tpu.memory_space<vmem>>, vector<1x6x32xf32>
    %176 = vector.shape_cast %175 : vector<1x6x32xf32> to vector<6x32xf32>
    %177 = vector.shape_cast %174 : vector<6x32xf32> to vector<1x6x32xf32>
    tpu.vector_store %arg11[%c5_156, %c0_157, %c64_158], %177 {strides = array<i32>} : memref<6x6x128xf32, #tpu.memory_space<vmem>>, vector<1x6x32xf32>,
    %178 = vector.extract_strided_slice %173 {offsets = [6, 0], sizes = [6, 32], strides = [1, 1]} : vector<12x32xf32> to vector<6x32xf32>
    %c5_159 = arith.constant 5 : index
    %c0_160 = arith.constant 0 : index
    %c96_161 = arith.constant 96 : index
    %179 = vector.load %arg11[%c5_159, %c0_160, %c96_161] : memref<6x6x128xf32, #tpu.memory_space<vmem>>, vector<1x6x32xf32>
    %180 = vector.shape_cast %179 : vector<1x6x32xf32> to vector<6x32xf32>
    %181 = vector.shape_cast %178 : vector<6x32xf32> to vector<1x6x32xf32>
    tpu.vector_store %arg11[%c5_159, %c0_160, %c96_161], %181 {strides = array<i32>} : memref<6x6x128xf32, #tpu.memory_space<vmem>>, vector<1x6x32xf32>,
    %c0_162 = arith.constant 0 : index
    %c0_163 = arith.constant 0 : index
    %c0_164 = arith.constant 0 : index
    %182 = vector.load %arg11[%c0_162, %c0_163, %c0_164] : memref<6x6x128xf32, #tpu.memory_space<vmem>>, vector<5x5x128xf32>
    %c0_165 = arith.constant 0 : index
    %c0_166 = arith.constant 0 : index
    %c0_167 = arith.constant 0 : index
    %183 = vector.load %arg12[%c0_165, %c0_166, %c0_167] : memref<5x5x512xf32, #tpu.memory_space<vmem>>, vector<5x5x128xf32>
    tpu.vector_store %arg12[%c0_165, %c0_166, %c0_167], %182 {strides = array<i32>} : memref<5x5x512xf32, #tpu.memory_space<vmem>>, vector<5x5x128xf32>,
    %c0_168 = arith.constant 0 : index
    %c1_169 = arith.constant 1 : index
    %c0_170 = arith.constant 0 : index
    %184 = vector.load %arg11[%c0_168, %c1_169, %c0_170] : memref<6x6x128xf32, #tpu.memory_space<vmem>>, vector<5x5x128xf32>
    %c0_171 = arith.constant 0 : index
    %c0_172 = arith.constant 0 : index
    %c128_173 = arith.constant 128 : index
    %185 = vector.load %arg12[%c0_171, %c0_172, %c128_173] : memref<5x5x512xf32, #tpu.memory_space<vmem>>, vector<5x5x128xf32>
    tpu.vector_store %arg12[%c0_171, %c0_172, %c128_173], %184 {strides = array<i32>} : memref<5x5x512xf32, #tpu.memory_space<vmem>>, vector<5x5x128xf32>,
    %c1_174 = arith.constant 1 : index
    %c0_175 = arith.constant 0 : index
    %c0_176 = arith.constant 0 : index
    %186 = vector.load %arg11[%c1_174, %c0_175, %c0_176] : memref<6x6x128xf32, #tpu.memory_space<vmem>>, vector<5x5x128xf32>
    %c0_177 = arith.constant 0 : index
    %c0_178 = arith.constant 0 : index
    %c256 = arith.constant 256 : index
    %187 = vector.load %arg12[%c0_177, %c0_178, %c256] : memref<5x5x512xf32, #tpu.memory_space<vmem>>, vector<5x5x128xf32>
    tpu.vector_store %arg12[%c0_177, %c0_178, %c256], %186 {strides = array<i32>} : memref<5x5x512xf32, #tpu.memory_space<vmem>>, vector<5x5x128xf32>,
    %c1_179 = arith.constant 1 : index
    %c1_180 = arith.constant 1 : index
    %c0_181 = arith.constant 0 : index
    %188 = vector.load %arg11[%c1_179, %c1_180, %c0_181] : memref<6x6x128xf32, #tpu.memory_space<vmem>>, vector<5x5x128xf32>
    %c0_182 = arith.constant 0 : index
    %c0_183 = arith.constant 0 : index
    %c384 = arith.constant 384 : index
    %189 = vector.load %arg12[%c0_182, %c0_183, %c384] : memref<5x5x512xf32, #tpu.memory_space<vmem>>, vector<5x5x128xf32>
    tpu.vector_store %arg12[%c0_182, %c0_183, %c384], %188 {strides = array<i32>} : memref<5x5x512xf32, #tpu.memory_space<vmem>>, vector<5x5x128xf32>,
    %c0_184 = arith.constant 0 : index
    %c0_185 = arith.constant 0 : index
    %190 = vector.load %arg5[%c0_184, %c0_185] : memref<512x64xf32, #tpu.memory_space<vmem>>, vector<512x64xf32>
    %c0_186 = arith.constant 0 : index
    %c0_187 = arith.constant 0 : index
    %191 = vector.load %arg6[%c0_186, %c0_187] : memref<1x64xf32, #tpu.memory_space<vmem>>, vector<1x64xf32>
    %c0_188 = arith.constant 0 : index
    %c0_189 = arith.constant 0 : index
    %c0_190 = arith.constant 0 : index
    %192 = vector.load %arg12[%c0_188, %c0_189, %c0_190] : memref<5x5x512xf32, #tpu.memory_space<vmem>>, vector<1x5x512xf32>
    %193 = vector.shape_cast %192 : vector<1x5x512xf32> to vector<5x512xf32>
    %cst_191 = arith.constant dense<0.000000e+00> : vector<5x64xf32>
    %194 = tpu.matmul %193, %190, %cst_191 {dimension_numbers = #tpu.dot_dimension_numbers<[1], [0], [0], [1], [0, 0, 1, 1], [], []>} : vector<5x512xf32>, vector<512x64xf32>, vector<5x64xf32> -> vector<5x64xf32>
    %195 = vector.broadcast %191 : vector<1x64xf32> to vector<5x64xf32>
    %196 = arith.addf %194, %195 : vector<5x64xf32>
    %c0_192 = arith.constant 0 : index
    %c0_193 = arith.constant 0 : index
    %c0_194 = arith.constant 0 : index
    %197 = vector.load %arg13[%c0_192, %c0_193, %c0_194] : memref<5x5x64xf32, #tpu.memory_space<vmem>>, vector<1x5x64xf32>
    %198 = vector.shape_cast %197 : vector<1x5x64xf32> to vector<5x64xf32>
    %199 = vector.shape_cast %196 : vector<5x64xf32> to vector<1x5x64xf32>
    tpu.vector_store %arg13[%c0_192, %c0_193, %c0_194], %199 {strides = array<i32>} : memref<5x5x64xf32, #tpu.memory_space<vmem>>, vector<1x5x64xf32>,
    %c1_195 = arith.constant 1 : index
    %c0_196 = arith.constant 0 : index
    %c0_197 = arith.constant 0 : index
    %200 = vector.load %arg12[%c1_195, %c0_196, %c0_197] : memref<5x5x512xf32, #tpu.memory_space<vmem>>, vector<1x5x512xf32>
    %201 = vector.shape_cast %200 : vector<1x5x512xf32> to vector<5x512xf32>
    %cst_198 = arith.constant dense<0.000000e+00> : vector<5x64xf32>
    %202 = tpu.matmul %201, %190, %cst_198 {dimension_numbers = #tpu.dot_dimension_numbers<[1], [0], [0], [1], [0, 0, 1, 1], [], []>} : vector<5x512xf32>, vector<512x64xf32>, vector<5x64xf32> -> vector<5x64xf32>
    %203 = vector.broadcast %191 : vector<1x64xf32> to vector<5x64xf32>
    %204 = arith.addf %202, %203 : vector<5x64xf32>
    %c1_199 = arith.constant 1 : index
    %c0_200 = arith.constant 0 : index
    %c0_201 = arith.constant 0 : index
    %205 = vector.load %arg13[%c1_199, %c0_200, %c0_201] : memref<5x5x64xf32, #tpu.memory_space<vmem>>, vector<1x5x64xf32>
    %206 = vector.shape_cast %205 : vector<1x5x64xf32> to vector<5x64xf32>
    %207 = vector.shape_cast %204 : vector<5x64xf32> to vector<1x5x64xf32>
    tpu.vector_store %arg13[%c1_199, %c0_200, %c0_201], %207 {strides = array<i32>} : memref<5x5x64xf32, #tpu.memory_space<vmem>>, vector<1x5x64xf32>,
    %c2_202 = arith.constant 2 : index
    %c0_203 = arith.constant 0 : index
    %c0_204 = arith.constant 0 : index
    %208 = vector.load %arg12[%c2_202, %c0_203, %c0_204] : memref<5x5x512xf32, #tpu.memory_space<vmem>>, vector<1x5x512xf32>
    %209 = vector.shape_cast %208 : vector<1x5x512xf32> to vector<5x512xf32>
    %cst_205 = arith.constant dense<0.000000e+00> : vector<5x64xf32>
    %210 = tpu.matmul %209, %190, %cst_205 {dimension_numbers = #tpu.dot_dimension_numbers<[1], [0], [0], [1], [0, 0, 1, 1], [], []>} : vector<5x512xf32>, vector<512x64xf32>, vector<5x64xf32> -> vector<5x64xf32>
    %211 = vector.broadcast %191 : vector<1x64xf32> to vector<5x64xf32>
    %212 = arith.addf %210, %211 : vector<5x64xf32>
    %c2_206 = arith.constant 2 : index
    %c0_207 = arith.constant 0 : index
    %c0_208 = arith.constant 0 : index
    %213 = vector.load %arg13[%c2_206, %c0_207, %c0_208] : memref<5x5x64xf32, #tpu.memory_space<vmem>>, vector<1x5x64xf32>
    %214 = vector.shape_cast %213 : vector<1x5x64xf32> to vector<5x64xf32>
    %215 = vector.shape_cast %212 : vector<5x64xf32> to vector<1x5x64xf32>
    tpu.vector_store %arg13[%c2_206, %c0_207, %c0_208], %215 {strides = array<i32>} : memref<5x5x64xf32, #tpu.memory_space<vmem>>, vector<1x5x64xf32>,
    %c3_209 = arith.constant 3 : index
    %c0_210 = arith.constant 0 : index
    %c0_211 = arith.constant 0 : index
    %216 = vector.load %arg12[%c3_209, %c0_210, %c0_211] : memref<5x5x512xf32, #tpu.memory_space<vmem>>, vector<1x5x512xf32>
    %217 = vector.shape_cast %216 : vector<1x5x512xf32> to vector<5x512xf32>
    %cst_212 = arith.constant dense<0.000000e+00> : vector<5x64xf32>
    %218 = tpu.matmul %217, %190, %cst_212 {dimension_numbers = #tpu.dot_dimension_numbers<[1], [0], [0], [1], [0, 0, 1, 1], [], []>} : vector<5x512xf32>, vector<512x64xf32>, vector<5x64xf32> -> vector<5x64xf32>
    %219 = vector.broadcast %191 : vector<1x64xf32> to vector<5x64xf32>
    %220 = arith.addf %218, %219 : vector<5x64xf32>
    %c3_213 = arith.constant 3 : index
    %c0_214 = arith.constant 0 : index
    %c0_215 = arith.constant 0 : index
    %221 = vector.load %arg13[%c3_213, %c0_214, %c0_215] : memref<5x5x64xf32, #tpu.memory_space<vmem>>, vector<1x5x64xf32>
    %222 = vector.shape_cast %221 : vector<1x5x64xf32> to vector<5x64xf32>
    %223 = vector.shape_cast %220 : vector<5x64xf32> to vector<1x5x64xf32>
    tpu.vector_store %arg13[%c3_213, %c0_214, %c0_215], %223 {strides = array<i32>} : memref<5x5x64xf32, #tpu.memory_space<vmem>>, vector<1x5x64xf32>,
    %c4_216 = arith.constant 4 : index
    %c0_217 = arith.constant 0 : index
    %c0_218 = arith.constant 0 : index
    %224 = vector.load %arg12[%c4_216, %c0_217, %c0_218] : memref<5x5x512xf32, #tpu.memory_space<vmem>>, vector<1x5x512xf32>
    %225 = vector.shape_cast %224 : vector<1x5x512xf32> to vector<5x512xf32>
    %cst_219 = arith.constant dense<0.000000e+00> : vector<5x64xf32>
    %226 = tpu.matmul %225, %190, %cst_219 {dimension_numbers = #tpu.dot_dimension_numbers<[1], [0], [0], [1], [0, 0, 1, 1], [], []>} : vector<5x512xf32>, vector<512x64xf32>, vector<5x64xf32> -> vector<5x64xf32>
    %227 = vector.broadcast %191 : vector<1x64xf32> to vector<5x64xf32>
    %228 = arith.addf %226, %227 : vector<5x64xf32>
    %c4_220 = arith.constant 4 : index
    %c0_221 = arith.constant 0 : index
    %c0_222 = arith.constant 0 : index
    %229 = vector.load %arg13[%c4_220, %c0_221, %c0_222] : memref<5x5x64xf32, #tpu.memory_space<vmem>>, vector<1x5x64xf32>
    %230 = vector.shape_cast %229 : vector<1x5x64xf32> to vector<5x64xf32>
    %231 = vector.shape_cast %228 : vector<5x64xf32> to vector<1x5x64xf32>
    tpu.vector_store %arg13[%c4_220, %c0_221, %c0_222], %231 {strides = array<i32>} : memref<5x5x64xf32, #tpu.memory_space<vmem>>, vector<1x5x64xf32>,
    %c0_223 = arith.constant 0 : index
    %c0_224 = arith.constant 0 : index
    %c0_225 = arith.constant 0 : index
    %232 = vector.load %arg13[%c0_223, %c0_224, %c0_225] : memref<5x5x64xf32, #tpu.memory_space<vmem>>, vector<3x3x64xf32>
    %c0_226 = arith.constant 0 : index
    %c0_227 = arith.constant 0 : index
    %c0_228 = arith.constant 0 : index
    %233 = vector.load %arg14[%c0_226, %c0_227, %c0_228] : memref<3x3x576xf32, #tpu.memory_space<vmem>>, vector<3x3x64xf32>
    tpu.vector_store %arg14[%c0_226, %c0_227, %c0_228], %232 {strides = array<i32>} : memref<3x3x576xf32, #tpu.memory_space<vmem>>, vector<3x3x64xf32>,
    %c0_229 = arith.constant 0 : index
    %c1_230 = arith.constant 1 : index
    %c0_231 = arith.constant 0 : index
    %234 = vector.load %arg13[%c0_229, %c1_230, %c0_231] : memref<5x5x64xf32, #tpu.memory_space<vmem>>, vector<3x3x64xf32>
    %c0_232 = arith.constant 0 : index
    %c0_233 = arith.constant 0 : index
    %c64_234 = arith.constant 64 : index
    %235 = vector.load %arg14[%c0_232, %c0_233, %c64_234] : memref<3x3x576xf32, #tpu.memory_space<vmem>>, vector<3x3x64xf32>
    tpu.vector_store %arg14[%c0_232, %c0_233, %c64_234], %234 {strides = array<i32>} : memref<3x3x576xf32, #tpu.memory_space<vmem>>, vector<3x3x64xf32>,
    %c0_235 = arith.constant 0 : index
    %c2_236 = arith.constant 2 : index
    %c0_237 = arith.constant 0 : index
    %236 = vector.load %arg13[%c0_235, %c2_236, %c0_237] : memref<5x5x64xf32, #tpu.memory_space<vmem>>, vector<3x3x64xf32>
    %c0_238 = arith.constant 0 : index
    %c0_239 = arith.constant 0 : index
    %c128_240 = arith.constant 128 : index
    %237 = vector.load %arg14[%c0_238, %c0_239, %c128_240] : memref<3x3x576xf32, #tpu.memory_space<vmem>>, vector<3x3x64xf32>
    tpu.vector_store %arg14[%c0_238, %c0_239, %c128_240], %236 {strides = array<i32>} : memref<3x3x576xf32, #tpu.memory_space<vmem>>, vector<3x3x64xf32>,
    %c1_241 = arith.constant 1 : index
    %c0_242 = arith.constant 0 : index
    %c0_243 = arith.constant 0 : index
    %238 = vector.load %arg13[%c1_241, %c0_242, %c0_243] : memref<5x5x64xf32, #tpu.memory_space<vmem>>, vector<3x3x64xf32>
    %c0_244 = arith.constant 0 : index
    %c0_245 = arith.constant 0 : index
    %c192_246 = arith.constant 192 : index
    %239 = vector.load %arg14[%c0_244, %c0_245, %c192_246] : memref<3x3x576xf32, #tpu.memory_space<vmem>>, vector<3x3x64xf32>
    tpu.vector_store %arg14[%c0_244, %c0_245, %c192_246], %238 {strides = array<i32>} : memref<3x3x576xf32, #tpu.memory_space<vmem>>, vector<3x3x64xf32>,
    %c1_247 = arith.constant 1 : index
    %c1_248 = arith.constant 1 : index
    %c0_249 = arith.constant 0 : index
    %240 = vector.load %arg13[%c1_247, %c1_248, %c0_249] : memref<5x5x64xf32, #tpu.memory_space<vmem>>, vector<3x3x64xf32>
    %c0_250 = arith.constant 0 : index
    %c0_251 = arith.constant 0 : index
    %c256_252 = arith.constant 256 : index
    %241 = vector.load %arg14[%c0_250, %c0_251, %c256_252] : memref<3x3x576xf32, #tpu.memory_space<vmem>>, vector<3x3x64xf32>
    tpu.vector_store %arg14[%c0_250, %c0_251, %c256_252], %240 {strides = array<i32>} : memref<3x3x576xf32, #tpu.memory_space<vmem>>, vector<3x3x64xf32>,
    %c1_253 = arith.constant 1 : index
    %c2_254 = arith.constant 2 : index
    %c0_255 = arith.constant 0 : index
    %242 = vector.load %arg13[%c1_253, %c2_254, %c0_255] : memref<5x5x64xf32, #tpu.memory_space<vmem>>, vector<3x3x64xf32>
    %c0_256 = arith.constant 0 : index
    %c0_257 = arith.constant 0 : index
    %c320 = arith.constant 320 : index
    %243 = vector.load %arg14[%c0_256, %c0_257, %c320] : memref<3x3x576xf32, #tpu.memory_space<vmem>>, vector<3x3x64xf32>
    tpu.vector_store %arg14[%c0_256, %c0_257, %c320], %242 {strides = array<i32>} : memref<3x3x576xf32, #tpu.memory_space<vmem>>, vector<3x3x64xf32>,
    %c2_258 = arith.constant 2 : index
    %c0_259 = arith.constant 0 : index
    %c0_260 = arith.constant 0 : index
    %244 = vector.load %arg13[%c2_258, %c0_259, %c0_260] : memref<5x5x64xf32, #tpu.memory_space<vmem>>, vector<3x3x64xf32>
    %c0_261 = arith.constant 0 : index
    %c0_262 = arith.constant 0 : index
    %c384_263 = arith.constant 384 : index
    %245 = vector.load %arg14[%c0_261, %c0_262, %c384_263] : memref<3x3x576xf32, #tpu.memory_space<vmem>>, vector<3x3x64xf32>
    tpu.vector_store %arg14[%c0_261, %c0_262, %c384_263], %244 {strides = array<i32>} : memref<3x3x576xf32, #tpu.memory_space<vmem>>, vector<3x3x64xf32>,
    %c2_264 = arith.constant 2 : index
    %c1_265 = arith.constant 1 : index
    %c0_266 = arith.constant 0 : index
    %246 = vector.load %arg13[%c2_264, %c1_265, %c0_266] : memref<5x5x64xf32, #tpu.memory_space<vmem>>, vector<3x3x64xf32>
    %c0_267 = arith.constant 0 : index
    %c0_268 = arith.constant 0 : index
    %c448 = arith.constant 448 : index
    %247 = vector.load %arg14[%c0_267, %c0_268, %c448] : memref<3x3x576xf32, #tpu.memory_space<vmem>>, vector<3x3x64xf32>
    tpu.vector_store %arg14[%c0_267, %c0_268, %c448], %246 {strides = array<i32>} : memref<3x3x576xf32, #tpu.memory_space<vmem>>, vector<3x3x64xf32>,
    %c2_269 = arith.constant 2 : index
    %c2_270 = arith.constant 2 : index
    %c0_271 = arith.constant 0 : index
    %248 = vector.load %arg13[%c2_269, %c2_270, %c0_271] : memref<5x5x64xf32, #tpu.memory_space<vmem>>, vector<3x3x64xf32>
    %c0_272 = arith.constant 0 : index
    %c0_273 = arith.constant 0 : index
    %c512 = arith.constant 512 : index
    %249 = vector.load %arg14[%c0_272, %c0_273, %c512] : memref<3x3x576xf32, #tpu.memory_space<vmem>>, vector<3x3x64xf32>
    tpu.vector_store %arg14[%c0_272, %c0_273, %c512], %248 {strides = array<i32>} : memref<3x3x576xf32, #tpu.memory_space<vmem>>, vector<3x3x64xf32>,
    %c0_274 = arith.constant 0 : index
    %c0_275 = arith.constant 0 : index
    %250 = vector.load %arg7[%c0_274, %c0_275] : memref<64x576xf32, #tpu.memory_space<vmem>>, vector<64x576xf32>
    %c0_276 = arith.constant 0 : index
    %c0_277 = arith.constant 0 : index
    %251 = vector.load %arg8[%c0_276, %c0_277] : memref<64x1xf32, #tpu.memory_space<vmem>>, vector<64x1xf32>
    %c0_278 = arith.constant 0 : index
    %c0_279 = arith.constant 0 : index
    %c0_280 = arith.constant 0 : index
    %252 = vector.load %arg14[%c0_278, %c0_279, %c0_280] : memref<3x3x576xf32, #tpu.memory_space<vmem>>, vector<1x3x576xf32>
    %253 = vector.shape_cast %252 : vector<1x3x576xf32> to vector<3x576xf32>
    %cst_281 = arith.constant dense<0.000000e+00> : vector<64x3xf32>
    %254 = tpu.matmul %250, %253, %cst_281 {dimension_numbers = #tpu.dot_dimension_numbers<[1], [1], [0], [0], [0, 0, 1, 0], [], []>} : vector<64x576xf32>, vector<3x576xf32>, vector<64x3xf32> -> vector<64x3xf32>
    %255 = vector.broadcast %251 : vector<64x1xf32> to vector<64x3xf32>
    %256 = arith.addf %254, %255 : vector<64x3xf32>
    %c0_282 = arith.constant 0 : index
    %c0_283 = arith.constant 0 : index
    %c0_284 = arith.constant 0 : index
    %257 = vector.load %arg9[%c0_282, %c0_283, %c0_284] : memref<1x64x9xf32, #tpu.memory_space<vmem>>, vector<1x64x3xf32>
    %258 = vector.shape_cast %257 : vector<1x64x3xf32> to vector<64x3xf32>
    %259 = vector.shape_cast %256 : vector<64x3xf32> to vector<1x64x3xf32>
    tpu.vector_store %arg9[%c0_282, %c0_283, %c0_284], %259 {strides = array<i32>} : memref<1x64x9xf32, #tpu.memory_space<vmem>>, vector<1x64x3xf32>,
    %c1_285 = arith.constant 1 : index
    %c0_286 = arith.constant 0 : index
    %c0_287 = arith.constant 0 : index
    %260 = vector.load %arg14[%c1_285, %c0_286, %c0_287] : memref<3x3x576xf32, #tpu.memory_space<vmem>>, vector<1x3x576xf32>
    %261 = vector.shape_cast %260 : vector<1x3x576xf32> to vector<3x576xf32>
    %cst_288 = arith.constant dense<0.000000e+00> : vector<64x3xf32>
    %262 = tpu.matmul %250, %261, %cst_288 {dimension_numbers = #tpu.dot_dimension_numbers<[1], [1], [0], [0], [0, 0, 1, 0], [], []>} : vector<64x576xf32>, vector<3x576xf32>, vector<64x3xf32> -> vector<64x3xf32>
    %263 = vector.broadcast %251 : vector<64x1xf32> to vector<64x3xf32>
    %264 = arith.addf %262, %263 : vector<64x3xf32>
    %c0_289 = arith.constant 0 : index
    %c0_290 = arith.constant 0 : index
    %c3_291 = arith.constant 3 : index
    %265 = vector.load %arg9[%c0_289, %c0_290, %c3_291] : memref<1x64x9xf32, #tpu.memory_space<vmem>>, vector<1x64x3xf32>
    %266 = vector.shape_cast %265 : vector<1x64x3xf32> to vector<64x3xf32>
    %267 = vector.shape_cast %264 : vector<64x3xf32> to vector<1x64x3xf32>
    tpu.vector_store %arg9[%c0_289, %c0_290, %c3_291], %267 {strides = array<i32>} : memref<1x64x9xf32, #tpu.memory_space<vmem>>, vector<1x64x3xf32>,
    %c2_292 = arith.constant 2 : index
    %c0_293 = arith.constant 0 : index
    %c0_294 = arith.constant 0 : index
    %268 = vector.load %arg14[%c2_292, %c0_293, %c0_294] : memref<3x3x576xf32, #tpu.memory_space<vmem>>, vector<1x3x576xf32>
    %269 = vector.shape_cast %268 : vector<1x3x576xf32> to vector<3x576xf32>
    %cst_295 = arith.constant dense<0.000000e+00> : vector<64x3xf32>
    %270 = tpu.matmul %250, %269, %cst_295 {dimension_numbers = #tpu.dot_dimension_numbers<[1], [1], [0], [0], [0, 0, 1, 0], [], []>} : vector<64x576xf32>, vector<3x576xf32>, vector<64x3xf32> -> vector<64x3xf32>
    %271 = vector.broadcast %251 : vector<64x1xf32> to vector<64x3xf32>
    %272 = arith.addf %270, %271 : vector<64x3xf32>
    %c0_296 = arith.constant 0 : index
    %c0_297 = arith.constant 0 : index
    %c6_298 = arith.constant 6 : index
    %273 = vector.load %arg9[%c0_296, %c0_297, %c6_298] : memref<1x64x9xf32, #tpu.memory_space<vmem>>, vector<1x64x3xf32>
    %274 = vector.shape_cast %273 : vector<1x64x3xf32> to vector<64x3xf32>
    %275 = vector.shape_cast %272 : vector<64x3xf32> to vector<1x64x3xf32>
    tpu.vector_store %arg9[%c0_296, %c0_297, %c6_298], %275 {strides = array<i32>} : memref<1x64x9xf32, #tpu.memory_space<vmem>>, vector<1x64x3xf32>,
    return
  }
  func.func @transform_0(%arg0: i32) -> (i32, i32, i32, i32) {
    %c0_i32 = arith.constant 0 : i32
    %c0_i32_0 = arith.constant 0 : i32
    %c0_i32_1 = arith.constant 0 : i32
    %c0_i32_2 = arith.constant 0 : i32
    return %arg0, %c0_i32, %c0_i32_0, %c0_i32_1 : i32, i32, i32, i32
  }
  func.func @transform_1(%arg0: i32) -> (i32, i32, i32, i32) {
    %c0_i32 = arith.constant 0 : i32
    %c0_i32_0 = arith.constant 0 : i32
    %c0_i32_1 = arith.constant 0 : i32
    %c0_i32_2 = arith.constant 0 : i32
    return %arg0, %c0_i32, %c0_i32_0, %c0_i32_1 : i32, i32, i32, i32
  }
  func.func @transform_2(%arg0: i32) -> (i32, i32) {
    %c0_i32 = arith.constant 0 : i32
    %c0_i32_0 = arith.constant 0 : i32
    %c0_i32_1 = arith.constant 0 : i32
    return %c0_i32, %c0_i32_0 : i32, i32
  }
  func.func @transform_3(%arg0: i32) -> (i32, i32) {
    %c0_i32 = arith.constant 0 : i32
    %c0_i32_0 = arith.constant 0 : i32
    %c0_i32_1 = arith.constant 0 : i32
    return %c0_i32, %c0_i32_0 : i32, i32
  }
  func.func @transform_4(%arg0: i32) -> (i32, i32) {
    %c0_i32 = arith.constant 0 : i32
    %c0_i32_0 = arith.constant 0 : i32
    %c0_i32_1 = arith.constant 0 : i32
    return %c0_i32, %c0_i32_0 : i32, i32
  }
  func.func @transform_5(%arg0: i32) -> (i32, i32) {
    %c0_i32 = arith.constant 0 : i32
    %c0_i32_0 = arith.constant 0 : i32
    %c0_i32_1 = arith.constant 0 : i32
    return %c0_i32, %c0_i32_0 : i32, i32
  }
  func.func @transform_6(%arg0: i32) -> (i32, i32) {
    %c0_i32 = arith.constant 0 : i32
    %c0_i32_0 = arith.constant 0 : i32
    %c0_i32_1 = arith.constant 0 : i32
    return %c0_i32, %c0_i32_0 : i32, i32
  }
  func.func @transform_7(%arg0: i32) -> (i32, i32) {
    %c0_i32 = arith.constant 0 : i32
    %c0_i32_0 = arith.constant 0 : i32
    %c0_i32_1 = arith.constant 0 : i32
    return %c0_i32, %c0_i32_0 : i32, i32
  }
  func.func @transform_8(%arg0: i32) -> (i32, i32, i32) {
    %c0_i32 = arith.constant 0 : i32
    %c0_i32_0 = arith.constant 0 : i32
    %c0_i32_1 = arith.constant 0 : i32
    return %arg0, %c0_i32, %c0_i32_0 : i32, i32, i32
  }
}

</mosaic_0001>

<bundles_post_ra>
// kernel: encoder_forward.1
= control target key start
LH: loop header
LB: loop body
LE: loop exit
PB: predicated region body
PF: predicated region fallthrough
CT: control target
= control target key end

     0   :  { %s5332_s27 = smov 0   ;;  %s7683_s0 = inlined_call_operand.vmem [shape: f32[2,13,7,64], index: 0, kind: input, shape index: {}]   ;;  %s7684_s1 = inlined_call_operand.vmem [shape: f32[2,13,6,64], index: 1, kind: input, shape index: {}]   ;;  %s7685_s2 = inlined_call_operand.vmem [shape: f32[256,32], index: 2, kind: input, shape index: {}]   ;;  %s7686_s3 = inlined_call_operand.vmem [shape: f32[1,32], index: 3, kind: input, shape index: {}]   ;;  %s7687_s4 = inlined_call_operand.vmem [shape: f32[512,64], index: 4, kind: input, shape index: {}]   ;;  %s7688_s5 = inlined_call_operand.vmem [shape: f32[1,64], index: 5, kind: input, shape index: {}]   ;;  %s7689_s6 = inlined_call_operand.vmem [shape: f32[64,576], index: 6, kind: input, shape index: {}]   ;;  %s7690_s7 = inlined_call_operand.vmem [shape: f32[64,1], index: 7, kind: input, shape index: {}]   ;;  %s7691_s8 = inlined_call_operand.vmem [shape: f32[2,64,9], index: 8, kind: output, shape index: {}]  }
   0x1 LB: > { %s4224_s28 = sadd.s32 4294967295, %s5279_s27   ;;  %p4228_p0 = scmp.ge.s32.totalorder %s5279_s27, 1  ;;  %s5279_s27 = sphi %s5332_s27, %s18_s27  }
   0x2   : > { %p272_p1 = scmp.lt.s32.totalorder %s5279_s27, 3 }
   0x4   : > { %p273_p2 = pnand %p4228_p0, %p272_p1 }
   0x6   : > { %276 = sbr.rel (%p273_p2) target bundleno = 1363 (0x553), region = 52 }
   0xb   : > { %p311_p3 = scmp.lt.s32.totalorder %s4224_s28, 1  ;;  %v5343_v0 = vld [vmem:[%s7685_s2 + $0xf8] sm:$0xff]  ;;  %v5353_v2 = vld [vmem:[%s7685_s2 + $0xf0] sm:$0xff]  ;;  %v5368_v4 = vld [vmem:[%s7685_s2 + $0xe8] sm:$0xff]  ;;  %s5281_s14 = smov 64   ;;  %vm338_vm0 = vcmask 521216  }
   0xc   : > { %v5348_v1 = vld [vmem:[%s7685_s2 + $0x78] sm:$0xff]  ;;  %4313 = vmatprep.subr.mxu0 %v5343_v0  ;;  %v5359_v3 = vld [vmem:[%s7685_s2 + $0x70] sm:$0xff]  ;;  %4351 = vmatprep.subr.mxu1 %v5343_v0  ;;  %v5375_v5 = vld [vmem:[%s7685_s2 + $0x68] sm:$0xff]  ;;  %vm399_vm1 = vcmask 523270   ;;  %vm401_vm2 = vcmask 519168   ;;  %vm485_vm3 = vcmask 1046016  }
   0xd   : > { %s7759_s28 = smov (!%p311_p3, %s4224_s28), 1  ;;  %4314 = vmatpush3.msra.mxu0 %v5348_v1  ;;  %4352 = vmatpush3.msra.mxu1 %v5348_v1  ;;  %v5383_v6 = vld [vmem:[%s7685_s2 + $0xe0] sm:$0xff]  ;;  %v5407_v8 = vld [vmem:[%s7685_s2 + $0xd8] sm:$0xff]  ;;  %v5431_v17 = vld [vmem:[%s7685_s2 + $0xd0] sm:$0xff]  ;;  %vm570_vm4 = vcmask 1048070   ;;  %vm572_vm5 = vcmask 1043968  }
   0xe   : > { %4315 = vmatprep.subr.mxu0 %v5353_v2  ;;  %4353 = vmatprep.subr.mxu1 %v5353_v2  ;;  %s5190_s19 = smul.u32 104, %s7759_s28  ;;  %v5402_v7 = vld [vmem:[%s7685_s2 + $0x60] sm:$0xff]  ;;  %v5416_v11 = vld [vmem:[%s7685_s2 + $0x58] sm:$0xff]  ;;  %v5438_v18 = vld [vmem:[%s7685_s2 + $0x50] sm:$0xff]  ;;  %vm980_vm6 = vcmask 259072   ;;  %s5283_s22 = smov 96  }
   0xf   : > { %4316 = vmatpush3.msra.mxu0 %v5359_v3  ;;  %4354 = vmatpush3.msra.mxu1 %v5359_v3  ;;  %v5446_v21 = vld [vmem:[%s7685_s2 + $0xc8] sm:$0xff]  ;;  %v5462_v24 = vld [vmem:[%s7685_s2 + $0xc0] sm:$0xff]  ;;  %v5480_v29 = vld [vmem:[%s7685_s2 + $0xb8] sm:$0xff]  ;;  %vm990_vm7 = vcmask 523526   ;;  %vm992_vm8 = vcmask 519424   ;;  %vm1078_vm9 = vcmask 783872  }
  0x10   : > { %4317 = vmatprep.subr.mxu0 %v5368_v4  ;;  %4355 = vmatprep.subr.mxu1 %v5368_v4  ;;  %s5391_s24 = scalar_lea.vmem %s7684_s1, %s5190_s19  ;;  %s5396_s29 = scalar_lea.vmem %s7683_s0, %s5190_s19  ;;  %v5455_v23 = vld [vmem:[%s7685_s2 + $0x48] sm:$0xff]  ;;  %v5470_v26 = vld [vmem:[%s7685_s2 + $0x40] sm:$0xff]  ;;  %v5487_v30 = vld [vmem:[%s7685_s2 + $0x38] sm:$0xff]  ;;  %vm1087_vm10 = vcmask 1048326   ;;  %vm1089_vm11 = vcmask 1044224   ;;  %vm2276_vm12 = vcmask 520192  }
  0x11   : > { %4318 = vmatpush3.msra.mxu0 %v5375_v5  ;;  %4356 = vmatpush3.msra.mxu1 %v5375_v5  ;;  %v4257_v9 = vld [vmem:[%s5391_s24 + $0x8] sm:$0x3f]  ;;  %v425_v10 = vld [vmem:[%s5391_s24] sm:$0x3f]  ;;  %v4258_v12 = vld [vmem:[%s5391_s24 + $0x10] sm:$0x3f] }
  0x12   : > { %4319 = vmatprep.subr.mxu0 %v5383_v6  ;;  %4357 = vmatprep.subr.mxu1 %v5383_v6  ;;  %v498_v13 = vld [vmem:[%s5396_s29 + $0x1] sm:$0x3f]  ;;  %v4269_v15 = vld [vmem:[%s5396_s29 + $0x9] sm:$0x3f]  ;;  %v4270_v16 = vld [vmem:[%s5396_s29 + $0x11] sm:$0x3f] }
  0x13   : > { %718 = vrot.lane.b32.xlu0 %v4257_v9, %s5281_s14  ;;  %449 = vrot.lane.b32.xlu1 %v425_v10, %s5281_s14  ;;  %v522_v14 = vrot.slane %v498_v13, 2  ;;  %v790_v19 = vrot.slane %v4269_v15, 2  ;;  %v791_v20 = vrot.slane %v4270_v16, 2  ;;  %v499_v22 = vld [vmem:[%s5396_s29 + $0x9] sm:$0x3f]  ;;  %v5495_v32 = vld [vmem:[%s7685_s2 + $0xb0] sm:$0xff] }
  0x14   : > { %4320 = vmatpush3.msra.mxu0 %v5402_v7  ;;  %4358 = vmatpush3.msra.mxu1 %v5402_v7  ;;  %v523_v25 = vrot.slane %v499_v22, 2  ;;  %v426_v27 = vld [vmem:[%s5391_s24 + $0x8] sm:$0x3f]  ;;  %v4271_v28 = vld [vmem:[%s5396_s29 + $0x19] sm:$0x3f]  ;;  %v5503_v35 = vld [vmem:[%s7685_s2 + $0x30] sm:$0xff] }
  0x15   : > { %4321 = vmatprep.subr.mxu0 %v5407_v8  ;;  %4359 = vmatprep.subr.mxu1 %v5407_v8  ;;  %v792_v31 = vrot.slane %v4271_v28, 2  ;;  %v4259_v33 = vld [vmem:[%s5391_s24 + $0x18] sm:$0x3f]  ;;  %v500_v34 = vld [vmem:[%s5396_s29 + $0x11] sm:$0x3f]  ;;  %v5511_v37 = vld [vmem:[%s7685_s2 + $0xa8] sm:$0xff] }
  0x16   : > { %4322 = vmatpush3.msra.mxu0 %v5416_v11  ;;  %4360 = vmatpush3.msra.mxu1 %v5416_v11  ;;  %v4233_v36 = vld [vmem:[%s5396_s29 + $0x8] sm:$0x3f]  ;;  %v427_v39 = vld [vmem:[%s5391_s24 + $0x10] sm:$0x3f]  ;;  %v4272_v40 = vld [vmem:[%s5396_s29 + $0x21] sm:$0x3f] }
  0x17   : > { %720 = vrot.lane.b32.xlu0 %v4258_v12, %s5281_s14  ;;  %534 = vrot.lane.b32.xlu1 %v522_v14, %s5281_s14  ;;  %v5517_v38 = vld [vmem:[%s7685_s2 + $0x28] sm:$0xff]  ;;  %609 = vst.msk [vmem:[#allocation2 + $0x8] sm:$0x3f] %vm338_vm0, %v4233_v36  ;;  %v326_v41 = vld [vmem:[%s5396_s29] sm:$0x3f]  ;;  %v524_v43 = vrot.slane %v500_v34, 2 }
  0x18   : > { %4323 = vmatprep.subr.mxu0 %v5431_v17  ;;  %4361 = vmatprep.subr.mxu1 %v5431_v17  ;;  %v4234_v42 = vld [vmem:[%s5396_s29 + $0x10] sm:$0x3f]  ;;  %339 = vst.msk [vmem:[#allocation2] sm:$0x3f] %vm338_vm0, %v326_v41  ;;  %v351_v44 = vld [vmem:[%s5391_s24] sm:$0x3f] }
  0x19   : > { %4324 = vmatpush3.msra.mxu0 %v5438_v18  ;;  %4362 = vmatpush3.msra.mxu1 %v5438_v18  ;;  %610 = vst.msk [vmem:[#allocation2 + $0x28] sm:$0x3f] %vm338_vm0, %v4234_v42  ;;  %v4245_v45 = vld [vmem:[%s5391_s24 + $0x8] sm:$0x3f]  ;;  %v375_v46 = vrot.slane %v351_v44, 2  ;;  %v5540_v50 = vld [vmem:[%s7685_s2 + $0xa0] sm:$0xff] }
  0x1a   : > { %4325 = vmatprep.subr.mxu0 %v5446_v21  ;;  %4363 = vmatprep.subr.mxu1 %v5446_v21  ;;  %v646_v47 = vrot.slane %v4245_v45, 2  ;;  %v4246_v48 = vld [vmem:[%s5391_s24 + $0x10] sm:$0x3f]  ;;  %v327_v49 = vld [vmem:[%s5396_s29 + $0x8] sm:$0x3f]  ;;  %v5551_v53 = vld [vmem:[%s7685_s2 + $0x20] sm:$0xff] }
  0x1b   : > { %802 = vrot.lane.b32.xlu0 %v790_v19, %s5281_s14  ;;  %804 = vrot.lane.b32.xlu1 %v791_v20, %s5281_s14  ;;  %v647_v51 = vrot.slane %v4246_v48, 2  ;;  %340 = vst.msk [vmem:[#allocation2 + $0x20] sm:$0x3f] %vm338_vm0, %v327_v49  ;;  %v352_v52 = vld [vmem:[%s5391_s24 + $0x8] sm:$0x3f]  ;;  %v793_v55 = vrot.slane %v4272_v40, 2 }
  0x1c   : > { %4326 = vmatpush3.msra.mxu0 %v5455_v23  ;;  %4364 = vmatpush3.msra.mxu1 %v5455_v23  ;;  %400 = vst.msk [vmem:[#allocation2] sm:$0xc0] %vm399_vm1, %v375_v46  ;;  %670 = vst.msk [vmem:[#allocation2 + $0x8] sm:$0xc0] %vm399_vm1, %v646_v47  ;;  %v376_v54 = vrot.slane %v352_v52, 2  ;;  %v5563_v56 = vld [vmem:[%s7685_s2 + $0x98] sm:$0xff] }
  0x1d   : > { %4327 = vmatprep.subr.mxu0 %v5462_v24  ;;  %4365 = vmatprep.subr.mxu1 %v5462_v24  ;;  %402 = vst.msk [vmem:[#allocation2 + $0x10] sm:$0xf] %vm401_vm2, %v375_v46  ;;  %671 = vst.msk [vmem:[#allocation2 + $0x18] sm:$0xf] %vm401_vm2, %v646_v47  ;;  %v4260_v57 = vld [vmem:[%s5391_s24 + $0x20] sm:$0x3f] }
  0x1e   : > { %4328 = vmatpush3.msra.mxu0 %v5470_v26  ;;  %4366 = vmatpush3.msra.mxu1 %v5470_v26  ;;  %672 = vst.msk [vmem:[#allocation2 + $0x28] sm:$0xc0] %vm399_vm1, %v647_v51  ;;  %v501_v58 = vld [vmem:[%s5396_s29 + $0x19] sm:$0x3f]  ;;  %403 = vst.msk [vmem:[#allocation2 + $0x20] sm:$0xc0] %vm399_vm1, %v376_v54 }
  0x1f   : > { %451 = vrot.lane.b32.xlu0 %v426_v27, %s5281_s14  ;;  %536 = vrot.lane.b32.xlu1 %v523_v25, %s5281_s14  ;;  %673 = vst.msk [vmem:[#allocation2 + $0x38] sm:$0xf] %vm401_vm2, %v647_v51  ;;  %404 = vst.msk [vmem:[#allocation2 + $0x30] sm:$0xf] %vm401_vm2, %v376_v54  ;;  %v5575_v59 = vld [vmem:[%s7685_s2 + $0x18] sm:$0xff]  ;;  %v5583_v61 = vld [vmem:[%s7685_s2 + $0x90] sm:$0xff] }
  0x20   : > { %4329 = vmatprep.subr.mxu0 %v5480_v29  ;;  %4367 = vmatprep.subr.mxu1 %v5480_v29  ;;  %v4235_v60 = vld [vmem:[%s5396_s29 + $0x18] sm:$0x3f]  ;;  %v328_v63 = vld [vmem:[%s5396_s29 + $0x10] sm:$0x3f]  ;;  %v525_v9 = vrot.slane %v501_v58, 2  ;;  %v5606_v19 = vld [vmem:[%s7685_s2 + $0x88] sm:$0xff] }
  0x21   : > { %4330 = vmatpush3.msra.mxu0 %v5487_v30  ;;  %4368 = vmatpush3.msra.mxu1 %v5487_v30  ;;  %611 = vst.msk [vmem:[#allocation2 + $0x48] sm:$0x3f] %vm338_vm0, %v4235_v60  ;;  %v4247_v62 = vld [vmem:[%s5391_s24 + $0x18] sm:$0x3f]  ;;  %v5594_v10 = vld [vmem:[%s7685_s2 + $0x10] sm:$0xff]  ;;  %v5615_v20 = vld [vmem:[%s7685_s2 + $0x8] sm:$0xff] }
  0x22   : > { %4331 = vmatprep.subr.mxu0 %v5495_v32  ;;  %4369 = vmatprep.subr.mxu1 %v5495_v32  ;;  %v648_v12 = vrot.slane %v4247_v62, 2  ;;  %341 = vst.msk [vmem:[#allocation2 + $0x40] sm:$0x3f] %vm338_vm0, %v328_v63  ;;  %v353_v13 = vld [vmem:[%s5391_s24 + $0x10] sm:$0x3f]  ;;  %v5627_v28 = vld [vmem:[%s7685_s2 + $0x80] sm:$0xff] }
  0x23   : > { %722 = vrot.lane.b32.xlu0 %v4259_v33, %s5281_s14  ;;  %806 = vrot.lane.b32.xlu1 %v792_v31, %s5281_s14  ;;  %v428_v14 = vld [vmem:[%s5391_s24 + $0x18] sm:$0x3f]  ;;  %v4273_v15 = vld [vmem:[%s5396_s29 + $0x29] sm:$0x3f]  ;;  %v377_v16 = vrot.slane %v353_v13, 2  ;;  %vm2869_vm13 = vcmask 518144  }
  0x24   : > { %4332 = vmatpush3.msra.mxu0 %v5503_v35  ;;  %4370 = vmatpush3.msra.mxu1 %v5503_v35  ;;  %674 = vst.msk [vmem:[#allocation2 + $0x48] sm:$0xc0] %vm399_vm1, %v648_v12  ;;  %v4236_v22 = vld [vmem:[%s5396_s29 + $0x20] sm:$0x3f]  ;;  %v794_v27 = vrot.slane %v4273_v15, 2  ;;  %vm2888_vm14 = vcmask 1042944  }
  0x25   : > { %4333 = vmatprep.subr.mxu0 %v5511_v37  ;;  %4371 = vmatprep.subr.mxu1 %v5511_v37  ;;  %675 = vst.msk [vmem:[#allocation2 + $0x58] sm:$0xf] %vm401_vm2, %v648_v12  ;;  %406 = vst.msk [vmem:[#allocation2 + $0x50] sm:$0xf] %vm401_vm2, %v377_v16  ;;  %v4248_v25 = vld [vmem:[%s5391_s24 + $0x20] sm:$0x3f] }
  0x26   : > { %4334 = vmatpush3.msra.mxu0 %v5517_v38  ;;  %4372 = vmatpush3.msra.mxu1 %v5517_v38  ;;  %405 = vst.msk [vmem:[#allocation2 + $0x40] sm:$0xc0] %vm399_vm1, %v377_v16  ;;  %v649_v31 = vrot.slane %v4248_v25, 2  ;;  %v4261_v33 = vld [vmem:[%s5391_s24 + $0x28] sm:$0x3f]  ;;  %vm3068_vm15 = vcmask 523264  }
  0x27   : > { %453 = vrot.lane.b32.xlu0 %v427_v39, %s5281_s14  ;;  %538 = vrot.lane.b32.xlu1 %v524_v43, %s5281_s14  ;;  %612 = vst.msk [vmem:[#allocation2 + $0x68] sm:$0x3f] %vm338_vm0, %v4236_v22  ;;  %v502_v34 = vld [vmem:[%s5396_s29 + $0x21] sm:$0x3f]  ;;  %v354_v36 = vld [vmem:[%s5391_s24 + $0x18] sm:$0x3f] }
  0x28   : > { %4335 = vmatprep.subr.mxu0 %v5540_v50  ;;  %4373 = vmatprep.subr.mxu1 %v5540_v50  ;;  %v5639_v39 = vld [vmem:[%s7685_s2] sm:$0xff]  ;;  %676 = vst.msk [vmem:[#allocation2 + $0x68] sm:$0xc0] %vm399_vm1, %v649_v31  ;;  %v378_v40 = vrot.slane %v354_v36, 2  ;;  %v329_v41 = vld [vmem:[%s5396_s29 + $0x18] sm:$0x3f] }
  0x29   : > { %4336 = vmatpush3.msra.mxu0 %v5551_v53  ;;  %4374 = vmatpush3.msra.mxu1 %v5551_v53  ;;  %677 = vst.msk [vmem:[#allocation2 + $0x78] sm:$0xf] %vm401_vm2, %v649_v31  ;;  %v526_v42 = vrot.slane %v502_v34, 2  ;;  %v429_v43 = vld [vmem:[%s5391_s24 + $0x20] sm:$0x3f] }
  0x2a   : > { %4337 = vmatprep.subr.mxu0 %v5563_v56  ;;  %4375 = vmatprep.subr.mxu1 %v5563_v56  ;;  %342 = vst.msk [vmem:[#allocation2 + $0x60] sm:$0x3f] %vm338_vm0, %v329_v41  ;;  %v4274_v44 = vld [vmem:[%s5396_s29 + $0x31] sm:$0x3f]  ;;  %v503_v47 = vld [vmem:[%s5396_s29 + $0x29] sm:$0x3f] }
  0x2b   : > { %724 = vrot.lane.b32.xlu0 %v4260_v57, %s5281_s14  ;;  %808 = vrot.lane.b32.xlu1 %v793_v55, %s5281_s14  ;;  %407 = vst.msk [vmem:[#allocation2 + $0x60] sm:$0xc0] %vm399_vm1, %v378_v40  ;;  %v795_v45 = vrot.slane %v4274_v44, 2  ;;  %v4262_v46 = vld [vmem:[%s5391_s24 + $0x30] sm:$0x3f]  ;;  %v527_v48 = vrot.slane %v503_v47, 2 }
  0x2c   : > { %4338 = vmatpush3.msra.mxu0 %v5575_v59  ;;  %4376 = vmatpush3.msra.mxu1 %v5575_v59  ;;  %408 = vst.msk [vmem:[#allocation2 + $0x70] sm:$0xf] %vm401_vm2, %v378_v40  ;;  %v430_v49 = vld [vmem:[%s5391_s24 + $0x28] sm:$0x3f]  ;;  %v4275_v51 = vld [vmem:[%s5396_s29 + $0x39] sm:$0x3f] }
  0x2d   : > { %4339 = vmatprep.subr.mxu0 %v5583_v61  ;;  %4377 = vmatprep.subr.mxu1 %v5583_v61  ;;  %v796_v52 = vrot.slane %v4275_v51, 2  ;;  %v4263_v54 = vld [vmem:[%s5391_s24 + $0x38] sm:$0x3f]  ;;  %v504_v55 = vld [vmem:[%s5396_s29 + $0x31] sm:$0x3f] }
  0x2e   : > { %4340 = vmatpush3.msra.mxu0 %v5594_v10  ;;  %4378 = vmatpush3.msra.mxu1 %v5594_v10  ;;  %v528_v57 = vrot.slane %v504_v55, 2  ;;  %v431_v58 = vld [vmem:[%s5391_s24 + $0x30] sm:$0x3f]  ;;  %v4276_v60 = vld [vmem:[%s5396_s29 + $0x41] sm:$0x3f] }
  0x2f   : > { %455 = vrot.lane.b32.xlu0 %v428_v14, %s5281_s14  ;;  %540 = vrot.lane.b32.xlu1 %v525_v9, %s5281_s14  ;;  %v797_v62 = vrot.slane %v4276_v60, 2  ;;  %v4264_v63 = vld [vmem:[%s5391_s24 + $0x40] sm:$0x3f]  ;;  %v505_v9 = vld [vmem:[%s5396_s29 + $0x39] sm:$0x3f] }
  0x30   : > { %4341 = vmatprep.subr.mxu0 %v5606_v19  ;;  %4379 = vmatprep.subr.mxu1 %v5606_v19  ;;  %v4237_v12 = vld [vmem:[%s5396_s29 + $0x28] sm:$0x3f]  ;;  %v529_v14 = vrot.slane %v505_v9, 2  ;;  %v432_v16 = vld [vmem:[%s5391_s24 + $0x38] sm:$0x3f] }
  0x31   : > { %4342 = vmatpush3.msra.mxu0 %v5615_v20  ;;  %4380 = vmatpush3.msra.mxu1 %v5615_v20  ;;  %v4249_v13 = vld [vmem:[%s5391_s24 + $0x28] sm:$0x3f]  ;;  %613 = vst.msk [vmem:[#allocation2 + $0x88] sm:$0x3f] %vm338_vm0, %v4237_v12  ;;  %v330_v25 = vld [vmem:[%s5396_s29 + $0x20] sm:$0x3f] }
  0x32   : > { %4343 = vmatprep.subr.mxu0 %v5627_v28  ;;  %4381 = vmatprep.subr.mxu1 %v5627_v28  ;;  %v650_v15 = vrot.slane %v4249_v13, 2  ;;  %v4277_v22 = vld [vmem:[%s5396_s29 + $0x49] sm:$0x3f]  ;;  %343 = vst.msk [vmem:[#allocation2 + $0x80] sm:$0x3f] %vm338_vm0, %v330_v25 }
  0x33   : > { %726 = vrot.lane.b32.xlu0 %v4261_v33, %s5281_s14  ;;  %810 = vrot.lane.b32.xlu1 %v794_v27, %s5281_s14  ;;  %v355_v27 = vld [vmem:[%s5391_s24 + $0x20] sm:$0x3f]  ;;  %v798_v31 = vrot.slane %v4277_v22, 2  ;;  %v4265_v34 = vld [vmem:[%s5391_s24 + $0x48] sm:$0x3f] }
  0x34   : > { %4344 = vmatpush3.msra.mxu0 %v5639_v39  ;;  %4382 = vmatpush3.msra.mxu1 %v5639_v39  ;;  %678 = vst.msk [vmem:[#allocation2 + $0x88] sm:$0xc0] %vm399_vm1, %v650_v15  ;;  %v379_v33 = vrot.slane %v355_v27, 2  ;;  %v506_v36 = vld [vmem:[%s5396_s29 + $0x41] sm:$0x3f] }
  0x35   : > { %4389 = vmatprep.subr.mxu0 %v5343_v0  ;;  %4427 = vmatprep.subr.mxu1 %v5343_v0  ;;  %679 = vst.msk [vmem:[#allocation2 + $0x98] sm:$0xf] %vm401_vm2, %v650_v15  ;;  %v4238_v40 = vld [vmem:[%s5396_s29 + $0x30] sm:$0x3f]  ;;  %v433_v44 = vld [vmem:[%s5391_s24 + $0x40] sm:$0x3f] }
  0x36   : > { %409 = vst.msk [vmem:[#allocation2 + $0x80] sm:$0xc0] %vm399_vm1, %v379_v33  ;;  %v4250_v41 = vld [vmem:[%s5391_s24 + $0x30] sm:$0x3f]  ;;  %v434_v55 = vld [vmem:[%s5391_s24 + $0x48] sm:$0x3f] }
  0x37   : > { %457 = vrot.lane.b32.xlu0 %v429_v43, %s5281_s14  ;;  %542 = vrot.lane.b32.xlu1 %v526_v42, %s5281_s14  ;;  %410 = vst.msk [vmem:[#allocation2 + $0x90] sm:$0xf] %vm401_vm2, %v379_v33  ;;  %v530_v42 = vrot.slane %v506_v36, 2  ;;  %v651_v43 = vrot.slane %v4250_v41, 2  ;;  %v4266_v51 = vld [vmem:[%s5391_s24 + $0x50] sm:$0x3f] }
  0x38   : > { %614 = vst.msk [vmem:[#allocation2 + $0xa8] sm:$0x3f] %vm338_vm0, %v4238_v40  ;;  %v4267_v60 = vld [vmem:[%s5391_s24 + $0x58] sm:$0x3f]  ;;  %v435_v9 = vld [vmem:[%s5391_s24 + $0x50] sm:$0x3f] }
  0x39   : > { %680 = vst.msk [vmem:[#allocation2 + $0xa8] sm:$0xc0] %vm399_vm1, %v651_v43  ;;  %v4280_v12 = vld [vmem:[%s5396_s29 + $0x61] sm:$0x3f]  ;;  %v509_v15 = vld [vmem:[%s5396_s29 + $0x59] sm:$0x3f] }
  0x3a   : > { %681 = vst.msk [vmem:[#allocation2 + $0xb8] sm:$0xf] %vm401_vm2, %v651_v43  ;;  %v801_v13 = vrot.slane %v4280_v12, 2  ;;  %v436_v22 = vld [vmem:[%s5391_s24 + $0x58] sm:$0x3f] }
  0x3b   : > { %728 = vrot.lane.b32.xlu0 %v4262_v46, %s5281_s14  ;;  %812 = vrot.lane.b32.xlu1 %v795_v45, %s5281_s14  ;;  %v4278_v45 = vld [vmem:[%s5396_s29 + $0x51] sm:$0x3f]  ;;  %v356_v46 = vld [vmem:[%s5391_s24 + $0x28] sm:$0x3f] }
  0x3c   : > { %v380_v47 = vrot.slane %v356_v46, 2  ;;  %v4251_v25 = vld [vmem:[%s5391_s24 + $0x38] sm:$0x3f]  ;;  %v357_v33 = vld [vmem:[%s5391_s24 + $0x30] sm:$0x3f] }
  0x3d   : > { %v4239_v27 = vld [vmem:[%s5396_s29 + $0x38] sm:$0x3f]  ;;  %v381_v36 = vrot.slane %v357_v33, 2  ;;  %v4252_v40 = vld [vmem:[%s5391_s24 + $0x40] sm:$0x3f] }
  0x3e   : > { %411 = vst.msk [vmem:[#allocation2 + $0xa0] sm:$0xc0] %vm399_vm1, %v380_v47  ;;  %v4240_v41 = vld [vmem:[%s5396_s29 + $0x40] sm:$0x3f]  ;;  %v358_v43 = vld [vmem:[%s5391_s24 + $0x38] sm:$0x3f] }
  0x3f   : > { %459 = vrot.lane.b32.xlu0 %v430_v49, %s5281_s14  ;;  %544 = vrot.lane.b32.xlu1 %v527_v48, %s5281_s14  ;;  %v331_v48 = vld [vmem:[%s5396_s29 + $0x28] sm:$0x3f]  ;;  %v799_v49 = vrot.slane %v4278_v45, 2  ;;  %412 = vst.msk [vmem:[#allocation2 + $0xb0] sm:$0xf] %vm401_vm2, %v380_v47  ;;  %v382_v45 = vrot.slane %v358_v43, 2 }
  0x40   : > { %344 = vst.msk [vmem:[#allocation2 + $0xa0] sm:$0x3f] %vm338_vm0, %v331_v48  ;;  %615 = vst.msk [vmem:[#allocation2 + $0xc8] sm:$0x3f] %vm338_vm0, %v4239_v27  ;;  %v4254_v33 = vld [vmem:[%s5391_s24 + $0x50] sm:$0x3f] }
  0x41   : > { %413 = vst.msk [vmem:[#allocation2 + $0xc0] sm:$0xc0] %vm399_vm1, %v381_v36  ;;  %415 = vst.msk [vmem:[#allocation2 + $0xe0] sm:$0xc0] %vm399_vm1, %v382_v45 }
  0x42   : > { %414 = vst.msk [vmem:[#allocation2 + $0xd0] sm:$0xf] %vm401_vm2, %v381_v36  ;;  %416 = vst.msk [vmem:[#allocation2 + $0xf0] sm:$0xf] %vm401_vm2, %v382_v45  ;;  %v655_v36 = vrot.slane %v4254_v33, 2 }
  0x43   : > { %730 = vrot.lane.b32.xlu0 %v4263_v54, %s5281_s14  ;;  %814 = vrot.lane.b32.xlu1 %v796_v52, %s5281_s14  ;;  %v507_v52 = vld [vmem:[%s5396_s29 + $0x49] sm:$0x3f]  ;;  %616 = vst.msk [vmem:[#allocation2 + $0xe8] sm:$0x3f] %vm338_vm0, %v4240_v41 }
  0x44   : > { %v531_v54 = vrot.slane %v507_v52, 2  ;;  %688 = vst.msk [vmem:[#allocation2 + $0x128] sm:$0xc0] %vm399_vm1, %v655_v36 }
  0x45   : > { %689 = vst.msk [vmem:[#allocation2 + $0x138] sm:$0xf] %vm401_vm2, %v655_v36  ;;  %v5951_v36 = vld [vmem:[%s7685_s2 + $0x60] sm:$0xff] }
  0x47   : > { %461 = vrot.lane.b32.xlu0 %v431_v58, %s5281_s14  ;;  %546 = vrot.lane.b32.xlu1 %v528_v57, %s5281_s14  ;;  %v4279_v57 = vld [vmem:[%s5396_s29 + $0x59] sm:$0x3f] }
  0x48   : > { %v800_v58 = vrot.slane %v4279_v57, 2  ;;  %v4253_v57 = vld [vmem:[%s5391_s24 + $0x48] sm:$0x3f] }
  0x4b   : > { %732 = vrot.lane.b32.xlu0 %v4264_v63, %s5281_s14  ;;  %816 = vrot.lane.b32.xlu1 %v797_v62, %s5281_s14  ;;  %v508_v62 = vld [vmem:[%s5396_s29 + $0x51] sm:$0x3f] }
  0x4c   : > { %v532_v63 = vrot.slane %v508_v62, 2 }
  0x4f   : > { %463 = vrot.lane.b32.xlu0 %v432_v16, %s5281_s14  ;;  %548 = vrot.lane.b32.xlu1 %v529_v14, %s5281_s14  ;;  %v4268_v14 = vld [vmem:[%s5391_s24 + $0x60] sm:$0x3f]  ;;  %v533_v16 = vrot.slane %v509_v15, 2 }
  0x50   : > { %v359_v15 = vld [vmem:[%s5391_s24 + $0x40] sm:$0x3f] }
  0x53   : > { %734 = vrot.lane.b32.xlu0 %v4265_v34, %s5281_s14  ;;  %818 = vrot.lane.b32.xlu1 %v798_v31, %s5281_s14  ;;  %v652_v31 = vrot.slane %v4251_v25, 2  ;;  %v332_v34 = vld [vmem:[%s5396_s29 + $0x30] sm:$0x3f] }
  0x54   : > { %345 = vst.msk [vmem:[#allocation2 + $0xc0] sm:$0x3f] %vm338_vm0, %v332_v34  ;;  %v4242_v34 = vld [vmem:[%s5396_s29 + $0x50] sm:$0x3f] }
  0x55   : > { %682 = vst.msk [vmem:[#allocation2 + $0xc8] sm:$0xc0] %vm399_vm1, %v652_v31 }
  0x56   : > { %683 = vst.msk [vmem:[#allocation2 + $0xd8] sm:$0xf] %vm401_vm2, %v652_v31 }
  0x57   : > { %465 = vrot.lane.b32.xlu0 %v433_v44, %s5281_s14  ;;  %550 = vrot.lane.b32.xlu1 %v530_v42, %s5281_s14  ;;  %v653_v42 = vrot.slane %v4252_v40, 2  ;;  %v333_v44 = vld [vmem:[%s5396_s29 + $0x38] sm:$0x3f]  ;;  %618 = vst.msk [vmem:[#allocation2 + $0x128] sm:$0x3f] %vm338_vm0, %v4242_v34 }
  0x58   : > { %346 = vst.msk [vmem:[#allocation2 + $0xe0] sm:$0x3f] %vm338_vm0, %v333_v44  ;;  %v337_v34 = vld [vmem:[%s5396_s29 + $0x58] sm:$0x3f] }
  0x59   : > { %684 = vst.msk [vmem:[#allocation2 + $0xe8] sm:$0xc0] %vm399_vm1, %v653_v42 }
  0x5a   : > { %685 = vst.msk [vmem:[#allocation2 + $0xf8] sm:$0xf] %vm401_vm2, %v653_v42  ;;  %v360_v42 = vld [vmem:[%s5391_s24 + $0x48] sm:$0x3f] }
  0x5b   : > { %736 = vrot.lane.b32.xlu0 %v4266_v51, %s5281_s14  ;;  %820 = vrot.lane.b32.xlu1 %v799_v49, %s5281_s14  ;;  %v384_v45 = vrot.slane %v360_v42, 2  ;;  %350 = vst.msk [vmem:[#allocation2 + $0x160] sm:$0x3f] %vm338_vm0, %v337_v34 }
  0x5d   : > { %419 = vst.msk [vmem:[#allocation2 + $0x120] sm:$0xc0] %vm399_vm1, %v384_v45 }
  0x5e   : > { %420 = vst.msk [vmem:[#allocation2 + $0x130] sm:$0xf] %vm401_vm2, %v384_v45  ;;  %v5985_v45 = vld [vmem:[%s7685_s2 + $0x50] sm:$0xff] }
  0x5f   : > { %467 = vrot.lane.b32.xlu0 %v434_v55, %s5281_s14  ;;  %552 = vrot.lane.b32.xlu1 %v531_v54, %s5281_s14 }
  0x63   : > { %738 = vrot.lane.b32.xlu0 %v4267_v60, %s5281_s14  ;;  %822 = vrot.lane.b32.xlu1 %v800_v58, %s5281_s14  ;;  %v4241_v58 = vld [vmem:[%s5396_s29 + $0x48] sm:$0x3f]  ;;  %v654_v60 = vrot.slane %v4253_v57, 2 }
  0x64   : > { %617 = vst.msk [vmem:[#allocation2 + $0x108] sm:$0x3f] %vm338_vm0, %v4241_v58 }
  0x65   : > { %686 = vst.msk [vmem:[#allocation2 + $0x108] sm:$0xc0] %vm399_vm1, %v654_v60 }
  0x66   : > { %687 = vst.msk [vmem:[#allocation2 + $0x118] sm:$0xf] %vm401_vm2, %v654_v60  ;;  %v5905_v60 = vld [vmem:[%s7685_s2 + $0x70] sm:$0xff] }
  0x67   : > { %469 = vrot.lane.b32.xlu0 %v435_v9, %s5281_s14  ;;  %554 = vrot.lane.b32.xlu1 %v532_v63, %s5281_s14 }
  0x6b   : > { %740 = vrot.lane.b32.xlu0 %v4268_v14, %s5281_s14  ;;  %824 = vrot.lane.b32.xlu1 %v801_v13, %s5281_s14  ;;  %v334_v14 = vld [vmem:[%s5396_s29 + $0x40] sm:$0x3f] }
  0x6c   : > { %347 = vst.msk [vmem:[#allocation2 + $0x100] sm:$0x3f] %vm338_vm0, %v334_v14  ;;  %v5923_v14 = vld [vmem:[%s7685_s2 + $0xe8] sm:$0xff] }
  0x6f   : > { %471 = vrot.lane.b32.xlu0 %v436_v22, %s5281_s14  ;;  %556 = vrot.lane.b32.xlu1 %v533_v16, %s5281_s14  ;;  %v383_v22 = vrot.slane %v359_v15, 2  ;;  %v362_v15 = vld [vmem:[%s5391_s24 + $0x58] sm:$0x3f] }
  0x71   : > { %417 = vst.msk [vmem:[#allocation2 + $0x100] sm:$0xc0] %vm399_vm1, %v383_v22 }
  0x72   : > { %418 = vst.msk [vmem:[#allocation2 + $0x110] sm:$0xf] %vm401_vm2, %v383_v22 }
  0x85   : > { %v719_v46 = vpop.permute.xlu0 %718  ;;  %v450_v47 = vpop.permute.xlu1 %449 }
  0x86   : > { %754 = vst.msk [vmem:[#allocation2 + $0x8] sm:$0x3f] %vm485_vm3, %v719_v46  ;;  %486 = vst.msk [vmem:[#allocation2] sm:$0x3f] %vm485_vm3, %v450_v47 }
  0x89   : > { %v721_v48 = vpop.permute.xlu0 %720  ;;  %v535_v49 = vpop.permute.xlu1 %534 }
  0x8a   : > { %755 = vst.msk [vmem:[#allocation2 + $0x28] sm:$0x3f] %vm485_vm3, %v721_v48 }
  0x8b   : > { %571 = vst.msk [vmem:[#allocation2] sm:$0xc0] %vm570_vm4, %v535_v49 }
  0x8c   : > { %573 = vst.msk [vmem:[#allocation2 + $0x10] sm:$0xf] %vm572_vm5, %v535_v49  ;;  %v336_v49 = vld [vmem:[%s5396_s29 + $0x50] sm:$0x3f] }
  0x8d   : > { %v803_v51 = vpop.permute.xlu0 %802  ;;  %v805_v52 = vpop.permute.xlu1 %804  ;;  %349 = vst.msk [vmem:[#allocation2 + $0x140] sm:$0x3f] %vm338_vm0, %v336_v49 }
  0x8e   : > { %838 = vst.msk [vmem:[#allocation2 + $0x8] sm:$0xc0] %vm570_vm4, %v803_v51  ;;  %840 = vst.msk [vmem:[#allocation2 + $0x28] sm:$0xc0] %vm570_vm4, %v805_v52 }
  0x8f   : > { %839 = vst.msk [vmem:[#allocation2 + $0x18] sm:$0xf] %vm572_vm5, %v803_v51  ;;  %841 = vst.msk [vmem:[#allocation2 + $0x38] sm:$0xf] %vm572_vm5, %v805_v52  ;;  %v361_v51 = vld [vmem:[%s5391_s24 + $0x50] sm:$0x3f] }
  0x90   : > { %v385_v52 = vrot.slane %v361_v51, 2  ;;  %v6161_v51 = vld [vmem:[%s7685_s2 + $0x98] sm:$0xff] }
  0x91   : > { %v452_v54 = vpop.permute.xlu0 %451  ;;  %v537_v55 = vpop.permute.xlu1 %536 }
  0x92   : > { %487 = vst.msk [vmem:[#allocation2 + $0x20] sm:$0x3f] %vm485_vm3, %v452_v54  ;;  %v895_v13 = vld [vmem:[#allocation2] sm:$0xff]  ;;  %v5897_v54 = vld [vmem:[%s7685_s2 + $0xf0] sm:$0xff] }
  0x93   : > { %574 = vst.msk [vmem:[#allocation2 + $0x20] sm:$0xc0] %vm570_vm4, %v537_v55  ;;  %v897_v40 = vld [vmem:[#allocation2 + $0x10] sm:$0xf] }
  0x94   : > { %575 = vst.msk [vmem:[#allocation2 + $0x30] sm:$0xf] %vm572_vm5, %v537_v55 }
  0x95   : > { %v896_v62 = vld [vmem:[#allocation2 + $0x8] sm:$0xff]  ;;  %v723_v9 = vpop.permute.xlu0 %722  ;;  %v807_v12 = vpop.permute.xlu1 %806  ;;  %421 = vst.msk [vmem:[#allocation2 + $0x140] sm:$0xc0] %vm399_vm1, %v385_v52 }
  0x96   : > { %v996_v63 = vld [vmem:[#allocation2 + $0x28] sm:$0xff]  ;;  %969 = vmatprep.mubr.f32.mxu0 %v896_v62  ;;  %756 = vst.msk [vmem:[#allocation2 + $0x48] sm:$0x3f] %vm485_vm3, %v723_v9  ;;  %v898_v16 = vld [vmem:[#allocation2 + $0x18] sm:$0xf] }
  0x97   : > { %1063 = vmatprep.mubr.f32.mxu1 %v996_v63  ;;  %842 = vst.msk [vmem:[#allocation2 + $0x48] sm:$0xc0] %vm570_vm4, %v807_v12  ;;  %970 = vmatmul.mubr.f32.vlgmr.msra.gmra.mxu0 %v895_v13  ;;  %v998_v41 = vld [vmem:[#allocation2 + $0x38] sm:$0xf]  ;;  %v4244_v9 = vld [vmem:[%s5396_s29 + $0x60] sm:$0x3f] }
  0x98   : > { %843 = vst.msk [vmem:[#allocation2 + $0x58] sm:$0xf] %vm572_vm5, %v807_v12  ;;  %4390 = vmatpush3.msra.mxu0 %v5348_v1  ;;  %974 = vmatprep.mubr.f32.mxu0 %v898_v16  ;;  %v5911_v62 = vld [vmem:[%s7685_s2 + $0xf8] sm:$0xff]  ;;  %v4256_v12 = vld [vmem:[%s5391_s24 + $0x60] sm:$0x3f]  ;;  %v5931_v16 = vld [vmem:[%s7685_s2 + $0x68] sm:$0xff] }
  0x99   : > { %4391 = vmatprep.subr.mxu0 %v5353_v2  ;;  %v454_v27 = vpop.permute.xlu0 %453  ;;  %v539_v31 = vpop.permute.xlu1 %538  ;;  %422 = vst.msk [vmem:[#allocation2 + $0x150] sm:$0xf] %vm401_vm2, %v385_v52  ;;  %v657_v13 = vrot.slane %v4256_v12, 2  ;;  %v6168_v52 = vld [vmem:[%s7685_s2 + $0x18] sm:$0xff]  ;;  %v6210_v12 = vld [vmem:[%s7685_s2] sm:$0xff] }
  0x9a   : > { %v995_v25 = vld [vmem:[#allocation2 + $0x20] sm:$0xff]  ;;  %4392 = vmatpush3.msra.mxu0 %v5359_v3  ;;  %488 = vst.msk [vmem:[#allocation2 + $0x40] sm:$0x3f] %vm485_vm3, %v454_v27  ;;  %v386_v27 = vrot.slane %v362_v15, 2 }
  0x9b   : > { %1064 = vmatmul.mubr.f32.vlgmr.msra.gmra.mxu1 %v995_v25  ;;  %576 = vst.msk [vmem:[#allocation2 + $0x40] sm:$0xc0] %vm570_vm4, %v539_v31  ;;  %4393 = vmatprep.subr.mxu0 %v5368_v4  ;;  %v997_v46 = vld [vmem:[#allocation2 + $0x30] sm:$0xf] }
  0x9c   : > { %577 = vst.msk [vmem:[#allocation2 + $0x50] sm:$0xf] %vm572_vm5, %v539_v31  ;;  %4428 = vmatpush3.msra.mxu1 %v5348_v1  ;;  %975 = vmatmul.mubr.f32.gmra.mxu0 %v897_v40  ;;  %v335_v1 = vld [vmem:[%s5396_s29 + $0x48] sm:$0x3f]  ;;  %v5940_v31 = vld [vmem:[%s7685_s2 + $0xe0] sm:$0xff]  ;;  %v5961_v40 = vld [vmem:[%s7685_s2 + $0xd8] sm:$0xff] }
  0x9d   : > { %1068 = vmatprep.mubr.f32.mxu1 %v998_v41  ;;  %4394 = vmatpush3.msra.mxu0 %v5375_v5  ;;  %v725_v43 = vpop.permute.xlu0 %724  ;;  %v809_v44 = vpop.permute.xlu1 %808  ;;  %348 = vst.msk [vmem:[#allocation2 + $0x120] sm:$0x3f] %vm338_vm0, %v335_v1  ;;  %620 = vst.msk [vmem:[#allocation2 + $0x168] sm:$0x3f] %vm338_vm0, %v4244_v9  ;;  %v5968_v41 = vld [vmem:[%s7685_s2 + $0x58] sm:$0xff]  ;;  %v5992_v1 = vld [vmem:[%s7685_s2 + $0xc8] sm:$0xff] }
  0x9e   : > { %4429 = vmatprep.subr.mxu1 %v5353_v2  ;;  %4395 = vmatprep.subr.mxu0 %v5383_v6  ;;  %757 = vst.msk [vmem:[#allocation2 + $0x68] sm:$0x3f] %vm485_vm3, %v725_v43  ;;  %v6203_v9 = vld [vmem:[%s7685_s2 + $0x80] sm:$0xff] }
  0x9f   : > { %4430 = vmatpush3.msra.mxu1 %v5359_v3  ;;  %844 = vst.msk [vmem:[#allocation2 + $0x68] sm:$0xc0] %vm570_vm4, %v809_v44  ;;  %4396 = vmatpush3.msra.mxu0 %v5402_v7 }
  0xa0   : > { %845 = vst.msk [vmem:[#allocation2 + $0x78] sm:$0xf] %vm572_vm5, %v809_v44  ;;  %4431 = vmatprep.subr.mxu1 %v5368_v4  ;;  %1069 = vmatmul.mubr.f32.gmra.mxu1 %v997_v46  ;;  %v5975_v44 = vld [vmem:[%s7685_s2 + $0xd0] sm:$0xff]  ;;  %v5999_v46 = vld [vmem:[%s7685_s2 + $0x48] sm:$0xff] }
  0xa1   : > { %4397 = vmatprep.subr.mxu0 %v5407_v8  ;;  %4432 = vmatpush3.msra.mxu1 %v5375_v5  ;;  %v456_v2 = vpop.permute.xlu0 %455  ;;  %v541_v3 = vpop.permute.xlu1 %540  ;;  %692 = vst.msk [vmem:[#allocation2 + $0x168] sm:$0xc0] %vm399_vm1, %v657_v13  ;;  %423 = vst.msk [vmem:[#allocation2 + $0x160] sm:$0xc0] %vm399_vm1, %v386_v27 }
  0xa2   : > { %4398 = vmatpush3.msra.mxu0 %v5416_v11  ;;  %4433 = vmatprep.subr.mxu1 %v5383_v6  ;;  %489 = vst.msk [vmem:[#allocation2 + $0x60] sm:$0x3f] %vm485_vm3, %v456_v2 }
  0xa3   : > { %4399 = vmatprep.subr.mxu0 %v5431_v17  ;;  %578 = vst.msk [vmem:[#allocation2 + $0x60] sm:$0xc0] %vm570_vm4, %v541_v3  ;;  %4434 = vmatpush3.msra.mxu1 %v5402_v7  ;;  %v1094_v55 = vld [vmem:[#allocation2 + $0x50] sm:$0xf] }
  0xa4   : > { %579 = vst.msk [vmem:[#allocation2 + $0x70] sm:$0xf] %vm572_vm5, %v541_v3  ;;  %4400 = vmatpush3.msra.mxu0 %v5438_v18  ;;  %4435 = vmatprep.subr.mxu1 %v5407_v8 }
  0xa5   : > { %4401 = vmatprep.subr.mxu0 %v5446_v21  ;;  %4436 = vmatpush3.msra.mxu1 %v5416_v11  ;;  %v727_v4 = vpop.permute.xlu0 %726  ;;  %v811_v5 = vpop.permute.xlu1 %810  ;;  %693 = vst.msk [vmem:[#allocation2 + $0x178] sm:$0xf] %vm401_vm2, %v657_v13  ;;  %424 = vst.msk [vmem:[#allocation2 + $0x170] sm:$0xf] %vm401_vm2, %v386_v27 }
  0xa6   : > { %4402 = vmatpush3.msra.mxu0 %v5455_v23  ;;  %4437 = vmatprep.subr.mxu1 %v5431_v17  ;;  %758 = vst.msk [vmem:[#allocation2 + $0x88] sm:$0x3f] %vm485_vm3, %v727_v4  ;;  %v1093_v17 = vld [vmem:[#allocation2 + $0x48] sm:$0xff]  ;;  %v6006_v4 = vld [vmem:[%s7685_s2 + $0xc0] sm:$0xff] }
  0xa7   : > { %4403 = vmatprep.subr.mxu0 %v5462_v24  ;;  %846 = vst.msk [vmem:[#allocation2 + $0x88] sm:$0xc0] %vm570_vm4, %v811_v5  ;;  %4438 = vmatpush3.msra.mxu1 %v5438_v18  ;;  %v1187_v63 = vld [vmem:[#allocation2 + $0x78] sm:$0xf] }
  0xa8   : > { %847 = vst.msk [vmem:[#allocation2 + $0x98] sm:$0xf] %vm572_vm5, %v811_v5  ;;  %4404 = vmatpush3.msra.mxu0 %v5470_v26  ;;  %4439 = vmatprep.subr.mxu1 %v5446_v21  ;;  %v6016_v5 = vld [vmem:[%s7685_s2 + $0x40] sm:$0xff] }
  0xa9   : > { %4405 = vmatprep.subr.mxu0 %v5480_v29  ;;  %4440 = vmatpush3.msra.mxu1 %v5455_v23  ;;  %v458_v6 = vpop.permute.xlu0 %457  ;;  %v543_v7 = vpop.permute.xlu1 %542 }
  0xaa   : > { %4406 = vmatpush3.msra.mxu0 %v5487_v30  ;;  %4441 = vmatprep.subr.mxu1 %v5462_v24  ;;  %490 = vst.msk [vmem:[#allocation2 + $0x80] sm:$0x3f] %vm485_vm3, %v458_v6  ;;  %v1184_v48 = vld [vmem:[#allocation2 + $0x60] sm:$0xff]  ;;  %v6023_v6 = vld [vmem:[%s7685_s2 + $0xb8] sm:$0xff] }
  0xab   : > { %4407 = vmatprep.subr.mxu0 %v5495_v32  ;;  %580 = vst.msk [vmem:[#allocation2 + $0x80] sm:$0xc0] %vm570_vm4, %v543_v7  ;;  %4442 = vmatpush3.msra.mxu1 %v5470_v26  ;;  %v4243_v26 = vld [vmem:[%s5396_s29 + $0x58] sm:$0x3f]  ;;  %v1186_v33 = vld [vmem:[#allocation2 + $0x70] sm:$0xf] }
  0xac   : > { %581 = vst.msk [vmem:[#allocation2 + $0x90] sm:$0xf] %vm572_vm5, %v543_v7  ;;  %4408 = vmatpush3.msra.mxu0 %v5503_v35  ;;  %4443 = vmatprep.subr.mxu1 %v5480_v29  ;;  %v4255_v29 = vld [vmem:[%s5391_s24 + $0x58] sm:$0x3f]  ;;  %s5282_s24 = smov 32  }
  0xad   : > { %4409 = vmatprep.subr.mxu0 %v5511_v37  ;;  %4444 = vmatpush3.msra.mxu1 %v5487_v30  ;;  %v729_v8 = vpop.permute.xlu0 %728  ;;  %v813_v11 = vpop.permute.xlu1 %812  ;;  %619 = vst.msk [vmem:[#allocation2 + $0x148] sm:$0x3f] %vm338_vm0, %v4243_v26  ;;  %v656_v30 = vrot.slane %v4255_v29, 2  ;;  %v6030_v7 = vld [vmem:[%s7685_s2 + $0x38] sm:$0xff]  ;;  %vm3410_vm0 = vcmask 23552  }
  0xae   : > { %4410 = vmatpush3.msra.mxu0 %v5517_v38  ;;  %4445 = vmatprep.subr.mxu1 %v5495_v32  ;;  %759 = vst.msk [vmem:[#allocation2 + $0xa8] sm:$0x3f] %vm485_vm3, %v729_v8  ;;  %v1092_v32 = vld [vmem:[#allocation2 + $0x40] sm:$0xff]  ;;  %v1279_v29 = vld [vmem:[#allocation2 + $0x88] sm:$0xff] }
  0xaf   : > { %4411 = vmatprep.subr.mxu0 %v5540_v50  ;;  %848 = vst.msk [vmem:[#allocation2 + $0xa8] sm:$0xc0] %vm570_vm4, %v813_v11  ;;  %4446 = vmatpush3.msra.mxu1 %v5503_v35  ;;  %v1185_v35 = vld [vmem:[#allocation2 + $0x68] sm:$0xff] }
  0xb0   : > { %849 = vst.msk [vmem:[#allocation2 + $0xb8] sm:$0xf] %vm572_vm5, %v813_v11  ;;  %4412 = vmatpush3.msra.mxu0 %v5551_v53  ;;  %4447 = vmatprep.subr.mxu1 %v5511_v37  ;;  %v1095_v37 = vld [vmem:[#allocation2 + $0x58] sm:$0xf] }
  0xb1   : > { %4413 = vmatprep.subr.mxu0 %v5563_v56  ;;  %4448 = vmatpush3.msra.mxu1 %v5517_v38  ;;  %v460_v18 = vpop.permute.xlu0 %459  ;;  %v545_v21 = vpop.permute.xlu1 %544  ;;  %690 = vst.msk [vmem:[#allocation2 + $0x148] sm:$0xc0] %vm399_vm1, %v656_v30  ;;  %vm3779_vm1 = vcmask 48152  }
  0xb2   : > { %4414 = vmatpush3.msra.mxu0 %v5575_v59  ;;  %1160 = vmatprep.mubr.f32.mxu0 %v1093_v17  ;;  %491 = vst.msk [vmem:[#allocation2 + $0xa0] sm:$0x3f] %vm485_vm3, %v460_v18  ;;  %v6037_v17 = vld [vmem:[%s7685_s2 + $0xb0] sm:$0xff] }
  0xb3   : > { %4449 = vmatprep.subr.mxu1 %v5540_v50  ;;  %582 = vst.msk [vmem:[#allocation2 + $0xa0] sm:$0xc0] %vm570_vm4, %v545_v21  ;;  %4415 = vmatprep.subr.mxu0 %v5583_v61  ;;  %v6047_v18 = vld [vmem:[%s7685_s2 + $0x30] sm:$0xff] }
  0xb4   : > { %583 = vst.msk [vmem:[#allocation2 + $0xb0] sm:$0xf] %vm572_vm5, %v545_v21  ;;  %4450 = vmatpush3.msra.mxu1 %v5551_v53  ;;  %4416 = vmatpush3.msra.mxu0 %v5594_v10  ;;  %v6054_v21 = vld [vmem:[%s7685_s2 + $0xa8] sm:$0xff] }
  0xb5   : > { %4451 = vmatprep.subr.mxu1 %v5563_v56  ;;  %4417 = vmatprep.subr.mxu0 %v5606_v19  ;;  %v731_v23 = vpop.permute.xlu0 %730  ;;  %v815_v24 = vpop.permute.xlu1 %814  ;;  %691 = vst.msk [vmem:[#allocation2 + $0x158] sm:$0xf] %vm401_vm2, %v656_v30  ;;  %vm4148_vm2 = vcmask 72752  }
  0xb6   : > { %4452 = vmatpush3.msra.mxu1 %v5575_v59  ;;  %4418 = vmatpush3.msra.mxu0 %v5615_v20  ;;  %760 = vst.msk [vmem:[#allocation2 + $0xc8] sm:$0x3f] %vm485_vm3, %v731_v23  ;;  %v6061_v23 = vld [vmem:[%s7685_s2 + $0x28] sm:$0xff] }
  0xb7   : > { %4453 = vmatprep.subr.mxu1 %v5583_v61  ;;  %850 = vst.msk [vmem:[#allocation2 + $0xc8] sm:$0xc0] %vm570_vm4, %v815_v24  ;;  %4419 = vmatprep.subr.mxu0 %v5627_v28 }
  0xb8   : > { %851 = vst.msk [vmem:[#allocation2 + $0xd8] sm:$0xf] %vm572_vm5, %v815_v24  ;;  %4454 = vmatpush3.msra.mxu1 %v5594_v10  ;;  %4420 = vmatpush3.msra.mxu0 %v5639_v39 }
  0xb9   : > { %4455 = vmatprep.subr.mxu1 %v5606_v19  ;;  %1161 = vmatmul.mubr.f32.vlgmr.msra.gmra.mxu0 %v1092_v32  ;;  %v462_v38 = vpop.permute.xlu0 %461  ;;  %v547_v47 = vpop.permute.xlu1 %546 }
  0xba   : > { %4456 = vmatpush3.msra.mxu1 %v5615_v20  ;;  %4465 = vmatprep.subr.mxu0 %v5343_v0  ;;  %492 = vst.msk [vmem:[#allocation2 + $0xc0] sm:$0x3f] %vm485_vm3, %v462_v38  ;;  %v5890_v0 = vld [vmem:[%s7685_s2 + $0x78] sm:$0xff]  ;;  %v1370_v38 = vld [vmem:[#allocation2 + $0xa0] sm:$0xff] }
  0xbb   : > { %1165 = vmatprep.mubr.f32.mxu0 %v1095_v37  ;;  %584 = vst.msk [vmem:[#allocation2 + $0xc0] sm:$0xc0] %vm570_vm4, %v547_v47  ;;  %4457 = vmatprep.subr.mxu1 %v5627_v28 }
  0xbc   : > { %585 = vst.msk [vmem:[#allocation2 + $0xd0] sm:$0xf] %vm572_vm5, %v547_v47  ;;  %1252 = vmatprep.mubr.f32.mxu1 %v1185_v35  ;;  %4466 = vmatpush3.msra.mxu0 %v5890_v0  ;;  %v1373_v47 = vld [vmem:[#allocation2 + $0xb8] sm:$0xf] }
  0xbd   : > { %4458 = vmatpush3.msra.mxu1 %v5639_v39  ;;  %4467 = vmatprep.subr.mxu0 %v5897_v54  ;;  %v733_v57 = vpop.permute.xlu0 %732  ;;  %v817_v58 = vpop.permute.xlu1 %816 }
  0xbe   : > { %1253 = vmatmul.mubr.f32.vlgmr.msra.gmra.mxu1 %v1184_v48  ;;  %4468 = vmatpush3.msra.mxu0 %v5905_v60  ;;  %761 = vst.msk [vmem:[#allocation2 + $0xe8] sm:$0x3f] %vm485_vm3, %v733_v57  ;;  %v6154_v48 = vld [vmem:[%s7685_s2 + $0x20] sm:$0xff]  ;;  %v1465_v49 = vld [vmem:[#allocation2 + $0xc8] sm:$0xff]  ;;  %v6182_v57 = vld [vmem:[%s7685_s2 + $0x10] sm:$0xff] }
  0xbf   : > { %4503 = vmatprep.subr.mxu1 %v5911_v62  ;;  %852 = vst.msk [vmem:[#allocation2 + $0xe8] sm:$0xc0] %vm570_vm4, %v817_v58  ;;  %1166 = vmatmul.mubr.f32.gmra.mxu0 %v1094_v55  ;;  %v6175_v55 = vld [vmem:[%s7685_s2 + $0x90] sm:$0xff] }
  0xc0   : > { %853 = vst.msk [vmem:[#allocation2 + $0xf8] sm:$0xf] %vm572_vm5, %v817_v58  ;;  %1257 = vmatprep.mubr.f32.mxu1 %v1187_v63  ;;  %4469 = vmatprep.subr.mxu0 %v5923_v14  ;;  %v6189_v58 = vld [vmem:[%s7685_s2 + $0x88] sm:$0xff] }
  0xc1   : > { %4504 = vmatpush3.msra.mxu1 %v5890_v0  ;;  %4470 = vmatpush3.msra.mxu0 %v5931_v16  ;;  %v464_v22 = vpop.permute.xlu0 %463  ;;  %v549_v25 = vpop.permute.xlu1 %548  ;;  %v6196_v63 = vld [vmem:[%s7685_s2 + $0x8] sm:$0xff] }
  0xc2   : > { %4505 = vmatprep.subr.mxu1 %v5897_v54  ;;  %4471 = vmatprep.subr.mxu0 %v5940_v31  ;;  %493 = vst.msk [vmem:[#allocation2 + $0xe0] sm:$0x3f] %vm485_vm3, %v464_v22  ;;  %v1464_v13 = vld [vmem:[#allocation2 + $0xc0] sm:$0xff]  ;;  %v1467_v22 = vld [vmem:[#allocation2 + $0xd8] sm:$0xf] }
  0xc3   : > { %4506 = vmatpush3.msra.mxu1 %v5905_v60  ;;  %586 = vst.msk [vmem:[#allocation2 + $0xe0] sm:$0xc0] %vm570_vm4, %v549_v25  ;;  %4472 = vmatpush3.msra.mxu0 %v5951_v36  ;;  %v1466_v27 = vld [vmem:[#allocation2 + $0xd0] sm:$0xf] }
  0xc4   : > { %587 = vst.msk [vmem:[#allocation2 + $0xf0] sm:$0xf] %vm572_vm5, %v549_v25  ;;  %1258 = vmatmul.mubr.f32.gmra.mxu1 %v1186_v33  ;;  %4507 = vmatprep.subr.mxu1 %v5923_v14 }
  0xc5   : > { %4473 = vmatprep.subr.mxu0 %v5961_v40  ;;  %4508 = vmatpush3.msra.mxu1 %v5931_v16  ;;  %v735_v42 = vpop.permute.xlu0 %734  ;;  %v819_v43 = vpop.permute.xlu1 %818 }
  0xc6   : > { %4474 = vmatpush3.msra.mxu0 %v5968_v41  ;;  %4509 = vmatprep.subr.mxu1 %v5940_v31  ;;  %762 = vst.msk [vmem:[#allocation2 + $0x108] sm:$0x3f] %vm485_vm3, %v735_v42  ;;  %v1557_v15 = vld [vmem:[#allocation2 + $0xe8] sm:$0xff] }
  0xc7   : > { %4475 = vmatprep.subr.mxu0 %v5975_v44  ;;  %854 = vst.msk [vmem:[#allocation2 + $0x108] sm:$0xc0] %vm570_vm4, %v819_v43  ;;  %4510 = vmatpush3.msra.mxu1 %v5951_v36  ;;  %v1559_v33 = vld [vmem:[#allocation2 + $0xf8] sm:$0xf] }
  0xc8   : > { %855 = vst.msk [vmem:[#allocation2 + $0x118] sm:$0xf] %vm572_vm5, %v819_v43  ;;  %4476 = vmatpush3.msra.mxu0 %v5985_v45  ;;  %4511 = vmatprep.subr.mxu1 %v5961_v40 }
  0xc9   : > { %4477 = vmatprep.subr.mxu0 %v5992_v1  ;;  %4512 = vmatpush3.msra.mxu1 %v5968_v41  ;;  %v466_v2 = vpop.permute.xlu0 %465  ;;  %v551_v3 = vpop.permute.xlu1 %550 }
  0xca   : > { %4478 = vmatpush3.msra.mxu0 %v5999_v46  ;;  %4513 = vmatprep.subr.mxu1 %v5975_v44  ;;  %494 = vst.msk [vmem:[#allocation2 + $0x100] sm:$0x3f] %vm485_vm3, %v466_v2  ;;  %v1556_v25 = vld [vmem:[#allocation2 + $0xe0] sm:$0xff] }
  0xcb   : > { %4479 = vmatprep.subr.mxu0 %v6006_v4  ;;  %588 = vst.msk [vmem:[#allocation2 + $0x100] sm:$0xc0] %vm570_vm4, %v551_v3  ;;  %4514 = vmatpush3.msra.mxu1 %v5985_v45  ;;  %v1558_v34 = vld [vmem:[#allocation2 + $0xf0] sm:$0xf] }
  0xcc   : > { %589 = vst.msk [vmem:[#allocation2 + $0x110] sm:$0xf] %vm572_vm5, %v551_v3  ;;  %4480 = vmatpush3.msra.mxu0 %v6016_v5  ;;  %4515 = vmatprep.subr.mxu1 %v5992_v1 }
  0xcd   : > { %4481 = vmatprep.subr.mxu0 %v6023_v6  ;;  %4516 = vmatpush3.msra.mxu1 %v5999_v46  ;;  %v737_v8 = vpop.permute.xlu0 %736  ;;  %v821_v11 = vpop.permute.xlu1 %820 }
  0xce   : > { %4482 = vmatpush3.msra.mxu0 %v6030_v7  ;;  %4517 = vmatprep.subr.mxu1 %v6006_v4  ;;  %763 = vst.msk [vmem:[#allocation2 + $0x128] sm:$0x3f] %vm485_vm3, %v737_v8  ;;  %v1651_v42 = vld [vmem:[#allocation2 + $0x108] sm:$0xff] }
  0xcf   : > { %4483 = vmatprep.subr.mxu0 %v6037_v17  ;;  %856 = vst.msk [vmem:[#allocation2 + $0x128] sm:$0xc0] %vm570_vm4, %v821_v11  ;;  %4518 = vmatpush3.msra.mxu1 %v6016_v5  ;;  %v1653_v3 = vld [vmem:[#allocation2 + $0x118] sm:$0xf] }
  0xd0   : > { %857 = vst.msk [vmem:[#allocation2 + $0x138] sm:$0xf] %vm572_vm5, %v821_v11  ;;  %4484 = vmatpush3.msra.mxu0 %v6047_v18  ;;  %4519 = vmatprep.subr.mxu1 %v6023_v6 }
  0xd1   : > { %4485 = vmatprep.subr.mxu0 %v6054_v21  ;;  %4520 = vmatpush3.msra.mxu1 %v6030_v7  ;;  %v468_v24 = vpop.permute.xlu0 %467  ;;  %v553_v26 = vpop.permute.xlu1 %552 }
  0xd2   : > { %4486 = vmatpush3.msra.mxu0 %v6061_v23  ;;  %4521 = vmatprep.subr.mxu1 %v6037_v17  ;;  %495 = vst.msk [vmem:[#allocation2 + $0x120] sm:$0x3f] %vm485_vm3, %v468_v24  ;;  %v1650_v2 = vld [vmem:[#allocation2 + $0x100] sm:$0xff] }
  0xd3   : > { %4487 = vmatprep.subr.mxu0 %v5540_v50  ;;  %590 = vst.msk [vmem:[#allocation2 + $0x120] sm:$0xc0] %vm570_vm4, %v553_v26  ;;  %4522 = vmatpush3.msra.mxu1 %v6047_v18  ;;  %v1652_v24 = vld [vmem:[#allocation2 + $0x110] sm:$0xf] }
  0xd4   : > { %591 = vst.msk [vmem:[#allocation2 + $0x130] sm:$0xf] %vm572_vm5, %v553_v26  ;;  %4488 = vmatpush3.msra.mxu0 %v5551_v53  ;;  %4523 = vmatprep.subr.mxu1 %v6054_v21 }
  0xd5   : > { %4489 = vmatprep.subr.mxu0 %v5563_v56  ;;  %4524 = vmatpush3.msra.mxu1 %v6061_v23  ;;  %v739_v30 = vpop.permute.xlu0 %738  ;;  %v823_v32 = vpop.permute.xlu1 %822 }
  0xd6   : > { %4490 = vmatpush3.msra.mxu0 %v5575_v59  ;;  %1346 = vmatprep.mubr.f32.mxu0 %v1279_v29  ;;  %764 = vst.msk [vmem:[#allocation2 + $0x148] sm:$0x3f] %vm485_vm3, %v739_v30  ;;  %v1743_v43 = vld [vmem:[#allocation2 + $0x128] sm:$0xff]  ;;  %v6411_v30 = vld [vmem:[%s7687_s4 + $0xd0] sm:$0xff] }
  0xd7   : > { %4525 = vmatprep.subr.mxu1 %v5540_v50  ;;  %858 = vst.msk [vmem:[#allocation2 + $0x148] sm:$0xc0] %vm570_vm4, %v823_v32  ;;  %4491 = vmatprep.subr.mxu0 %v5583_v61  ;;  %v1745_v11 = vld [vmem:[#allocation2 + $0x138] sm:$0xf] }
  0xd8   : > { %859 = vst.msk [vmem:[#allocation2 + $0x158] sm:$0xf] %vm572_vm5, %v823_v32  ;;  %4526 = vmatpush3.msra.mxu1 %v5551_v53  ;;  %4492 = vmatpush3.msra.mxu0 %v5594_v10  ;;  %v1278_v53 = vld [vmem:[#allocation2 + $0x80] sm:$0xff]  ;;  %v6417_v32 = vld [vmem:[%s7687_s4 + $0x50] sm:$0xff] }
  0xd9   : > { %4527 = vmatprep.subr.mxu1 %v5563_v56  ;;  %4493 = vmatprep.subr.mxu0 %v5606_v19  ;;  %v470_v35 = vpop.permute.xlu0 %469  ;;  %v555_v50 = vpop.permute.xlu1 %554  ;;  %v1371_v56 = vld [vmem:[#allocation2 + $0xa8] sm:$0xff] }
  0xda   : > { %4528 = vmatpush3.msra.mxu1 %v5575_v59  ;;  %4494 = vmatpush3.msra.mxu0 %v5615_v20  ;;  %496 = vst.msk [vmem:[#allocation2 + $0x140] sm:$0x3f] %vm485_vm3, %v470_v35  ;;  %v1281_v59 = vld [vmem:[#allocation2 + $0x98] sm:$0xf]  ;;  %v1742_v8 = vld [vmem:[#allocation2 + $0x120] sm:$0xff] }
  0xdb   : > { %4529 = vmatprep.subr.mxu1 %v5583_v61  ;;  %592 = vst.msk [vmem:[#allocation2 + $0x140] sm:$0xc0] %vm570_vm4, %v555_v50  ;;  %4495 = vmatprep.subr.mxu0 %v5627_v28  ;;  %v1744_v26 = vld [vmem:[#allocation2 + $0x130] sm:$0xf] }
  0xdc   : > { %593 = vst.msk [vmem:[#allocation2 + $0x150] sm:$0xf] %vm572_vm5, %v555_v50  ;;  %4530 = vmatpush3.msra.mxu1 %v5594_v10  ;;  %4496 = vmatpush3.msra.mxu0 %v5639_v39 }
  0xdd   : > { %4531 = vmatprep.subr.mxu1 %v5606_v19  ;;  %1347 = vmatmul.mubr.f32.vlgmr.msra.gmra.mxu0 %v1278_v53  ;;  %v741_v61 = vpop.permute.xlu0 %740  ;;  %v825_v37 = vpop.permute.xlu1 %824 }
  0xde   : > { %4532 = vmatpush3.msra.mxu1 %v5615_v20  ;;  %4541 = vmatprep.subr.mxu0 %v5911_v62  ;;  %765 = vst.msk [vmem:[#allocation2 + $0x168] sm:$0x3f] %vm485_vm3, %v741_v61  ;;  %v1280_v20 = vld [vmem:[#allocation2 + $0x90] sm:$0xf] }
  0xdf   : > { %1351 = vmatprep.mubr.f32.mxu0 %v1281_v59  ;;  %860 = vst.msk [vmem:[#allocation2 + $0x168] sm:$0xc0] %vm570_vm4, %v825_v37  ;;  %4533 = vmatprep.subr.mxu1 %v5627_v28  ;;  %v1372_v28 = vld [vmem:[#allocation2 + $0xb0] sm:$0xf] }
  0xe0   : > { %861 = vst.msk [vmem:[#allocation2 + $0x178] sm:$0xf] %vm572_vm5, %v825_v37  ;;  %1438 = vmatprep.mubr.f32.mxu1 %v1371_v56  ;;  %4542 = vmatpush3.msra.mxu0 %v5890_v0 }
  0xe1   : > { %4534 = vmatpush3.msra.mxu1 %v5639_v39  ;;  %4543 = vmatprep.subr.mxu0 %v5897_v54  ;;  %v472_v10 = vpop.permute.xlu0 %471  ;;  %v557_v19 = vpop.permute.xlu1 %556  ;;  %v6147_v39 = vld [vmem:[%s7685_s2 + $0xa0] sm:$0xff] }
  0xe2   : > { %1439 = vmatmul.mubr.f32.vlgmr.msra.gmra.mxu1 %v1370_v38  ;;  %4544 = vmatpush3.msra.mxu0 %v5905_v60  ;;  %497 = vst.msk [vmem:[#allocation2 + $0x160] sm:$0x3f] %vm485_vm3, %v472_v10 }
  0xe3   : > { %4579 = vmatprep.subr.mxu1 %v5911_v62  ;;  %594 = vst.msk [vmem:[#allocation2 + $0x160] sm:$0xc0] %vm570_vm4, %v557_v19  ;;  %1352 = vmatmul.mubr.f32.gmra.mxu0 %v1280_v20 }
  0xe4   : > { %595 = vst.msk [vmem:[#allocation2 + $0x170] sm:$0xf] %vm572_vm5, %v557_v19  ;;  %1443 = vmatprep.mubr.f32.mxu1 %v1373_v47  ;;  %4545 = vmatprep.subr.mxu0 %v5923_v14 }
  0xe5   : > { %4580 = vmatpush3.msra.mxu1 %v5890_v0  ;;  %4546 = vmatpush3.msra.mxu0 %v5931_v16 }
  0xe6   : > { %4581 = vmatprep.subr.mxu1 %v5897_v54  ;;  %4547 = vmatprep.subr.mxu0 %v5940_v31 }
  0xe7   : > { %4582 = vmatpush3.msra.mxu1 %v5905_v60  ;;  %4548 = vmatpush3.msra.mxu0 %v5951_v36 }
  0xe8   : > { %1444 = vmatmul.mubr.f32.gmra.mxu1 %v1372_v28  ;;  %4583 = vmatprep.subr.mxu1 %v5923_v14  ;;  %v6434_v28 = vld [vmem:[%s7687_s4 + $0xc8] sm:$0xff] }
  0xe9   : > { %4549 = vmatprep.subr.mxu0 %v5961_v40  ;;  %4584 = vmatpush3.msra.mxu1 %v5931_v16 }
  0xea   : > { %4550 = vmatpush3.msra.mxu0 %v5968_v41  ;;  %4585 = vmatprep.subr.mxu1 %v5940_v31 }
  0xeb   : > { %4551 = vmatprep.subr.mxu0 %v5975_v44  ;;  %4586 = vmatpush3.msra.mxu1 %v5951_v36 }
  0xec   : > { %4552 = vmatpush3.msra.mxu0 %v5985_v45  ;;  %4587 = vmatprep.subr.mxu1 %v5961_v40 }
  0xed   : > { %4553 = vmatprep.subr.mxu0 %v5992_v1  ;;  %4588 = vmatpush3.msra.mxu1 %v5968_v41 }
  0xee   : > { %4554 = vmatpush3.msra.mxu0 %v5999_v46  ;;  %4589 = vmatprep.subr.mxu1 %v5975_v44 }
  0xef   : > { %4555 = vmatprep.subr.mxu0 %v6006_v4  ;;  %4590 = vmatpush3.msra.mxu1 %v5985_v45 }
  0xf0   : > { %4556 = vmatpush3.msra.mxu0 %v6016_v5  ;;  %4591 = vmatprep.subr.mxu1 %v5992_v1 }
  0xf1   : > { %4557 = vmatprep.subr.mxu0 %v6023_v6  ;;  %4592 = vmatpush3.msra.mxu1 %v5999_v46 }
  0xf2   : > { %4558 = vmatpush3.msra.mxu0 %v6030_v7  ;;  %4593 = vmatprep.subr.mxu1 %v6006_v4 }
  0xf3   : > { %4559 = vmatprep.subr.mxu0 %v6037_v17  ;;  %4594 = vmatpush3.msra.mxu1 %v6016_v5 }
  0xf4   : > { %4560 = vmatpush3.msra.mxu0 %v6047_v18  ;;  %4595 = vmatprep.subr.mxu1 %v6023_v6 }
  0xf5   : > { %4561 = vmatprep.subr.mxu0 %v6054_v21  ;;  %4596 = vmatpush3.msra.mxu1 %v6030_v7 }
  0xf6   : > { %4562 = vmatpush3.msra.mxu0 %v6061_v23  ;;  %4597 = vmatprep.subr.mxu1 %v6037_v17 }
  0xf7   : > { %4563 = vmatprep.subr.mxu0 %v6147_v39  ;;  %4598 = vmatpush3.msra.mxu1 %v6047_v18 }
  0xf8   : > { %4564 = vmatpush3.msra.mxu0 %v6154_v48  ;;  %4599 = vmatprep.subr.mxu1 %v6054_v21 }
  0xf9   : > { %4565 = vmatprep.subr.mxu0 %v6161_v51  ;;  %4600 = vmatpush3.msra.mxu1 %v6061_v23 }
  0xfa   : > { %4566 = vmatpush3.msra.mxu0 %v6168_v52  ;;  %1532 = vmatprep.mubr.f32.mxu0 %v1465_v49  ;;  %v6453_v49 = vld [vmem:[%s7687_s4 + $0x40] sm:$0xff] }
  0xfb   : > { %4601 = vmatprep.subr.mxu1 %v6147_v39  ;;  %4567 = vmatprep.subr.mxu0 %v6175_v55 }
  0xfc   : > { %4602 = vmatpush3.msra.mxu1 %v6154_v48  ;;  %4568 = vmatpush3.msra.mxu0 %v6182_v57 }
  0xfd   : > { %4603 = vmatprep.subr.mxu1 %v6161_v51  ;;  %4569 = vmatprep.subr.mxu0 %v6189_v58 }
  0xfe   : > { %4604 = vmatpush3.msra.mxu1 %v6168_v52  ;;  %4570 = vmatpush3.msra.mxu0 %v6196_v63 }
  0xff   : > { %4605 = vmatprep.subr.mxu1 %v6175_v55  ;;  %4571 = vmatprep.subr.mxu0 %v6203_v9 }
 0x100   : > { %4606 = vmatpush3.msra.mxu1 %v6182_v57  ;;  %4572 = vmatpush3.msra.mxu0 %v6210_v12 }
 0x101   : > { %4607 = vmatprep.subr.mxu1 %v6189_v58  ;;  %1533 = vmatmul.mubr.f32.vlgmr.msra.gmra.mxu0 %v1464_v13  ;;  %v6506_v13 = vld [vmem:[%s7687_s4 + $0x98] sm:$0xff] }
 0x102   : > { %4608 = vmatpush3.msra.mxu1 %v6196_v63  ;;  %4617 = vmatprep.subr.mxu0 %v5911_v62 }
 0x103   : > { %1537 = vmatprep.mubr.f32.mxu0 %v1467_v22  ;;  %4609 = vmatprep.subr.mxu1 %v6203_v9  ;;  %v6517_v22 = vld [vmem:[%s7687_s4 + $0x90] sm:$0xff] }
 0x104   : > { %1624 = vmatprep.mubr.f32.mxu1 %v1557_v15  ;;  %4618 = vmatpush3.msra.mxu0 %v5890_v0  ;;  %v6511_v15 = vld [vmem:[%s7687_s4 + $0x18] sm:$0xff]  ;;  %7723 = vst [vmem:[#allocation7_spill] sm:$0xff] %v6517_v22 }
 0x105   : > { %4610 = vmatpush3.msra.mxu1 %v6210_v12  ;;  %4619 = vmatprep.subr.mxu0 %v5897_v54 }
 0x106   : > { %1625 = vmatmul.mubr.f32.vlgmr.msra.gmra.mxu1 %v1556_v25  ;;  %4620 = vmatpush3.msra.mxu0 %v5905_v60  ;;  %v6523_v25 = vld [vmem:[%s7687_s4 + $0x10] sm:$0xff] }
 0x107   : > { %4655 = vmatprep.subr.mxu1 %v5911_v62  ;;  %1538 = vmatmul.mubr.f32.gmra.mxu0 %v1466_v27  ;;  %v6529_v27 = vld [vmem:[%s7687_s4 + $0x88] sm:$0xff] }
 0x108   : > { %1629 = vmatprep.mubr.f32.mxu1 %v1559_v33  ;;  %4621 = vmatprep.subr.mxu0 %v5923_v14  ;;  %v6535_v33 = vld [vmem:[%s7687_s4 + $0x8] sm:$0xff] }
 0x109   : > { %4656 = vmatpush3.msra.mxu1 %v5890_v0  ;;  %4622 = vmatpush3.msra.mxu0 %v5931_v16 }
 0x10a   : > { %4657 = vmatprep.subr.mxu1 %v5897_v54  ;;  %4623 = vmatprep.subr.mxu0 %v5940_v31 }
 0x10b   : > { %4658 = vmatpush3.msra.mxu1 %v5905_v60  ;;  %4624 = vmatpush3.msra.mxu0 %v5951_v36 }
 0x10c   : > { %1630 = vmatmul.mubr.f32.gmra.mxu1 %v1558_v34  ;;  %4659 = vmatprep.subr.mxu1 %v5923_v14  ;;  %v6540_v34 = vld [vmem:[%s7687_s4 + $0x1f8] sm:$0xff] }
 0x10d   : > { %4625 = vmatprep.subr.mxu0 %v5961_v40  ;;  %4660 = vmatpush3.msra.mxu1 %v5931_v16  ;;  %7724 = vst [vmem:[#allocation8_spill] sm:$0xff] %v6540_v34 }
 0x10e   : > { %4626 = vmatpush3.msra.mxu0 %v5968_v41  ;;  %4661 = vmatprep.subr.mxu1 %v5940_v31 }
 0x10f   : > { %4627 = vmatprep.subr.mxu0 %v5975_v44  ;;  %4662 = vmatpush3.msra.mxu1 %v5951_v36 }
 0x110   : > { %4628 = vmatpush3.msra.mxu0 %v5985_v45  ;;  %4663 = vmatprep.subr.mxu1 %v5961_v40 }
 0x111   : > { %4629 = vmatprep.subr.mxu0 %v5992_v1  ;;  %4664 = vmatpush3.msra.mxu1 %v5968_v41 }
 0x112   : > { %4630 = vmatpush3.msra.mxu0 %v5999_v46  ;;  %4665 = vmatprep.subr.mxu1 %v5975_v44 }
 0x113   : > { %4631 = vmatprep.subr.mxu0 %v6006_v4  ;;  %4666 = vmatpush3.msra.mxu1 %v5985_v45 }
 0x114   : > { %4632 = vmatpush3.msra.mxu0 %v6016_v5  ;;  %4667 = vmatprep.subr.mxu1 %v5992_v1 }
 0x115   : > { %4633 = vmatprep.subr.mxu0 %v6023_v6  ;;  %4668 = vmatpush3.msra.mxu1 %v5999_v46 }
 0x116   : > { %4634 = vmatpush3.msra.mxu0 %v6030_v7  ;;  %4669 = vmatprep.subr.mxu1 %v6006_v4 }
 0x117   : > { %4635 = vmatprep.subr.mxu0 %v6037_v17  ;;  %4670 = vmatpush3.msra.mxu1 %v6016_v5 }
 0x118   : > { %4636 = vmatpush3.msra.mxu0 %v6047_v18  ;;  %4671 = vmatprep.subr.mxu1 %v6023_v6 }
 0x119   : > { %4637 = vmatprep.subr.mxu0 %v6054_v21  ;;  %4672 = vmatpush3.msra.mxu1 %v6030_v7 }
 0x11a   : > { %4638 = vmatpush3.msra.mxu0 %v6061_v23  ;;  %4673 = vmatprep.subr.mxu1 %v6037_v17 }
 0x11b   : > { %4639 = vmatprep.subr.mxu0 %v6147_v39  ;;  %4674 = vmatpush3.msra.mxu1 %v6047_v18 }
 0x11c   : > { %4640 = vmatpush3.msra.mxu0 %v6154_v48  ;;  %4675 = vmatprep.subr.mxu1 %v6054_v21 }
 0x11d   : > { %4641 = vmatprep.subr.mxu0 %v6161_v51  ;;  %1718 = vmatprep.mubr.f32.mxu0 %v1651_v42  ;;  %v6545_v42 = vld [vmem:[%s7687_s4 + $0x178] sm:$0xff] }
 0x11e   : > { %4676 = vmatpush3.msra.mxu1 %v6061_v23  ;;  %4642 = vmatpush3.msra.mxu0 %v6168_v52 }
 0x11f   : > { %4677 = vmatprep.subr.mxu1 %v6147_v39  ;;  %4643 = vmatprep.subr.mxu0 %v6175_v55 }
 0x120   : > { %4678 = vmatpush3.msra.mxu1 %v6154_v48  ;;  %4644 = vmatpush3.msra.mxu0 %v6182_v57 }
 0x121   : > { %4679 = vmatprep.subr.mxu1 %v6161_v51  ;;  %4645 = vmatprep.subr.mxu0 %v6189_v58 }
 0x122   : > { %4680 = vmatpush3.msra.mxu1 %v6168_v52  ;;  %4646 = vmatpush3.msra.mxu0 %v6196_v63 }
 0x123   : > { %4681 = vmatprep.subr.mxu1 %v6175_v55  ;;  %4647 = vmatprep.subr.mxu0 %v6203_v9 }
 0x124   : > { %4682 = vmatpush3.msra.mxu1 %v6182_v57  ;;  %4648 = vmatpush3.msra.mxu0 %v6210_v12 }
 0x125   : > { %4683 = vmatprep.subr.mxu1 %v6189_v58  ;;  %1719 = vmatmul.mubr.f32.vlgmr.msra.gmra.mxu0 %v1650_v2  ;;  %v6557_v2 = vld [vmem:[%s7687_s4 + $0x1f0] sm:$0xff] }
 0x126   : > { %4684 = vmatpush3.msra.mxu1 %v6196_v63  ;;  %1810 = vmatprep.mubr.f32.mxu1 %v1743_v43  ;;  %v6551_v43 = vld [vmem:[%s7687_s4 + $0x80] sm:$0xff] }
 0x127   : > { %4693 = vmatprep.subr.mxu0 %v5911_v62  ;;  %1723 = vmatprep.mubr.f32.mxu0 %v1653_v3  ;;  %v6562_v3 = vld [vmem:[%s7687_s4 + $0x170] sm:$0xff] }
 0x128   : > { %4685 = vmatprep.subr.mxu1 %v6203_v9  ;;  %4694 = vmatpush3.msra.mxu0 %v5890_v0 }
 0x129   : > { %4686 = vmatpush3.msra.mxu1 %v6210_v12  ;;  %4695 = vmatprep.subr.mxu0 %v5897_v54 }
 0x12a   : > { %1811 = vmatmul.mubr.f32.vlgmr.msra.gmra.mxu1 %v1742_v8  ;;  %4696 = vmatpush3.msra.mxu0 %v5905_v60 }
 0x12b   : > { %1815 = vmatprep.mubr.f32.mxu1 %v1745_v11  ;;  %1724 = vmatmul.mubr.f32.gmra.mxu0 %v1652_v24  ;;  %v6568_v11 = vld [vmem:[%s7687_s4] sm:$0xff]  ;;  %v6574_v24 = vld [vmem:[%s7687_s4 + $0x1e8] sm:$0xff] }
 0x12c   : > { %4697 = vmatprep.subr.mxu0 %v5923_v14  ;;  %4731 = vmatprep.subr.mxu1 %v5911_v62  ;;  %v1929_v62 = vld [vmem:[#allocation2 + $0x168] sm:$0xff] }
 0x12d   : > { %4698 = vmatpush3.msra.mxu0 %v5931_v16  ;;  %4732 = vmatpush3.msra.mxu1 %v5890_v0  ;;  %v1837_v0 = vld [vmem:[#allocation2 + $0x148] sm:$0xff] }
 0x12e   : > { %4699 = vmatprep.subr.mxu0 %v5940_v31  ;;  %4733 = vmatprep.subr.mxu1 %v5897_v54  ;;  %v1836_v54 = vld [vmem:[#allocation2 + $0x140] sm:$0xff] }
 0x12f   : > { %1816 = vmatmul.mubr.f32.gmra.mxu1 %v1744_v26  ;;  %4700 = vmatpush3.msra.mxu0 %v5951_v36  ;;  %v6581_v26 = vld [vmem:[%s7687_s4 + $0x168] sm:$0xff] }
 0x130   : > { %4734 = vmatpush3.msra.mxu1 %v5905_v60  ;;  %4701 = vmatprep.subr.mxu0 %v5961_v40  ;;  %v1839_v60 = vld [vmem:[#allocation2 + $0x158] sm:$0xf] }
 0x131   : > { %4735 = vmatprep.subr.mxu1 %v5923_v14  ;;  %4702 = vmatpush3.msra.mxu0 %v5968_v41  ;;  %v1838_v14 = vld [vmem:[#allocation2 + $0x150] sm:$0xf] }
 0x132   : > { %4736 = vmatpush3.msra.mxu1 %v5931_v16  ;;  %4703 = vmatprep.subr.mxu0 %v5975_v44  ;;  %v1928_v16 = vld [vmem:[#allocation2 + $0x160] sm:$0xff] }
 0x133   : > { %4737 = vmatprep.subr.mxu1 %v5940_v31  ;;  %4704 = vmatpush3.msra.mxu0 %v5985_v45  ;;  %v1931_v31 = vld [vmem:[#allocation2 + $0x178] sm:$0xf] }
 0x134   : > { %4738 = vmatpush3.msra.mxu1 %v5951_v36  ;;  %4705 = vmatprep.subr.mxu0 %v5992_v1  ;;  %v1930_v36 = vld [vmem:[#allocation2 + $0x170] sm:$0xf] }
 0x135   : > { %4739 = vmatprep.subr.mxu1 %v5961_v40  ;;  %4706 = vmatpush3.msra.mxu0 %v5999_v46  ;;  %v6348_v40 = vld [vmem:[%s7687_s4 + $0xf8] sm:$0xff] }
 0x136   : > { %4740 = vmatpush3.msra.mxu1 %v5968_v41  ;;  %4707 = vmatprep.subr.mxu0 %v6006_v4  ;;  %v6353_v41 = vld [vmem:[%s7687_s4 + $0x78] sm:$0xff] }
 0x137   : > { %4741 = vmatprep.subr.mxu1 %v5975_v44  ;;  %4708 = vmatpush3.msra.mxu0 %v6016_v5  ;;  %v6358_v44 = vld [vmem:[%s7687_s4 + $0xf0] sm:$0xff] }
 0x138   : > { %4742 = vmatpush3.msra.mxu1 %v5985_v45  ;;  %4709 = vmatprep.subr.mxu0 %v6023_v6  ;;  %v6364_v45 = vld [vmem:[%s7687_s4 + $0x70] sm:$0xff] }
 0x139   : > { %4743 = vmatprep.subr.mxu1 %v5992_v1  ;;  %4710 = vmatpush3.msra.mxu0 %v6030_v7  ;;  %v6370_v1 = vld [vmem:[%s7687_s4 + $0xe8] sm:$0xff] }
 0x13a   : > { %4744 = vmatpush3.msra.mxu1 %v5999_v46  ;;  %4711 = vmatprep.subr.mxu0 %v6037_v17  ;;  %v6376_v46 = vld [vmem:[%s7687_s4 + $0x68] sm:$0xff] }
 0x13b   : > { %4745 = vmatprep.subr.mxu1 %v6006_v4  ;;  %4712 = vmatpush3.msra.mxu0 %v6047_v18  ;;  %v6382_v4 = vld [vmem:[%s7687_s4 + $0xe0] sm:$0xff] }
 0x13c   : > { %4746 = vmatpush3.msra.mxu1 %v6016_v5  ;;  %4713 = vmatprep.subr.mxu0 %v6054_v21 }
 0x13d   : > { %4747 = vmatprep.subr.mxu1 %v6023_v6  ;;  %4714 = vmatpush3.msra.mxu0 %v6061_v23  ;;  %v6388_v6 = vld [vmem:[%s7687_s4 + $0x60] sm:$0xff] }
 0x13e   : > { %4748 = vmatpush3.msra.mxu1 %v6030_v7  ;;  %4715 = vmatprep.subr.mxu0 %v6147_v39  ;;  %v6394_v7 = vld [vmem:[%s7687_s4 + $0xd8] sm:$0xff] }
 0x13f   : > { %4749 = vmatprep.subr.mxu1 %v6037_v17  ;;  %4716 = vmatpush3.msra.mxu0 %v6154_v48  ;;  %v6399_v17 = vld [vmem:[%s7686_s3] ss:$0 sm:$0xff] }
 0x140   : > { %4750 = vmatpush3.msra.mxu1 %v6047_v18  ;;  %4717 = vmatprep.subr.mxu0 %v6161_v51 }
 0x141   : > { %4751 = vmatprep.subr.mxu1 %v6054_v21  ;;  %4718 = vmatpush3.msra.mxu0 %v6168_v52  ;;  %v6405_v21 = vld [vmem:[%s7687_s4 + $0x58] sm:$0xff] }
 0x142   : > { %4752 = vmatpush3.msra.mxu1 %v6061_v23  ;;  %4719 = vmatprep.subr.mxu0 %v6175_v55 }
 0x143   : > { %4753 = vmatprep.subr.mxu1 %v6147_v39  ;;  %4720 = vmatpush3.msra.mxu0 %v6182_v57  ;;  %v6439_v39 = vld [vmem:[%s7687_s4 + $0x48] sm:$0xff] }
 0x144   : > { %4754 = vmatpush3.msra.mxu1 %v6154_v48  ;;  %4721 = vmatprep.subr.mxu0 %v6189_v58  ;;  %v6447_v48 = vld [vmem:[%s7687_s4 + $0xc0] sm:$0xff] }
 0x145   : > { %4755 = vmatprep.subr.mxu1 %v6161_v51  ;;  %4722 = vmatpush3.msra.mxu0 %v6196_v63  ;;  %v6459_v51 = vld [vmem:[%s7687_s4 + $0xb8] sm:$0xff] }
 0x146   : > { %4756 = vmatpush3.msra.mxu1 %v6168_v52  ;;  %4723 = vmatprep.subr.mxu0 %v6203_v9  ;;  %v6465_v52 = vld [vmem:[%s7687_s4 + $0x38] sm:$0xff] }
 0x147   : > { %4757 = vmatprep.subr.mxu1 %v6175_v55  ;;  %4724 = vmatpush3.msra.mxu0 %v6210_v12  ;;  %v6471_v55 = vld [vmem:[%s7687_s4 + $0xb0] sm:$0xff] }
 0x148   : > { %1904 = vmatprep.mubr.f32.mxu0 %v1837_v0  ;;  %4758 = vmatpush3.msra.mxu1 %v6182_v57  ;;  %v6477_v57 = vld [vmem:[%s7687_s4 + $0x30] sm:$0xff] }
 0x149   : > { %1905 = vmatmul.mubr.f32.vlgmr.msra.gmra.mxu0 %v1836_v54  ;;  %4759 = vmatprep.subr.mxu1 %v6189_v58  ;;  %v6483_v58 = vld [vmem:[%s7687_s4 + $0xa8] sm:$0xff]  ;;  %v6588_v54 = vld [vmem:[%s7687_s4 + $0x1e0] sm:$0xff] }
 0x14a   : > { %1909 = vmatprep.mubr.f32.mxu0 %v1839_v60  ;;  %4760 = vmatpush3.msra.mxu1 %v6196_v63  ;;  %v6489_v63 = vld [vmem:[%s7687_s4 + $0x28] sm:$0xff] }
 0x14b   : > { %1996 = vmatprep.mubr.f32.mxu1 %v1929_v62  ;;  %4761 = vmatprep.subr.mxu1 %v6203_v9  ;;  %v6495_v9 = vld [vmem:[%s7687_s4 + $0xa0] sm:$0xff] }
 0x14c   : > { %4762 = vmatpush3.msra.mxu1 %v6210_v12  ;;  %4769 = vmatprep.subr.mxu0 %v6348_v40  ;;  %v6501_v12 = vld [vmem:[%s7687_s4 + $0x20] sm:$0xff] }
 0x14d   : > { %1910 = vmatmul.mubr.f32.gmra.mxu0 %v1838_v14  ;;  %1997 = vmatmul.mubr.f32.vlgmr.msra.gmra.mxu1 %v1928_v16  ;;  %v6595_v62 = vld [vmem:[%s7687_s4 + $0x160] sm:$0xff]  ;;  %v6602_v16 = vld [vmem:[%s7687_s4 + $0x1d8] sm:$0xff] }
 0x14e   : > { %2001 = vmatprep.mubr.f32.mxu1 %v1931_v31  ;;  %4770 = vmatpush3.msra.mxu0 %v6353_v41 }
 0x14f   : > { %4771 = vmatprep.subr.mxu0 %v6358_v44  ;;  %4804 = vmatprep.subr.mxu1 %v6540_v34 }
 0x150   : > { %4772 = vmatpush3.msra.mxu0 %v6364_v45  ;;  %4805 = vmatpush3.msra.mxu1 %v6545_v42 }
 0x151   : > { %2002 = vmatmul.mubr.f32.gmra.mxu1 %v1930_v36  ;;  %4773 = vmatprep.subr.mxu0 %v6370_v1  ;;  %v6609_v36 = vld [vmem:[%s7687_s4 + $0x158] sm:$0xff] }
 0x152   : > { %4774 = vmatpush3.msra.mxu0 %v6376_v46  ;;  %4806 = vmatprep.subr.mxu1 %v6557_v2 }
 0x153   : > { %4775 = vmatprep.subr.mxu0 %v6382_v4  ;;  %4807 = vmatpush3.msra.mxu1 %v6562_v3 }
 0x154   : > { %4776 = vmatpush3.msra.mxu0 %v6388_v6  ;;  %4808 = vmatprep.subr.mxu1 %v6574_v24 }
 0x155   : > { %4777 = vmatprep.subr.mxu0 %v6394_v7  ;;  %4809 = vmatpush3.msra.mxu1 %v6581_v26 }
 0x156   : > { %4778 = vmatpush3.msra.mxu0 %v6405_v21  ;;  %4810 = vmatprep.subr.mxu1 %v6588_v54 }
 0x157   : > { %v4345_v5 = vpop.f32.mrf.mxu0  ;;  %4779 = vmatprep.subr.mxu0 %v6411_v30  ;;  %4811 = vmatpush3.msra.mxu1 %v6595_v62 }
 0x158   : > { %4780 = vmatpush3.msra.mxu0 %v6417_v32  ;;  %4812 = vmatprep.subr.mxu1 %v6602_v16 }
 0x159   : > { %v4346_v18 = vpop.f32.mrf.mxu0  ;;  %4781 = vmatprep.subr.mxu0 %v6434_v28  ;;  %4813 = vmatpush3.msra.mxu1 %v6609_v36 }
 0x15a   : > { %v4347_v23 = vadd.f32 %v4346_v18, %v4345_v5  ;;  %4782 = vmatpush3.msra.mxu0 %v6439_v39 }
 0x15b   : > { %v4383_v29 = vpop.f32.mrf.mxu1  ;;  %4783 = vmatprep.subr.mxu0 %v6447_v48 }
 0x15c   : > { %v972_v35 = vadd.f32 %v4347_v23, %v6399_v17  ;;  %v4348_v50 = vpop.f32.mrf.mxu0  ;;  %4784 = vmatpush3.msra.mxu0 %v6453_v49  ;;  %v6615_v23 = vld [vmem:[%s7687_s4 + $0x1d0] sm:$0xff] }
 0x15d   : > { %v4384_v53 = vpop.f32.mrf.mxu1  ;;  %4785 = vmatprep.subr.mxu0 %v6459_v51  ;;  %4814 = vmatprep.subr.mxu1 %v6615_v23 }
 0x15e   : > { %v4385_v56 = vadd.f32 %v4384_v53, %v4383_v29  ;;  %v4349_v59 = vpop.f32.mrf.mxu0  ;;  %984 = vrot.lane.b32.xlu0 %v972_v35, %s5282_s24  ;;  %981 = vst.msk [vmem:[#allocation3] sm:$0x3f] %vm980_vm6, %v972_v35  ;;  %4786 = vmatpush3.msra.mxu0 %v6465_v52  ;;  %v6623_v35 = vld [vmem:[%s7687_s4 + $0x150] sm:$0xff]  ;;  %v6629_v53 = vld [vmem:[%s7687_s4 + $0x1c8] sm:$0xff] }
 0x15f   : > { %v4350_v37 = vadd.f32 %v4349_v59, %v4348_v50  ;;  %4787 = vmatprep.subr.mxu0 %v6471_v55  ;;  %4815 = vmatpush3.msra.mxu1 %v6623_v35 }
 0x160   : > { %v1066_v61 = vadd.f32 %v4385_v56, %v6399_v17  ;;  %v4386_v38 = vpop.f32.mrf.mxu1  ;;  %4788 = vmatpush3.msra.mxu0 %v6477_v57  ;;  %4816 = vmatprep.subr.mxu1 %v6629_v53 }
 0x161   : > { %v977_v19 = vadd.f32 %v4350_v37, %v6399_v17  ;;  %4789 = vmatprep.subr.mxu0 %v6483_v58 }
 0x162   : > { %1081 = vrot.lane.b32.xlu1 %v1066_v61, %s5283_s22  ;;  %v4387_v10 = vpop.f32.mrf.mxu1  ;;  %1075 = vrot.lane.b32.xlu0 %v1066_v61, %s5281_s14 }
 0x163   : > { %v4388_v20 = vadd.f32 %v4387_v10, %v4386_v38  ;;  %4790 = vmatpush3.msra.mxu0 %v6489_v63 }
 0x164   : > { %4791 = vmatprep.subr.mxu0 %v6495_v9 }
 0x165   : > { %v1071_v47 = vadd.f32 %v4388_v20, %v6399_v17  ;;  %4792 = vmatpush3.msra.mxu0 %v6501_v12  ;;  %v6642_v20 = vld [vmem:[%s7687_s4 + $0x148] sm:$0xff] }
 0x166   : > { %986 = vrot.lane.b32.xlu1 %v977_v19, %s5282_s24  ;;  %4793 = vmatprep.subr.mxu0 %v6506_v13 }
 0x167   : > { %1083 = vrot.lane.b32.xlu0 %v1071_v47, %s5283_s22  ;;  %4794 = vmatpush3.msra.mxu0 %v6511_v15  ;;  %v6647_v47 = vld [vmem:[%s7687_s4 + $0x1c0] sm:$0xff] }
 0x168   : > { %4795 = vmatprep.subr.mxu0 %v6517_v22  ;;  %4817 = vmatpush3.msra.mxu1 %v6642_v20 }
 0x169   : > { %4796 = vmatpush3.msra.mxu0 %v6523_v25  ;;  %4818 = vmatprep.subr.mxu1 %v6647_v47 }
 0x16a   : > { %4797 = vmatprep.subr.mxu0 %v6529_v27 }
 0x16b   : > { %4798 = vmatpush3.msra.mxu0 %v6535_v33 }
 0x16c   : > { %4799 = vmatprep.subr.mxu0 %v6551_v43 }
 0x16d   : > { %4800 = vmatpush3.msra.mxu0 %v6568_v11 }
 0x16e   : > { %4839 = vmatprep.subr.mxu0 %v6348_v40 }
 0x179   : > { %v4421_v8 = vpop.f32.mrf.mxu0 }
 0x17b   : > { %v4422_v0 = vpop.f32.mrf.mxu0 }
 0x17c   : > { %v4423_v60 = vadd.f32 %v4422_v0, %v4421_v8  ;;  %v6655_v8 = vld [vmem:[%s7687_s4 + $0x140] sm:$0xff]  ;;  %v6661_v0 = vld [vmem:[%s7687_s4 + $0x1b8] sm:$0xff] }
 0x17d   : > { %4819 = vmatpush3.msra.mxu1 %v6655_v8 }
 0x17e   : > { %v4459_v14 = vpop.f32.mrf.mxu1  ;;  %v1163_v31 = vadd.f32 %v4423_v60, %v6399_v17  ;;  %v6667_v60 = vld [vmem:[%s7687_s4 + $0x138] sm:$0xff]  ;;  %4820 = vmatprep.subr.mxu1 %v6661_v0 }
 0x17f   : > { %v4424_v5 = vpop.f32.mrf.mxu0  ;;  %4821 = vmatpush3.msra.mxu1 %v6667_v60 }
 0x180   : > { %v4460_v18 = vpop.f32.mrf.mxu1  ;;  %1175 = vrot.lane.b32.xlu1 %v1163_v31, %s5282_s24  ;;  %1172 = vst.msk [vmem:[#allocation3 + $0x8] sm:$0x3f] %vm980_vm6, %v1163_v31  ;;  %v6679_v31 = vld [vmem:[%s7687_s4 + $0x130] sm:$0xff] }
 0x181   : > { %v4461_v29 = vadd.f32 %v4460_v18, %v4459_v14  ;;  %v4425_v50 = vpop.f32.mrf.mxu0  ;;  %v6673_v14 = vld [vmem:[%s7687_s4 + $0x1b0] sm:$0xff]  ;;  %7726 = vst [vmem:[#allocation10_spill] sm:$0xff] %v6679_v31  ;;  %v6691_v18 = vld [vmem:[%s7687_s4 + $0x128] sm:$0xff] }
 0x182   : > { %v4426_v59 = vadd.f32 %v4425_v50, %v4424_v5  ;;  %7725 = vst [vmem:[#allocation9_spill] sm:$0xff] %v6673_v14  ;;  %4822 = vmatprep.subr.mxu1 %v6673_v14  ;;  %v6685_v5 = vld [vmem:[%s7687_s4 + $0x1a8] sm:$0xff]  ;;  %7728 = vst [vmem:[#allocation12_spill] sm:$0xff] %v6691_v18  ;;  %v6703_v50 = vld [vmem:[%s7687_s4 + $0x120] sm:$0xff] }
 0x183   : > { %v1255_v56 = vadd.f32 %v4461_v29, %v6399_v17  ;;  %7727 = vst [vmem:[#allocation11_spill] sm:$0xff] %v6685_v5  ;;  %4823 = vmatpush3.msra.mxu1 %v6679_v31  ;;  %v6697_v29 = vld [vmem:[%s7687_s4 + $0x1a0] sm:$0xff]  ;;  %7730 = vst [vmem:[#allocation14_spill] sm:$0xff] %v6703_v50 }
 0x184   : > { %v4462_v61 = vpop.f32.mrf.mxu1  ;;  %v1168_v37 = vadd.f32 %v4426_v59, %v6399_v17  ;;  %4824 = vmatprep.subr.mxu1 %v6685_v5  ;;  %7729 = vst [vmem:[#allocation13_spill] sm:$0xff] %v6697_v29  ;;  %v6715_v59 = vld [vmem:[%s7687_s4 + $0x118] sm:$0xff] }
 0x185   : > { %1264 = vrot.lane.b32.xlu1 %v1255_v56, %s5281_s14  ;;  %4825 = vmatpush3.msra.mxu1 %v6691_v18  ;;  %7732 = vst [vmem:[#allocation16_spill] sm:$0xff] %v6715_v59 }
 0x186   : > { %v4463_v38 = vpop.f32.mrf.mxu1  ;;  %1177 = vrot.lane.b32.xlu0 %v1168_v37, %s5282_s24  ;;  %4826 = vmatprep.subr.mxu1 %v6697_v29  ;;  %v6727_v37 = vld [vmem:[%s7687_s4 + $0x110] sm:$0xff] }
 0x187   : > { %v4464_v10 = vadd.f32 %v4463_v38, %v4462_v61  ;;  %4827 = vmatpush3.msra.mxu1 %v6703_v50  ;;  %v6721_v61 = vld [vmem:[%s7687_s4 + $0x190] sm:$0xff]  ;;  %7734 = vst [vmem:[#allocation18_spill] sm:$0xff] %v6727_v37  ;;  %v6732_v38 = vld [vmem:[%s7687_s4 + $0x188] sm:$0xff] }
 0x188   : > { %7733 = vst [vmem:[#allocation17_spill] sm:$0xff] %v6721_v61  ;;  %7735 = vst [vmem:[#allocation19_spill] sm:$0xff] %v6732_v38 }
 0x189   : > { %v1260_v19 = vadd.f32 %v4464_v10, %v6399_v17  ;;  %v6739_v10 = vld [vmem:[%s7687_s4 + $0x108] sm:$0xff] }
 0x18a   : > { %1269 = vrot.lane.b32.xlu0 %v1255_v56, %s5283_s22  ;;  %v6709_v56 = vld [vmem:[%s7687_s4 + $0x198] sm:$0xff]  ;;  %7736 = vst [vmem:[#allocation20_spill] sm:$0xff] %v6739_v10 }
 0x18b   : > { %1271 = vrot.lane.b32.xlu1 %v1260_v19, %s5283_s22  ;;  %7731 = vst [vmem:[#allocation15_spill] sm:$0xff] %v6709_v56  ;;  %4828 = vmatprep.subr.mxu1 %v6709_v56  ;;  %v6744_v19 = vld [vmem:[%s7687_s4 + $0x180] sm:$0xff] }
 0x18c   : > { %4829 = vmatpush3.msra.mxu1 %v6715_v59  ;;  %7737 = vst [vmem:[#allocation21_spill] sm:$0xff] %v6744_v19  ;;  %v6750_v59 = vld [vmem:[%s7687_s4 + $0x100] sm:$0xff] }
 0x18d   : > { %4830 = vmatprep.subr.mxu1 %v6721_v61  ;;  %7738 = vst [vmem:[#allocation22_spill] sm:$0xff] %v6750_v59 }
 0x18e   : > { %4831 = vmatpush3.msra.mxu1 %v6727_v37 }
 0x18f   : > { %4832 = vmatprep.subr.mxu1 %v6732_v38 }
 0x190   : > { %4833 = vmatpush3.msra.mxu1 %v6739_v10 }
 0x191   : > { %4834 = vmatprep.subr.mxu1 %v6744_v19 }
 0x192   : > { %4835 = vmatpush3.msra.mxu1 %v6750_v59 }
 0x193   : > { %4874 = vmatprep.subr.mxu1 %v6540_v34 }
 0x19d   : > { %v4497_v37 = vpop.f32.mrf.mxu0 }
 0x19f   : > { %v4498_v61 = vpop.f32.mrf.mxu0 }
 0x1a0   : > { %v4499_v56 = vadd.f32 %v4498_v61, %v4497_v37 }
 0x1a2   : > { %v4535_v50 = vpop.f32.mrf.mxu1  ;;  %v1349_v29 = vadd.f32 %v4499_v56, %v6399_v17 }
 0x1a3   : > { %v4500_v38 = vpop.f32.mrf.mxu0 }
 0x1a4   : > { %v4536_v18 = vpop.f32.mrf.mxu1  ;;  %1361 = vrot.lane.b32.xlu0 %v1349_v29, %s5282_s24  ;;  %1358 = vst.msk [vmem:[#allocation3 + $0x10] sm:$0x3f] %vm980_vm6, %v1349_v29 }
 0x1a5   : > { %v4537_v5 = vadd.f32 %v4536_v18, %v4535_v50  ;;  %v4501_v10 = vpop.f32.mrf.mxu0 }
 0x1a6   : > { %v4502_v31 = vadd.f32 %v4501_v10, %v4500_v38 }
 0x1a7   : > { %v1441_v19 = vadd.f32 %v4537_v5, %v6399_v17 }
 0x1a8   : > { %v4538_v59 = vpop.f32.mrf.mxu1  ;;  %v1354_v14 = vadd.f32 %v4502_v31, %v6399_v17 }
 0x1a9   : > { %1450 = vrot.lane.b32.xlu0 %v1441_v19, %s5281_s14 }
 0x1aa   : > { %v4539_v61 = vpop.f32.mrf.mxu1  ;;  %1363 = vrot.lane.b32.xlu1 %v1354_v14, %s5282_s24 }
 0x1ab   : > { %v4540_v37 = vadd.f32 %v4539_v61, %v4538_v59 }
 0x1ad   : > { %v1446_v56 = vadd.f32 %v4540_v37, %v6399_v17 }
 0x1ae   : > { %1455 = vrot.lane.b32.xlu1 %v1441_v19, %s5283_s22 }
 0x1af   : > { %1457 = vrot.lane.b32.xlu0 %v1446_v56, %s5283_s22 }
 0x1c1   : > { %v4573_v18 = vpop.f32.mrf.mxu0 }
 0x1c3   : > { %v4574_v29 = vpop.f32.mrf.mxu0 }
 0x1c4   : > { %v4575_v50 = vadd.f32 %v4574_v29, %v4573_v18 }
 0x1c6   : > { %v4611_v5 = vpop.f32.mrf.mxu1  ;;  %v1535_v38 = vadd.f32 %v4575_v50, %v6399_v17 }
 0x1c7   : > { %v4576_v10 = vpop.f32.mrf.mxu0 }
 0x1c8   : > { %v4612_v31 = vpop.f32.mrf.mxu1  ;;  %1547 = vrot.lane.b32.xlu1 %v1535_v38, %s5282_s24  ;;  %1544 = vst.msk [vmem:[#allocation3 + $0x18] sm:$0x3f] %vm980_vm6, %v1535_v38 }
 0x1c9   : > { %v4613_v34 = vadd.f32 %v4612_v31, %v4611_v5  ;;  %v4577_v14 = vpop.f32.mrf.mxu0 }
 0x1ca   : > { %v4578_v61 = vadd.f32 %v4577_v14, %v4576_v10 }
 0x1cb   : > { %v1627_v59 = vadd.f32 %v4613_v34, %v6399_v17 }
 0x1cc   : > { %v4614_v19 = vpop.f32.mrf.mxu1  ;;  %v1540_v37 = vadd.f32 %v4578_v61, %v6399_v17 }
 0x1cd   : > { %1636 = vrot.lane.b32.xlu1 %v1627_v59, %s5281_s14 }
 0x1ce   : > { %v4615_v56 = vpop.f32.mrf.mxu1  ;;  %1549 = vrot.lane.b32.xlu0 %v1540_v37, %s5282_s24 }
 0x1cf   : > { %v4616_v18 = vadd.f32 %v4615_v56, %v4614_v19 }
 0x1d0   : > { %v985_v50 = vpop.permute.xlu0 %984 }
 0x1d1   : > { %v1632_v29 = vadd.f32 %v4616_v18, %v6399_v17  ;;  %991 = vst.msk [vmem:[#allocation3 - $0x6] sm:$0xc0] %vm990_vm7, %v985_v50 }
 0x1d2   : > { %1641 = vrot.lane.b32.xlu0 %v1627_v59, %s5283_s22 }
 0x1d3   : > { %1643 = vrot.lane.b32.xlu1 %v1632_v29, %s5283_s22 }
 0x1d4   : > { %v1082_v34 = vpop.permute.xlu1 %1081  ;;  %v1076_v5 = vpop.permute.xlu0 %1075 }
 0x1d8   : > { %v987_v38 = vpop.permute.xlu1 %986 }
 0x1d9   : > { %993 = vst.msk [vmem:[#allocation3 + $0x2] sm:$0xf] %vm992_vm8, %v987_v38  ;;  %v1084_v10 = vpop.permute.xlu0 %1083 }
 0x1da   : > { %1079 = vst.msk [vmem:[#allocation3] sm:$0x3f] %vm1078_vm9, %v1076_v5 }
 0x1db   : > { %1088 = vst.msk [vmem:[#allocation3 - $0x6] sm:$0xc0] %vm1087_vm10, %v1082_v34 }
 0x1dc   : > { %1090 = vst.msk [vmem:[#allocation3 + $0x2] sm:$0xf] %vm1089_vm11, %v1084_v10 }
 0x1e3   : > { %v2021_v31 = vld [vmem:[#allocation3] sm:$0x1f] }
 0x1e4   : > { %v2031_v14 = vld [vmem:[#allocation3 + $0x1] sm:$0x1f]  ;;  %2026 = vst [vmem:[#allocation4] sm:$0x1f] %v2021_v31 }
 0x1e5   : > { %2036 = vst [vmem:[#allocation4 + $0x70] sm:$0x1f] %v2031_v14  ;;  %v4649_v59 = vpop.f32.mrf.mxu0 }
 0x1e7   : > { %v4650_v61 = vpop.f32.mrf.mxu0 }
 0x1e8   : > { %v4651_v19 = vadd.f32 %v4650_v61, %v4649_v59 }
 0x1ea   : > { %v4687_v37 = vpop.f32.mrf.mxu1  ;;  %v1721_v29 = vadd.f32 %v4651_v19, %v6399_v17 }
 0x1eb   : > { %v2126_v18 = vld [vmem:[#allocation4] sm:$0x1f]  ;;  %v4652_v50 = vpop.f32.mrf.mxu0 }
 0x1ec   : > { %v2127_v56 = vld [vmem:[#allocation4 + $0x70] sm:$0x1f]  ;;  %v4688_v38 = vpop.f32.mrf.mxu1  ;;  %1730 = vst.msk [vmem:[#allocation3 + $0x20] sm:$0x3f] %vm980_vm6, %v1721_v29  ;;  %1733 = vrot.lane.b32.xlu0 %v1721_v29, %s5282_s24 }
 0x1ed   : > { %2200 = vmatprep.mubr.f32.mxu0 %v2127_v56  ;;  %v4689_v34 = vadd.f32 %v4688_v38, %v4687_v37  ;;  %v4653_v5 = vpop.f32.mrf.mxu0 }
 0x1ee   : > { %2201 = vmatmul.mubr.f32.vlgmr.msra.gmra.mxu0 %v2126_v18  ;;  %v4654_v31 = vadd.f32 %v4653_v5, %v4652_v50 }
 0x1ef   : > { %4840 = vmatpush3.msra.mxu0 %v6353_v41  ;;  %v1813_v10 = vadd.f32 %v4689_v34, %v6399_v17  ;;  %v4690_v14 = vpop.f32.mrf.mxu1 }
 0x1f0   : > { %4841 = vmatprep.subr.mxu0 %v6358_v44  ;;  %v1726_v59 = vadd.f32 %v4654_v31, %v6399_v17 }
 0x1f1   : > { %4842 = vmatpush3.msra.mxu0 %v6364_v45  ;;  %v4691_v61 = vpop.f32.mrf.mxu1  ;;  %1822 = vrot.lane.b32.xlu0 %v1813_v10, %s5281_s14 }
 0x1f2   : > { %4843 = vmatprep.subr.mxu0 %v6370_v1  ;;  %v4692_v19 = vadd.f32 %v4691_v61, %v4690_v14  ;;  %1735 = vrot.lane.b32.xlu1 %v1726_v59, %s5282_s24  ;;  %v1176_v37 = vpop.permute.xlu1 %1175 }
 0x1f3   : > { %4844 = vmatpush3.msra.mxu0 %v6376_v46  ;;  %1181 = vst.msk [vmem:[#allocation3 + $0x2] sm:$0xc0] %vm990_vm7, %v1176_v37 }
 0x1f4   : > { %4845 = vmatprep.subr.mxu0 %v6382_v4  ;;  %v1818_v56 = vadd.f32 %v4692_v19, %v6399_v17 }
 0x1f5   : > { %4846 = vmatpush3.msra.mxu0 %v6388_v6 }
 0x1f6   : > { %4847 = vmatprep.subr.mxu0 %v6394_v7  ;;  %1829 = vrot.lane.b32.xlu0 %v1818_v56, %s5283_s22 }
 0x1f7   : > { %4848 = vmatpush3.msra.mxu0 %v6405_v21  ;;  %1827 = vrot.lane.b32.xlu1 %v1813_v10, %s5283_s22  ;;  %v1265_v18 = vpop.permute.xlu1 %1264 }
 0x1f8   : > { %4849 = vmatprep.subr.mxu0 %v6411_v30  ;;  %v1178_v29 = vpop.permute.xlu0 %1177 }
 0x1f9   : > { %4850 = vmatpush3.msra.mxu0 %v6417_v32  ;;  %1182 = vst.msk [vmem:[#allocation3 + $0xa] sm:$0xf] %vm992_vm8, %v1178_v29 }
 0x1fa   : > { %4851 = vmatprep.subr.mxu0 %v6434_v28  ;;  %1267 = vst.msk [vmem:[#allocation3 + $0x8] sm:$0x3f] %vm1078_vm9, %v1265_v18 }
 0x1fb   : > { %4852 = vmatpush3.msra.mxu0 %v6439_v39 }
 0x1fc   : > { %4853 = vmatprep.subr.mxu0 %v6447_v48  ;;  %v1270_v38 = vpop.permute.xlu0 %1269 }
 0x1fd   : > { %4854 = vmatpush3.msra.mxu0 %v6453_v49  ;;  %v1272_v50 = vpop.permute.xlu1 %1271  ;;  %1275 = vst.msk [vmem:[#allocation3 + $0x2] sm:$0xc0] %vm1087_vm10, %v1270_v38 }
 0x1fe   : > { %4855 = vmatprep.subr.mxu0 %v6459_v51  ;;  %1276 = vst.msk [vmem:[#allocation3 + $0xa] sm:$0xf] %vm1089_vm11, %v1272_v50 }
 0x1ff   : > { %4856 = vmatpush3.msra.mxu0 %v6465_v52 }
 0x200   : > { %4857 = vmatprep.subr.mxu0 %v6471_v55 }
 0x201   : > { %4858 = vmatpush3.msra.mxu0 %v6477_v57 }
 0x202   : > { %4859 = vmatprep.subr.mxu0 %v6483_v58 }
 0x203   : > { %4860 = vmatpush3.msra.mxu0 %v6489_v63 }
 0x204   : > { %4861 = vmatprep.subr.mxu0 %v6495_v9 }
 0x205   : > { %4862 = vmatpush3.msra.mxu0 %v6501_v12  ;;  %v2022_v34 = vld [vmem:[#allocation3 + $0x8] sm:$0x1f] }
 0x206   : > { %4863 = vmatprep.subr.mxu0 %v6506_v13  ;;  %v2032_v5 = vld [vmem:[#allocation3 + $0x9] sm:$0x1f]  ;;  %2027 = vst [vmem:[#allocation4 + $0x48] sm:$0x1f] %v2022_v34 }
 0x207   : > { %v2041_v10 = vld [vmem:[#allocation3 + $0x8] sm:$0x1f]  ;;  %4864 = vmatpush3.msra.mxu0 %v6511_v15  ;;  %2037 = vst [vmem:[#allocation4 + $0x18] sm:$0x1f] %v2032_v5 }
 0x208   : > { %2046 = vst [vmem:[#allocation4 + $0x8] sm:$0x1f] %v2041_v10  ;;  %v2051_v31 = vld [vmem:[#allocation3 + $0x9] sm:$0x1f]  ;;  %4865 = vmatprep.subr.mxu0 %v6517_v22 }
 0x209   : > { %2056 = vst [vmem:[#allocation4 + $0x50] sm:$0x1f] %v2051_v31  ;;  %4866 = vmatpush3.msra.mxu0 %v6523_v25  ;;  %v4725_v14 = vpop.f32.mrf.mxu0 }
 0x20a   : > { %4867 = vmatprep.subr.mxu0 %v6529_v27 }
 0x20b   : > { %4868 = vmatpush3.msra.mxu0 %v6535_v33  ;;  %v4726_v59 = vpop.f32.mrf.mxu0 }
 0x20c   : > { %4869 = vmatprep.subr.mxu0 %v6551_v43  ;;  %v4727_v61 = vadd.f32 %v4726_v59, %v4725_v14 }
 0x20d   : > { %4870 = vmatpush3.msra.mxu0 %v6568_v11  ;;  %v4728_v19 = vpop.f32.mrf.mxu0  ;;  %v4763_v29 = vpop.f32.mrf.mxu1  ;;  %v2279_v38 = vld [vmem:[#allocation4 + $0x48] sm:$0x1f] }
 0x20e   : > { %4909 = vmatprep.subr.mxu0 %v6348_v40  ;;  %v2280_v37 = vld [vmem:[#allocation4 + $0x18] sm:$0x1f]  ;;  %v1907_v18 = vadd.f32 %v4727_v61, %v6399_v17 }
 0x20f   : > { %v2128_v56 = vld [vmem:[#allocation4 + $0x8] sm:$0x1f]  ;;  %2347 = vmatprep.mubr.f32.mxu0 %v2280_v37  ;;  %v4729_v34 = vpop.f32.mrf.mxu0  ;;  %v4764_v10 = vpop.f32.mrf.mxu1 }
 0x210   : > { %v2129_v50 = vld [vmem:[#allocation4 + $0x50] sm:$0x1f]  ;;  %2348 = vmatmul.mubr.f32.vlgmr.msra.gmra.mxu0 %v2279_v38  ;;  %1916 = vst.msk [vmem:[#allocation3 + $0x28] sm:$0x3f] %vm980_vm6, %v1907_v18  ;;  %v4730_v5 = vadd.f32 %v4729_v34, %v4728_v19  ;;  %1919 = vrot.lane.b32.xlu1 %v1907_v18, %s5282_s24  ;;  %v4765_v31 = vadd.f32 %v4764_v10, %v4763_v29  ;;  %v7741_v10 = vld [vmem:[#allocation11_spill] sm:$0xff] }
 0x211   : > { %2270 = vmatprep.mubr.f32.mxu1 %v2129_v50  ;;  %4910 = vmatpush3.msra.mxu0 %v6353_v41  ;;  %v4766_v59 = vpop.f32.mrf.mxu1  ;;  %v7739_v34 = vld [vmem:[#allocation9_spill] sm:$0xff] }
 0x212   : > { %2271 = vmatmul.mubr.f32.vlgmr.msra.gmra.mxu1 %v2128_v56  ;;  %v1912_v14 = vadd.f32 %v4730_v5, %v6399_v17  ;;  %4911 = vmatprep.subr.mxu0 %v6358_v44  ;;  %v1999_v61 = vadd.f32 %v4765_v31, %v6399_v17  ;;  %v7740_v5 = vld [vmem:[#allocation10_spill] sm:$0xff]  ;;  %v7742_v31 = vld [vmem:[#allocation12_spill] sm:$0xff] }
 0x213   : > { %4875 = vmatpush3.msra.mxu1 %v6545_v42  ;;  %4912 = vmatpush3.msra.mxu0 %v6364_v45  ;;  %v4767_v19 = vpop.f32.mrf.mxu1 }
 0x214   : > { %4876 = vmatprep.subr.mxu1 %v6557_v2  ;;  %1921 = vrot.lane.b32.xlu0 %v1912_v14, %s5282_s24  ;;  %v4768_v37 = vadd.f32 %v4767_v19, %v4766_v59  ;;  %v7743_v14 = vld [vmem:[#allocation13_spill] sm:$0xff]  ;;  %v7744_v59 = vld [vmem:[#allocation14_spill] sm:$0xff] }
 0x215   : > { %4877 = vmatpush3.msra.mxu1 %v6562_v3  ;;  %2008 = vrot.lane.b32.xlu1 %v1999_v61, %s5281_s14 }
 0x216   : > { %4878 = vmatprep.subr.mxu1 %v6574_v24  ;;  %4913 = vmatprep.subr.mxu0 %v6370_v1  ;;  %v2004_v56 = vadd.f32 %v4768_v37, %v6399_v17  ;;  %v1362_v18 = vpop.permute.xlu0 %1361 }
 0x217   : > { %4879 = vmatpush3.msra.mxu1 %v6581_v26  ;;  %4914 = vmatpush3.msra.mxu0 %v6376_v46  ;;  %1367 = vst.msk [vmem:[#allocation3 + $0xa] sm:$0xc0] %vm990_vm7, %v1362_v18 }
 0x218   : > { %4880 = vmatprep.subr.mxu1 %v6588_v54  ;;  %2013 = vrot.lane.b32.xlu0 %v1999_v61, %s5283_s22 }
 0x219   : > { %4881 = vmatpush3.msra.mxu1 %v6595_v62  ;;  %4915 = vmatprep.subr.mxu0 %v6382_v4 }
 0x21a   : > { %2015 = vrot.lane.b32.xlu1 %v2004_v56, %s5283_s22  ;;  %4882 = vmatprep.subr.mxu1 %v6602_v16  ;;  %v7745_v56 = vld [vmem:[#allocation15_spill] sm:$0xff]  ;;  %s5286_s22 = smov 6  }
 0x21b   : > { %4916 = vmatpush3.msra.mxu0 %v6388_v6  ;;  %4883 = vmatpush3.msra.mxu1 %v6609_v36  ;;  %v1451_v17 = vpop.permute.xlu0 %1450 }
 0x21c   : > { %4917 = vmatprep.subr.mxu0 %v6394_v7  ;;  %4884 = vmatprep.subr.mxu1 %v6615_v23  ;;  %v1364_v29 = vpop.permute.xlu1 %1363 }
 0x21d   : > { %4918 = vmatpush3.msra.mxu0 %v6405_v21  ;;  %4885 = vmatpush3.msra.mxu1 %v6623_v35  ;;  %1368 = vst.msk [vmem:[#allocation3 + $0x12] sm:$0xf] %vm992_vm8, %v1364_v29  ;;  %v7747_v29 = vld [vmem:[#allocation17_spill] sm:$0xff] }
 0x21e   : > { %4919 = vmatprep.subr.mxu0 %v6411_v30  ;;  %4886 = vmatprep.subr.mxu1 %v6629_v53  ;;  %1453 = vst.msk [vmem:[#allocation3 + $0x10] sm:$0x3f] %vm1078_vm9, %v1451_v17  ;;  %v7746_v17 = vld [vmem:[#allocation16_spill] sm:$0xff] }
 0x21f   : > { %4920 = vmatpush3.msra.mxu0 %v6417_v32  ;;  %4887 = vmatpush3.msra.mxu1 %v6642_v20 }
 0x220   : > { %4921 = vmatprep.subr.mxu0 %v6434_v28  ;;  %4888 = vmatprep.subr.mxu1 %v6647_v47  ;;  %v1456_v50 = vpop.permute.xlu1 %1455 }
 0x221   : > { %4922 = vmatpush3.msra.mxu0 %v6439_v39  ;;  %4889 = vmatpush3.msra.mxu1 %v6655_v8  ;;  %v1458_v38 = vpop.permute.xlu0 %1457  ;;  %1461 = vst.msk [vmem:[#allocation3 + $0xa] sm:$0xc0] %vm1087_vm10, %v1456_v50  ;;  %v7748_v50 = vld [vmem:[#allocation18_spill] sm:$0xff] }
 0x222   : > { %4923 = vmatprep.subr.mxu0 %v6447_v48  ;;  %4890 = vmatprep.subr.mxu1 %v6661_v0  ;;  %1462 = vst.msk [vmem:[#allocation3 + $0x12] sm:$0xf] %vm1089_vm11, %v1458_v38  ;;  %v7749_v38 = vld [vmem:[#allocation19_spill] sm:$0xff] }
 0x223   : > { %4924 = vmatpush3.msra.mxu0 %v6453_v49  ;;  %4891 = vmatpush3.msra.mxu1 %v6667_v60 }
 0x224   : > { %4925 = vmatprep.subr.mxu0 %v6459_v51  ;;  %4892 = vmatprep.subr.mxu1 %v7739_v34 }
 0x225   : > { %4926 = vmatpush3.msra.mxu0 %v6465_v52  ;;  %4893 = vmatpush3.msra.mxu1 %v7740_v5 }
 0x226   : > { %4927 = vmatprep.subr.mxu0 %v6471_v55  ;;  %4894 = vmatprep.subr.mxu1 %v7741_v10 }
 0x227   : > { %4928 = vmatpush3.msra.mxu0 %v6477_v57  ;;  %4895 = vmatpush3.msra.mxu1 %v7742_v31 }
 0x228   : > { %4929 = vmatprep.subr.mxu0 %v6483_v58  ;;  %4896 = vmatprep.subr.mxu1 %v7743_v14 }
 0x229   : > { %4930 = vmatpush3.msra.mxu0 %v6489_v63  ;;  %4897 = vmatpush3.msra.mxu1 %v7744_v59  ;;  %v2023_v61 = vld [vmem:[#allocation3 + $0x10] sm:$0x1f] }
 0x22a   : > { %v2033_v19 = vld [vmem:[#allocation3 + $0x11] sm:$0x1f]  ;;  %4931 = vmatprep.subr.mxu0 %v6495_v9  ;;  %4898 = vmatprep.subr.mxu1 %v7745_v56  ;;  %2028 = vst [vmem:[#allocation4 + $0x10] sm:$0x1f] %v2023_v61  ;;  %v7750_v61 = vld [vmem:[#allocation20_spill] sm:$0xff] }
 0x22b   : > { %v2042_v37 = vld [vmem:[#allocation3 + $0x10] sm:$0x1f]  ;;  %2038 = vst [vmem:[#allocation4 + $0x38] sm:$0x1f] %v2033_v19  ;;  %4932 = vmatpush3.msra.mxu0 %v6501_v12  ;;  %4899 = vmatpush3.msra.mxu1 %v7746_v17  ;;  %v7751_v19 = vld [vmem:[#allocation21_spill] sm:$0xff] }
 0x22c   : > { %2047 = vst [vmem:[#allocation4 + $0x68] sm:$0x1f] %v2042_v37  ;;  %v2052_v18 = vld [vmem:[#allocation3 + $0x11] sm:$0x1f]  ;;  %4933 = vmatprep.subr.mxu0 %v6506_v13  ;;  %4900 = vmatprep.subr.mxu1 %v7747_v29  ;;  %v7753_v29 = vld [vmem:[#allocation8_spill] sm:$0xff] }
 0x22d   : > { %2057 = vst [vmem:[#allocation4 + $0x80] sm:$0x1f] %v2052_v18  ;;  %4934 = vmatpush3.msra.mxu0 %v6511_v15  ;;  %4901 = vmatpush3.msra.mxu1 %v7748_v50  ;;  %v7752_v37 = vld [vmem:[#allocation22_spill] sm:$0xff] }
 0x22e   : > { %4935 = vmatprep.subr.mxu0 %v6517_v22  ;;  %4902 = vmatprep.subr.mxu1 %v7749_v38 }
 0x22f   : > { %4936 = vmatpush3.msra.mxu0 %v6523_v25  ;;  %4903 = vmatpush3.msra.mxu1 %v7750_v61 }
 0x230   : > { %4937 = vmatprep.subr.mxu0 %v6529_v27  ;;  %4904 = vmatprep.subr.mxu1 %v7751_v19 }
 0x231   : > { %4938 = vmatpush3.msra.mxu0 %v6535_v33  ;;  %4905 = vmatpush3.msra.mxu1 %v7752_v37  ;;  %v2426_v38 = vld [vmem:[#allocation4 + $0x10] sm:$0x1f] }
 0x232   : > { %4939 = vmatprep.subr.mxu0 %v6551_v43  ;;  %v2427_v18 = vld [vmem:[#allocation4 + $0x38] sm:$0x1f]  ;;  %4944 = vmatprep.subr.mxu1 %v7753_v29 }
 0x233   : > { %v2281_v50 = vld [vmem:[#allocation4 + $0x68] sm:$0x1f]  ;;  %2494 = vmatprep.mubr.f32.mxu0 %v2427_v18  ;;  %4940 = vmatpush3.msra.mxu0 %v6568_v11  ;;  %v5249_v18 = vld [vmem:[%s7687_s4 + $0xe8] sm:$0xff] }
 0x234   : > { %v2282_v22 = vld [vmem:[#allocation4 + $0x80] sm:$0x1f]  ;;  %2495 = vmatmul.mubr.f32.vlgmr.msra.gmra.mxu0 %v2426_v38  ;;  %4979 = vmatprep.subr.mxu0 %v6348_v40 }
 0x235   : > { %2417 = vmatprep.mubr.f32.mxu1 %v2282_v22  ;;  %4980 = vmatpush3.msra.mxu0 %v6353_v41  ;;  %v7757_v22 = vld [vmem:[#allocation19_spill] sm:$0xff] }
 0x236   : > { %2418 = vmatmul.mubr.f32.vlgmr.msra.gmra.mxu1 %v2281_v50  ;;  %4981 = vmatprep.subr.mxu0 %v6358_v44 }
 0x237   : > { %4945 = vmatpush3.msra.mxu1 %v6545_v42  ;;  %4982 = vmatpush3.msra.mxu0 %v6364_v45 }
 0x238   : > { %4946 = vmatprep.subr.mxu1 %v6557_v2  ;;  %4983 = vmatprep.subr.mxu0 %v6370_v1 }
 0x239   : > { %4947 = vmatpush3.msra.mxu1 %v6562_v3  ;;  %4984 = vmatpush3.msra.mxu0 %v6376_v46 }
 0x23a   : > { %4948 = vmatprep.subr.mxu1 %v6574_v24  ;;  %4985 = vmatprep.subr.mxu0 %v6382_v4  ;;  %v1548_v40 = vpop.permute.xlu1 %1547 }
 0x23b   : > { %4949 = vmatpush3.msra.mxu1 %v6581_v26  ;;  %4986 = vmatpush3.msra.mxu0 %v6388_v6  ;;  %1553 = vst.msk [vmem:[#allocation3 + $0x12] sm:$0xc0] %vm990_vm7, %v1548_v40  ;;  %v5253_v40 = vld [vmem:[%s7687_s4 + $0xd8] sm:$0xff] }
 0x23c   : > { %4950 = vmatprep.subr.mxu1 %v6588_v54  ;;  %4987 = vmatprep.subr.mxu0 %v6394_v7 }
 0x23d   : > { %4951 = vmatpush3.msra.mxu1 %v6595_v62  ;;  %4988 = vmatpush3.msra.mxu0 %v6405_v21  ;;  %v7754_v21 = vld [vmem:[#allocation17_spill] sm:$0xff] }
 0x23e   : > { %4952 = vmatprep.subr.mxu1 %v6602_v16  ;;  %4989 = vmatprep.subr.mxu0 %v6411_v30  ;;  %v7755_v30 = vld [vmem:[#allocation7_spill] sm:$0xff] }
 0x23f   : > { %4953 = vmatpush3.msra.mxu1 %v6609_v36  ;;  %v1637_v41 = vpop.permute.xlu1 %1636  ;;  %4990 = vmatpush3.msra.mxu0 %v6417_v32  ;;  %v7756_v32 = vld [vmem:[#allocation18_spill] sm:$0xff] }
 0x240   : > { %4954 = vmatprep.subr.mxu1 %v6615_v23  ;;  %4991 = vmatprep.subr.mxu0 %v6434_v28  ;;  %v1550_v44 = vpop.permute.xlu0 %1549 }
 0x241   : > { %4955 = vmatpush3.msra.mxu1 %v6623_v35  ;;  %4992 = vmatpush3.msra.mxu0 %v6439_v39  ;;  %1554 = vst.msk [vmem:[#allocation3 + $0x1a] sm:$0xf] %vm992_vm8, %v1550_v44 }
 0x242   : > { %4956 = vmatprep.subr.mxu1 %v6629_v53  ;;  %4993 = vmatprep.subr.mxu0 %v6447_v48  ;;  %1639 = vst.msk [vmem:[#allocation3 + $0x18] sm:$0x3f] %vm1078_vm9, %v1637_v41 }
 0x243   : > { %4957 = vmatpush3.msra.mxu1 %v6642_v20  ;;  %4994 = vmatpush3.msra.mxu0 %v6453_v49 }
 0x244   : > { %4958 = vmatprep.subr.mxu1 %v6647_v47  ;;  %4995 = vmatprep.subr.mxu0 %v6459_v51  ;;  %v1642_v1 = vpop.permute.xlu0 %1641 }
 0x245   : > { %4959 = vmatpush3.msra.mxu1 %v6655_v8  ;;  %v1644_v45 = vpop.permute.xlu1 %1643  ;;  %4996 = vmatpush3.msra.mxu0 %v6465_v52  ;;  %1647 = vst.msk [vmem:[#allocation3 + $0x12] sm:$0xc0] %vm1087_vm10, %v1642_v1  ;;  %v5264_v1 = vld [vmem:[%s7687_s4 + $0x178] sm:$0xff] }
 0x246   : > { %4960 = vmatprep.subr.mxu1 %v6661_v0  ;;  %1648 = vst.msk [vmem:[#allocation3 + $0x1a] sm:$0xf] %vm1089_vm11, %v1644_v45  ;;  %4997 = vmatprep.subr.mxu0 %v6471_v55 }
 0x247   : > { %4961 = vmatpush3.msra.mxu1 %v6667_v60  ;;  %4998 = vmatpush3.msra.mxu0 %v6477_v57 }
 0x248   : > { %4962 = vmatprep.subr.mxu1 %v7739_v34  ;;  %4999 = vmatprep.subr.mxu0 %v6483_v58 }
 0x249   : > { %4963 = vmatpush3.msra.mxu1 %v7740_v5  ;;  %5000 = vmatpush3.msra.mxu0 %v6489_v63 }
 0x24a   : > { %4964 = vmatprep.subr.mxu1 %v7741_v10  ;;  %5001 = vmatprep.subr.mxu0 %v6495_v9 }
 0x24b   : > { %4965 = vmatpush3.msra.mxu1 %v7742_v31  ;;  %5002 = vmatpush3.msra.mxu0 %v6501_v12 }
 0x24c   : > { %4966 = vmatprep.subr.mxu1 %v7743_v14  ;;  %5003 = vmatprep.subr.mxu0 %v6506_v13 }
 0x24d   : > { %4967 = vmatpush3.msra.mxu1 %v7744_v59  ;;  %v2024_v46 = vld [vmem:[#allocation3 + $0x18] sm:$0x1f]  ;;  %5004 = vmatpush3.msra.mxu0 %v6511_v15 }
 0x24e   : > { %4968 = vmatprep.subr.mxu1 %v7745_v56  ;;  %v2034_v4 = vld [vmem:[#allocation3 + $0x19] sm:$0x1f]  ;;  %2029 = vst [vmem:[#allocation4 + $0x60] sm:$0x1f] %v2024_v46  ;;  %5005 = vmatprep.subr.mxu0 %v7755_v30  ;;  %v5265_v46 = vld [vmem:[%s7687_s4 + $0x1f0] sm:$0xff] }
 0x24f   : > { %v2043_v6 = vld [vmem:[#allocation3 + $0x18] sm:$0x1f]  ;;  %4969 = vmatpush3.msra.mxu1 %v7746_v17  ;;  %2039 = vst [vmem:[#allocation4 + $0x20] sm:$0x1f] %v2034_v4  ;;  %5006 = vmatpush3.msra.mxu0 %v6523_v25  ;;  %v5266_v4 = vld [vmem:[%s7687_s4 + $0x170] sm:$0xff] }
 0x250   : > { %2048 = vst [vmem:[#allocation4 + $0x30] sm:$0x1f] %v2043_v6  ;;  %v2053_v7 = vld [vmem:[#allocation3 + $0x19] sm:$0x1f]  ;;  %4970 = vmatprep.subr.mxu1 %v7754_v21  ;;  %5007 = vmatprep.subr.mxu0 %v6529_v27  ;;  %v5267_v6 = vld [vmem:[%s7687_s4 + $0x1e8] sm:$0xff] }
 0x251   : > { %2058 = vst [vmem:[#allocation4 + $0x88] sm:$0x1f] %v2053_v7  ;;  %4971 = vmatpush3.msra.mxu1 %v7756_v32  ;;  %5008 = vmatpush3.msra.mxu0 %v6535_v33  ;;  %v5245_v25 = vld [vmem:[%s7687_s4 + $0xf8] sm:$0xff]  ;;  %v5268_v7 = vld [vmem:[%s7687_s4 + $0x168] sm:$0xff] }
 0x252   : > { %4972 = vmatprep.subr.mxu1 %v7757_v22  ;;  %5009 = vmatprep.subr.mxu0 %v6551_v43  ;;  %v5246_v43 = vld [vmem:[%s7687_s4 + $0x78] sm:$0xff] }
 0x253   : > { %4973 = vmatpush3.msra.mxu1 %v7750_v61  ;;  %5010 = vmatpush3.msra.mxu0 %v6568_v11  ;;  %v5247_v11 = vld [vmem:[%s7687_s4 + $0xf0] sm:$0xff] }
 0x254   : > { %4974 = vmatprep.subr.mxu1 %v7751_v19  ;;  %5049 = vmatprep.subr.mxu0 %v5245_v25  ;;  %v5269_v25 = vld [vmem:[%s7687_s4 + $0x1e0] sm:$0xff] }
 0x255   : > { %4975 = vmatpush3.msra.mxu1 %v7752_v37  ;;  %v2573_v33 = vld [vmem:[#allocation4 + $0x60] sm:$0x1f] }
 0x256   : > { %5014 = vmatprep.subr.mxu1 %v7753_v29  ;;  %v2574_v27 = vld [vmem:[#allocation4 + $0x20] sm:$0x1f] }
 0x257   : > { %v2428_v50 = vld [vmem:[#allocation4 + $0x30] sm:$0x1f]  ;;  %2641 = vmatprep.mubr.f32.mxu0 %v2574_v27  ;;  %v5248_v29 = vld [vmem:[%s7687_s4 + $0x70] sm:$0xff] }
 0x258   : > { %v2429_v38 = vld [vmem:[#allocation4 + $0x88] sm:$0x1f]  ;;  %2642 = vmatmul.mubr.f32.vlgmr.msra.gmra.mxu0 %v2573_v33  ;;  %v5270_v27 = vld [vmem:[%s7687_s4 + $0x160] sm:$0xff] }
 0x259   : > { %2564 = vmatprep.mubr.f32.mxu1 %v2429_v38  ;;  %5050 = vmatpush3.msra.mxu0 %v5246_v43  ;;  %v5272_v38 = vld [vmem:[%s7687_s4 + $0x158] sm:$0xff] }
 0x25a   : > { %2565 = vmatmul.mubr.f32.vlgmr.msra.gmra.mxu1 %v2428_v50  ;;  %5051 = vmatprep.subr.mxu0 %v5247_v11  ;;  %v5271_v50 = vld [vmem:[%s7687_s4 + $0x1d8] sm:$0xff] }
 0x25b   : > { %5015 = vmatpush3.msra.mxu1 %v6545_v42  ;;  %5052 = vmatpush3.msra.mxu0 %v5248_v29  ;;  %v5250_v42 = vld [vmem:[%s7687_s4 + $0x68] sm:$0xff] }
 0x25c   : > { %5016 = vmatprep.subr.mxu1 %v6557_v2  ;;  %5053 = vmatprep.subr.mxu0 %v5249_v18  ;;  %v5251_v2 = vld [vmem:[%s7687_s4 + $0xe0] sm:$0xff] }
 0x25d   : > { %5017 = vmatpush3.msra.mxu1 %v6562_v3  ;;  %5054 = vmatpush3.msra.mxu0 %v5250_v42  ;;  %v5252_v3 = vld [vmem:[%s7687_s4 + $0x60] sm:$0xff] }
 0x25e   : > { %5018 = vmatprep.subr.mxu1 %v6574_v24  ;;  %5055 = vmatprep.subr.mxu0 %v5251_v2  ;;  %v1734_v24 = vpop.permute.xlu0 %1733 }
 0x25f   : > { %5019 = vmatpush3.msra.mxu1 %v6581_v26  ;;  %5056 = vmatpush3.msra.mxu0 %v5252_v3  ;;  %1739 = vst.msk [vmem:[#allocation3 + $0x1a] sm:$0xc0] %vm990_vm7, %v1734_v24  ;;  %v5254_v26 = vld [vmem:[%s7687_s4 + $0x58] sm:$0xff] }
 0x260   : > { %5020 = vmatprep.subr.mxu1 %v6588_v54  ;;  %5057 = vmatprep.subr.mxu0 %v5253_v40  ;;  %v5255_v54 = vld [vmem:[%s7687_s4 + $0xd0] sm:$0xff] }
 0x261   : > { %5021 = vmatpush3.msra.mxu1 %v6595_v62  ;;  %5058 = vmatpush3.msra.mxu0 %v5254_v26  ;;  %v5256_v62 = vld [vmem:[%s7687_s4 + $0x50] sm:$0xff]  ;;  %v7153_v26 = vld [vmem:[%s7689_s6 + $0x8] sm:$0xff] }
 0x262   : > { %5022 = vmatprep.subr.mxu1 %v6602_v16  ;;  %5059 = vmatprep.subr.mxu0 %v5255_v54 }
 0x263   : > { %5023 = vmatpush3.msra.mxu1 %v6609_v36  ;;  %5060 = vmatpush3.msra.mxu0 %v5256_v62  ;;  %v1823_v16 = vpop.permute.xlu0 %1822 }
 0x264   : > { %5024 = vmatprep.subr.mxu1 %v6615_v23  ;;  %5061 = vmatprep.subr.mxu0 %v6434_v28  ;;  %v1736_v36 = vpop.permute.xlu1 %1735 }
 0x265   : > { %5025 = vmatpush3.msra.mxu1 %v6623_v35  ;;  %5062 = vmatpush3.msra.mxu0 %v6439_v39  ;;  %1740 = vst.msk [vmem:[#allocation3 + $0x22] sm:$0xf] %vm992_vm8, %v1736_v36 }
 0x266   : > { %5026 = vmatprep.subr.mxu1 %v6629_v53  ;;  %5063 = vmatprep.subr.mxu0 %v6447_v48  ;;  %1825 = vst.msk [vmem:[#allocation3 + $0x20] sm:$0x3f] %vm1078_vm9, %v1823_v16 }
 0x267   : > { %5027 = vmatpush3.msra.mxu1 %v6642_v20  ;;  %5064 = vmatpush3.msra.mxu0 %v6453_v49 }
 0x268   : > { %5028 = vmatprep.subr.mxu1 %v6647_v47  ;;  %5065 = vmatprep.subr.mxu0 %v6459_v51  ;;  %v1830_v28 = vpop.permute.xlu0 %1829 }
 0x269   : > { %5029 = vmatpush3.msra.mxu1 %v6655_v8  ;;  %5066 = vmatpush3.msra.mxu0 %v6465_v52  ;;  %v1828_v39 = vpop.permute.xlu1 %1827  ;;  %1834 = vst.msk [vmem:[#allocation3 + $0x22] sm:$0xf] %vm1089_vm11, %v1830_v28  ;;  %v5257_v52 = vld [vmem:[%s7687_s4 + $0x90] sm:$0xff] }
 0x26a   : > { %5030 = vmatprep.subr.mxu1 %v6661_v0  ;;  %5067 = vmatprep.subr.mxu0 %v6471_v55  ;;  %1833 = vst.msk [vmem:[#allocation3 + $0x1a] sm:$0xc0] %vm1087_vm10, %v1828_v39 }
 0x26b   : > { %5031 = vmatpush3.msra.mxu1 %v6667_v60  ;;  %5068 = vmatpush3.msra.mxu0 %v6477_v57  ;;  %v5258_v57 = vld [vmem:[%s7687_s4 + $0x10] sm:$0xff] }
 0x26c   : > { %5032 = vmatprep.subr.mxu1 %v7739_v34  ;;  %5069 = vmatprep.subr.mxu0 %v6483_v58  ;;  %v5259_v58 = vld [vmem:[%s7687_s4 + $0x88] sm:$0xff] }
 0x26d   : > { %5033 = vmatpush3.msra.mxu1 %v7740_v5  ;;  %5070 = vmatpush3.msra.mxu0 %v6489_v63  ;;  %v5260_v63 = vld [vmem:[%s7687_s4 + $0x8] sm:$0xff] }
 0x26e   : > { %5034 = vmatprep.subr.mxu1 %v7741_v10  ;;  %5071 = vmatprep.subr.mxu0 %v6495_v9  ;;  %v5261_v9 = vld [vmem:[%s7687_s4 + $0x80] sm:$0xff] }
 0x26f   : > { %5035 = vmatpush3.msra.mxu1 %v7742_v31  ;;  %5072 = vmatpush3.msra.mxu0 %v6501_v12  ;;  %v5262_v12 = vld [vmem:[%s7687_s4] sm:$0xff] }
 0x270   : > { %5036 = vmatprep.subr.mxu1 %v7743_v14  ;;  %5073 = vmatprep.subr.mxu0 %v6506_v13  ;;  %v5263_v13 = vld [vmem:[%s7687_s4 + $0x1f8] sm:$0xff] }
 0x271   : > { %5037 = vmatpush3.msra.mxu1 %v7744_v59  ;;  %5074 = vmatpush3.msra.mxu0 %v6511_v15  ;;  %v2025_v48 = vld [vmem:[#allocation3 + $0x20] sm:$0x1f] }
 0x272   : > { %5038 = vmatprep.subr.mxu1 %v7745_v56  ;;  %v2035_v49 = vld [vmem:[#allocation3 + $0x21] sm:$0x1f]  ;;  %5075 = vmatprep.subr.mxu0 %v5257_v52  ;;  %2030 = vst [vmem:[#allocation4 + $0x28] sm:$0x1f] %v2025_v48 }
 0x273   : > { %v2044_v51 = vld [vmem:[#allocation3 + $0x20] sm:$0x1f]  ;;  %5039 = vmatpush3.msra.mxu1 %v7746_v17  ;;  %2040 = vst [vmem:[#allocation4 + $0x58] sm:$0x1f] %v2035_v49  ;;  %5076 = vmatpush3.msra.mxu0 %v5258_v57 }
 0x274   : > { %2049 = vst [vmem:[#allocation4 + $0x40] sm:$0x1f] %v2044_v51  ;;  %v2054_v55 = vld [vmem:[#allocation3 + $0x21] sm:$0x1f]  ;;  %5040 = vmatprep.subr.mxu1 %v7754_v21  ;;  %5077 = vmatprep.subr.mxu0 %v5259_v58 }
 0x275   : > { %2059 = vst [vmem:[#allocation4 + $0x90] sm:$0x1f] %v2054_v55  ;;  %5041 = vmatpush3.msra.mxu1 %v7756_v32  ;;  %5078 = vmatpush3.msra.mxu0 %v5260_v63  ;;  %v7164_v55 = vld [vmem:[%s7689_s6 + $0xf8] sm:$0xff] }
 0x276   : > { %5042 = vmatprep.subr.mxu1 %v7757_v22  ;;  %5079 = vmatprep.subr.mxu0 %v5261_v9 }
 0x277   : > { %5043 = vmatpush3.msra.mxu1 %v7750_v61  ;;  %5080 = vmatpush3.msra.mxu0 %v5262_v12 }
 0x278   : > { %5044 = vmatprep.subr.mxu1 %v7751_v19 }
 0x279   : > { %5045 = vmatpush3.msra.mxu1 %v7752_v37  ;;  %v2720_v45 = vld [vmem:[#allocation4 + $0x28] sm:$0x1f] }
 0x27a   : > { %5084 = vmatprep.subr.mxu1 %v5263_v13  ;;  %v2721_v15 = vld [vmem:[#allocation4 + $0x58] sm:$0x1f] }
 0x27b   : > { %v2575_v41 = vld [vmem:[#allocation4 + $0x40] sm:$0x1f]  ;;  %2788 = vmatprep.mubr.f32.mxu0 %v2721_v15 }
 0x27c   : > { %v2576_v44 = vld [vmem:[#allocation4 + $0x90] sm:$0x1f]  ;;  %2789 = vmatmul.mubr.f32.vlgmr.msra.gmra.mxu0 %v2720_v45 }
 0x27d   : > { %2711 = vmatprep.mubr.f32.mxu1 %v2576_v44  ;;  %3159 = vmatprep.mubr.f32.mxu0 %v7153_v26 }
 0x27e   : > { %2712 = vmatmul.mubr.f32.vlgmr.msra.gmra.mxu1 %v2575_v41 }
 0x27f   : > { %5085 = vmatpush3.msra.mxu1 %v5264_v1 }
 0x280   : > { %5086 = vmatprep.subr.mxu1 %v5265_v46 }
 0x281   : > { %5087 = vmatpush3.msra.mxu1 %v5266_v4 }
 0x282   : > { %5088 = vmatprep.subr.mxu1 %v5267_v6  ;;  %v1920_v30 = vpop.permute.xlu1 %1919 }
 0x283   : > { %5089 = vmatpush3.msra.mxu1 %v5268_v7  ;;  %1925 = vst.msk [vmem:[#allocation3 + $0x22] sm:$0xc0] %vm990_vm7, %v1920_v30 }
 0x284   : > { %5090 = vmatprep.subr.mxu1 %v5269_v25 }
 0x285   : > { %5091 = vmatpush3.msra.mxu1 %v5270_v27 }
 0x286   : > { %5092 = vmatprep.subr.mxu1 %v5271_v50  ;;  %v1922_v33 = vpop.permute.xlu0 %1921 }
 0x287   : > { %5093 = vmatpush3.msra.mxu1 %v5272_v38  ;;  %v2009_v43 = vpop.permute.xlu1 %2008  ;;  %1926 = vst.msk [vmem:[#allocation3 + $0x2a] sm:$0xf] %vm992_vm8, %v1922_v33 }
 0x288   : > { %5094 = vmatprep.subr.mxu1 %v6615_v23  ;;  %2011 = vst.msk [vmem:[#allocation3 + $0x28] sm:$0x3f] %vm1078_vm9, %v2009_v43 }
 0x289   : > { %5095 = vmatpush3.msra.mxu1 %v6623_v35 }
 0x28a   : > { %5096 = vmatprep.subr.mxu1 %v6629_v53  ;;  %v2014_v11 = vpop.permute.xlu0 %2013 }
 0x28b   : > { %5097 = vmatpush3.msra.mxu1 %v6642_v20  ;;  %2019 = vst.msk [vmem:[#allocation3 + $0x22] sm:$0xc0] %vm1087_vm10, %v2014_v11 }
 0x28c   : > { %5098 = vmatprep.subr.mxu1 %v6647_v47  ;;  %v2016_v29 = vpop.permute.xlu1 %2015 }
 0x28d   : > { %5099 = vmatpush3.msra.mxu1 %v6655_v8  ;;  %2020 = vst.msk [vmem:[#allocation3 + $0x2a] sm:$0xf] %vm1089_vm11, %v2016_v29 }
 0x28e   : > { %5100 = vmatprep.subr.mxu1 %v6661_v0 }
 0x28f   : > { %5101 = vmatpush3.msra.mxu1 %v6667_v60  ;;  %v7139_v60 = vld [vmem:[%s7688_s5] ss:$0 sm:$0xff] }
 0x290   : > { %5102 = vmatprep.subr.mxu1 %v7739_v34 }
 0x291   : > { %5103 = vmatpush3.msra.mxu1 %v7740_v5 }
 0x292   : > { %5104 = vmatprep.subr.mxu1 %v7741_v10 }
 0x293   : > { %5105 = vmatpush3.msra.mxu1 %v7742_v31 }
 0x294   : > { %5106 = vmatprep.subr.mxu1 %v7743_v14  ;;  %v2045_v23 = vld [vmem:[#allocation3 + $0x28] sm:$0x1f] }
 0x295   : > { %v2055_v35 = vld [vmem:[#allocation3 + $0x29] sm:$0x1f]  ;;  %5107 = vmatpush3.msra.mxu1 %v7744_v59  ;;  %2050 = vst [vmem:[#allocation4 + $0x98] sm:$0x1f] %v2045_v23 }
 0x296   : > { %2060 = vst [vmem:[#allocation4 + $0x78] sm:$0x1f] %v2055_v35  ;;  %5108 = vmatprep.subr.mxu1 %v7745_v56 }
 0x297   : > { %5109 = vmatpush3.msra.mxu1 %v7746_v17 }
 0x298   : > { %5110 = vmatprep.subr.mxu1 %v7754_v21 }
 0x299   : > { %5111 = vmatpush3.msra.mxu1 %v7756_v32 }
 0x29a   : > { %5112 = vmatprep.subr.mxu1 %v7757_v22 }
 0x29b   : > { %5113 = vmatpush3.msra.mxu1 %v7750_v61 }
 0x29c   : > { %5114 = vmatprep.subr.mxu1 %v7751_v19  ;;  %v2722_v20 = vld [vmem:[#allocation4 + $0x98] sm:$0x1f] }
 0x29d   : > { %5115 = vmatpush3.msra.mxu1 %v7752_v37  ;;  %v2723_v53 = vld [vmem:[#allocation4 + $0x78] sm:$0x1f] }
 0x29e   : > { %2858 = vmatprep.mubr.f32.mxu1 %v2723_v53 }
 0x29f   : > { %2859 = vmatmul.mubr.f32.vlgmr.msra.gmra.mxu1 %v2722_v20 }
 0x2a0   : > { %3189 = vmatprep.mubr.f32.mxu1 %v7164_v55 }
 0x2ae   : > { %v4801_v47 = vpop.f32.mrf.mxu0 }
 0x2b0   : > { %v4802_v8 = vpop.f32.mrf.mxu0 }
 0x2b1   : > { %v4803_v0 = vadd.f32 %v4802_v8, %v4801_v47  ;;  %v5284_v47 = vmov 0  }
 0x2b2   : > { %5206 = vset.pattern.permute.xlu1 %v5284_v47  ;;  %5205 = vset.pattern.permute.xlu0 %v5284_v47  ;;  %v7423_v47 = vld [vmem:[%s7689_s6 + $0xb0] sm:$0xff] }
 0x2b3   : > { %v2203_v10 = vadd.f32 %v4803_v0, %v7139_v60 }
 0x2d0   : > { %v4871_v61 = vpop.f32.mrf.mxu0 }
 0x2d2   : > { %v4836_v34 = vpop.f32.mrf.mxu1  ;;  %v4872_v19 = vpop.f32.mrf.mxu0 }
 0x2d3   : > { %v4873_v37 = vadd.f32 %v4872_v19, %v4871_v61  ;;  %v3017_v61 = vld [vmem:[%s7690_s7 + $0x38] sm:$0xff]  ;;  %v3012_v19 = vld [vmem:[%s7690_s7 + $0x10] sm:$0xff] }
 0x2d4   : > { %v4837_v5 = vpop.f32.mrf.mxu1 }
 0x2d5   : > { %v4838_v31 = vadd.f32 %v4837_v5, %v4836_v34  ;;  %v2350_v22 = vadd.f32 %v4873_v37, %v7139_v60  ;;  %v3010_v5 = vld [vmem:[%s7690_s7] sm:$0xff] }
 0x2d7   : > { %v2273_v14 = vadd.f32 %v4838_v31, %v2203_v10  ;;  %v3013_v31 = vld [vmem:[%s7690_s7 + $0x18] sm:$0xff] }
 0x2d9   : > { %2277 = vst.msk [vmem:[#allocation5] sm:$0x1f] %vm2276_vm12, %v2273_v14  ;;  %v3015_v14 = vld [vmem:[%s7690_s7 + $0x28] sm:$0xff] }
 0x2e0   : > { %v2873_v59 = vld [vmem:[#allocation5 + $0x1] sm:$0x7] }
 0x2e1   : > { %v2866_v56 = vld [vmem:[#allocation5] sm:$0x7]  ;;  %2879 = vrot.lane.b32.xlu0 %v2873_v59, %s5281_s14 }
 0x2e2   : > { %v2892_v17 = vld [vmem:[#allocation5 + $0x2] sm:$0x7]  ;;  %2870 = vst.msk [vmem:[#allocation6] sm:$0x7] %vm2869_vm13, %v2866_v56 }
 0x2e3   : > { %2895 = vst.msk [vmem:[#allocation6 + $0x4] sm:$0x7] %vm2869_vm13, %v2892_v17  ;;  %v3011_v17 = vld [vmem:[%s7690_s7 + $0x8] sm:$0xff] }
 0x2f4   : > { %v4941_v16 = vpop.f32.mrf.mxu0 }
 0x2f6   : > { %v4906_v21 = vpop.f32.mrf.mxu1  ;;  %v4942_v36 = vpop.f32.mrf.mxu0 }
 0x2f7   : > { %v4943_v28 = vadd.f32 %v4942_v36, %v4941_v16  ;;  %v7246_v16 = vld [vmem:[%s7689_s6 + $0x28] sm:$0xff]  ;;  %v7251_v36 = vld [vmem:[%s7689_s6 + $0x118] sm:$0xff] }
 0x2f8   : > { %v4907_v32 = vpop.f32.mrf.mxu1 }
 0x2f9   : > { %v4908_v18 = vadd.f32 %v4907_v32, %v4906_v21  ;;  %v2497_v49 = vadd.f32 %v4943_v28, %v7139_v60  ;;  %v3014_v32 = vld [vmem:[%s7690_s7 + $0x20] sm:$0xff]  ;;  %v7256_v28 = vld [vmem:[%s7689_s6 + $0x58] sm:$0xff] }
 0x2fb   : > { %v2420_v42 = vadd.f32 %v4908_v18, %v2350_v22  ;;  %v3016_v18 = vld [vmem:[%s7690_s7 + $0x30] sm:$0xff] }
 0x2fd   : > { %2424 = vst.msk [vmem:[#allocation5 + $0x8] sm:$0x1f] %vm2276_vm12, %v2420_v42 }
 0x304   : > { %v2898_v2 = vld [vmem:[#allocation5 + $0x8] sm:$0x7] }
 0x305   : > { %v2922_v3 = vld [vmem:[#allocation5 + $0xa] sm:$0x7]  ;;  %2904 = vrot.lane.b32.xlu1 %v2898_v2, %s5281_s14 }
 0x306   : > { %2928 = vrot.lane.b32.xlu0 %v2922_v3, %s5281_s14  ;;  %v2916_v24 = vld [vmem:[#allocation5 + $0x9] sm:$0x7] }
 0x307   : > { %v2867_v40 = vld [vmem:[#allocation5 + $0x8] sm:$0x7]  ;;  %2919 = vst.msk [vmem:[#allocation6 + $0x8] sm:$0x7] %vm2869_vm13, %v2916_v24  ;;  %v7221_v24 = vld [vmem:[%s7689_s6] sm:$0xff] }
 0x308   : > { %2871 = vst.msk [vmem:[#allocation6 + $0x14] sm:$0x7] %vm2869_vm13, %v2867_v40  ;;  %v2893_v54 = vld [vmem:[#allocation5 + $0xa] sm:$0x7]  ;;  %v7226_v40 = vld [vmem:[%s7689_s6 + $0xf0] sm:$0xff] }
 0x309   : > { %2896 = vst.msk [vmem:[#allocation6 + $0x18] sm:$0x7] %vm2869_vm13, %v2893_v54  ;;  %v2874_v62 = vld [vmem:[#allocation5 + $0x9] sm:$0x7]  ;;  %v7232_v54 = vld [vmem:[%s7689_s6 + $0x30] sm:$0xff] }
 0x30a   : > { %2881 = vrot.lane.b32.xlu0 %v2874_v62, %s5281_s14  ;;  %v7237_v62 = vld [vmem:[%s7689_s6 + $0x120] sm:$0xff] }
 0x318   : > { %v5011_v45 = vpop.f32.mrf.mxu0 }
 0x31a   : > { %v4976_v39 = vpop.f32.mrf.mxu1  ;;  %v5012_v1 = vpop.f32.mrf.mxu0 }
 0x31b   : > { %v5013_v46 = vadd.f32 %v5012_v1, %v5011_v45  ;;  %v7336_v1 = vld [vmem:[%s7689_s6 + $0x98] sm:$0xff] }
 0x31c   : > { %v4977_v48 = vpop.f32.mrf.mxu1 }
 0x31d   : > { %v4978_v51 = vadd.f32 %v4977_v48, %v4976_v39  ;;  %v2644_v7 = vadd.f32 %v5013_v46, %v7139_v60  ;;  %v7262_v39 = vld [vmem:[%s7689_s6 + $0x18] sm:$0xff]  ;;  %v7270_v48 = vld [vmem:[%s7689_s6 + $0x50] sm:$0xff]  ;;  %v7343_v46 = vld [vmem:[%s7689_s6 + $0xc0] sm:$0xff] }
 0x31f   : > { %v2567_v52 = vadd.f32 %v4978_v51, %v2497_v49  ;;  %v7276_v49 = vld [vmem:[%s7689_s6 + $0x80] sm:$0xff]  ;;  %v7283_v51 = vld [vmem:[%s7689_s6 + $0x78] sm:$0xff] }
 0x321   : > { %2571 = vst.msk [vmem:[#allocation5 + $0x10] sm:$0x1f] %vm2276_vm12, %v2567_v52  ;;  %v7288_v52 = vld [vmem:[%s7689_s6 + $0xa8] sm:$0xff] }
 0x328   : > { %v2946_v57 = vld [vmem:[#allocation5 + $0x11] sm:$0x7] }
 0x329   : > { %v2923_v58 = vld [vmem:[#allocation5 + $0x12] sm:$0x7]  ;;  %2952 = vrot.lane.b32.xlu1 %v2946_v57, %s5281_s14 }
 0x32a   : > { %2930 = vrot.lane.b32.xlu0 %v2923_v58, %s5281_s14  ;;  %v2964_v63 = vld [vmem:[#allocation5 + $0x12] sm:$0x7]  ;;  %v7300_v58 = vld [vmem:[%s7689_s6 + $0xd0] sm:$0xff] }
 0x32b   : > { %v2940_v9 = vld [vmem:[#allocation5 + $0x10] sm:$0x7]  ;;  %2967 = vst.msk [vmem:[#allocation6 + $0x10] sm:$0x7] %vm2869_vm13, %v2964_v63  ;;  %v7307_v63 = vld [vmem:[%s7689_s6 + $0xc8] sm:$0xff] }
 0x32c   : > { %2943 = vst.msk [vmem:[#allocation6 + $0xc] sm:$0x7] %vm2869_vm13, %v2940_v9  ;;  %v2917_v12 = vld [vmem:[#allocation5 + $0x11] sm:$0x7] }
 0x32d   : > { %v2868_v13 = vld [vmem:[#allocation5 + $0x10] sm:$0x7]  ;;  %2920 = vst.msk [vmem:[#allocation6 + $0x1c] sm:$0x7] %vm2869_vm13, %v2917_v12 }
 0x32e   : > { %2872 = vst.msk [vmem:[#allocation6 + $0x28] sm:$0x7] %vm2869_vm13, %v2868_v13  ;;  %v2894_v15 = vld [vmem:[#allocation5 + $0x12] sm:$0x7] }
 0x32f   : > { %v2899_v41 = vld [vmem:[#allocation5 + $0x10] sm:$0x7]  ;;  %2897 = vst.msk [vmem:[#allocation6 + $0x2c] sm:$0x7] %vm2869_vm13, %v2894_v15  ;;  %v7320_v15 = vld [vmem:[%s7689_s6 + $0x48] sm:$0xff] }
 0x330   : > { %v2875_v44 = vld [vmem:[#allocation5 + $0x11] sm:$0x7]  ;;  %2906 = vrot.lane.b32.xlu1 %v2899_v41, %s5281_s14  ;;  %v7327_v41 = vld [vmem:[%s7689_s6 + $0x70] sm:$0xff] }
 0x331   : > { %2883 = vrot.lane.b32.xlu0 %v2875_v44, %s5281_s14  ;;  %v7295_v57 = vld [vmem:[%s7689_s6 + $0xa0] sm:$0xff] }
 0x332   : > { %v3020_v3 = vld [vmem:[#allocation6 + $0x10] sm:$0x7]  ;;  %v7312_v9 = vld [vmem:[%s7689_s6 + $0x20] sm:$0xff] }
 0x33c   : > { %v5081_v23 = vpop.f32.mrf.mxu0 }
 0x33e   : > { %v5046_v4 = vpop.f32.mrf.mxu1  ;;  %v5082_v35 = vpop.f32.mrf.mxu0 }
 0x33f   : > { %v5083_v53 = vadd.f32 %v5082_v35, %v5081_v23  ;;  %v7399_v23 = vld [vmem:[%s7689_s6 + $0x60] sm:$0xff]  ;;  %v7404_v35 = vld [vmem:[%s7689_s6 + $0x90] sm:$0xff] }
 0x340   : > { %v5047_v6 = vpop.f32.mrf.mxu1 }
 0x341   : > { %v5048_v30 = vadd.f32 %v5047_v6, %v5046_v4  ;;  %v2791_v0 = vadd.f32 %v5083_v53, %v7139_v60  ;;  %v7352_v6 = vld [vmem:[%s7689_s6 + $0xe8] sm:$0xff] }
 0x342   : > { %v7411_v53 = vld [vmem:[%s7689_s6 + $0x88] sm:$0xff] }
 0x343   : > { %v2714_v25 = vadd.f32 %v5048_v30, %v2644_v7  ;;  %v7357_v30 = vld [vmem:[%s7689_s6 + $0x110] sm:$0xff] }
 0x345   : > { %2718 = vst.msk [vmem:[#allocation5 + $0x18] sm:$0x1f] %vm2276_vm12, %v2714_v25  ;;  %v7364_v25 = vld [vmem:[%s7689_s6 + $0x10] sm:$0xff] }
 0x34c   : > { %v2947_v27 = vld [vmem:[#allocation5 + $0x19] sm:$0x7] }
 0x34d   : > { %v2924_v50 = vld [vmem:[#allocation5 + $0x1a] sm:$0x7]  ;;  %2954 = vrot.lane.b32.xlu1 %v2947_v27, %s5281_s14 }
 0x34e   : > { %2932 = vrot.lane.b32.xlu0 %v2924_v50, %s5281_s14  ;;  %v2965_v38 = vld [vmem:[#allocation5 + $0x1a] sm:$0x7] }
 0x34f   : > { %v2941_v33 = vld [vmem:[#allocation5 + $0x18] sm:$0x7]  ;;  %2968 = vst.msk [vmem:[#allocation6 + $0x24] sm:$0x7] %vm2869_vm13, %v2965_v38  ;;  %v7371_v38 = vld [vmem:[%s7689_s6 + $0x40] sm:$0xff] }
 0x350   : > { %v2918_v43 = vld [vmem:[#allocation5 + $0x19] sm:$0x7]  ;;  %2944 = vst.msk [vmem:[#allocation6 + $0x20] sm:$0x7] %vm2869_vm13, %v2941_v33  ;;  %v7376_v33 = vld [vmem:[%s7689_s6 + $0x138] sm:$0xff] }
 0x351   : > { %2921 = vst.msk [vmem:[#allocation6 + $0x30] sm:$0x7] %vm2869_vm13, %v2918_v43  ;;  %v2900_v11 = vld [vmem:[#allocation5 + $0x18] sm:$0x7] }
 0x352   : > { %2908 = vrot.lane.b32.xlu1 %v2900_v11, %s5281_s14  ;;  %3023 = vperm.xlu0 %5205, %v3010_v5   ;;  %v7383_v11 = vld [vmem:[%s7689_s6 + $0x38] sm:$0xff] }
 0x353   : > { %v2880_v29 = vpop.permute.xlu0 %2879 }
 0x354   : > { %2889 = vst.msk [vmem:[#allocation6] sm:$0x7] %vm2888_vm14, %v2880_v29  ;;  %v7389_v29 = vld [vmem:[%s7689_s6 + $0x68] sm:$0xff] }
 0x356   : > { %3038 = vperm.xlu0 %5205, %v3013_v31   ;;  %v3422_v43 = vld [vmem:[#allocation6 + $0x24] sm:$0x7]  ;;  %v7447_v31 = vld [vmem:[%s7689_s6 + $0x100] sm:$0xff] }
 0x35a   : > { %3048 = vperm.xlu0 %5205, %v3015_v14   ;;  %v7454_v14 = vld [vmem:[%s7689_s6 + $0x130] sm:$0xff] }
 0x35e   : > { %3058 = vperm.xlu0 %5205, %v3017_v61  }
 0x35f   : > { %v5116_v20 = vpop.f32.mrf.mxu1 }
 0x361   : > { %v5117_v8 = vpop.f32.mrf.mxu1 }
 0x362   : > { %v5118_v34 = vadd.f32 %v5117_v8, %v5116_v20  ;;  %v7416_v20 = vld [vmem:[%s7689_s6 + $0xb8] sm:$0xff]  ;;  %v7428_v8 = vld [vmem:[%s7689_s6 + $0xe0] sm:$0xff] }
 0x364   : > { %v2861_v10 = vadd.f32 %v5118_v34, %v2791_v0  ;;  %v7435_v0 = vld [vmem:[%s7689_s6 + $0xd8] sm:$0xff]  ;;  %v7440_v34 = vld [vmem:[%s7689_s6 + $0x108] sm:$0xff] }
 0x366   : > { %2865 = vst.msk [vmem:[#allocation5 + $0x20] sm:$0x1f] %vm2276_vm12, %v2861_v10 }
 0x36d   : > { %v2948_v60 = vld [vmem:[#allocation5 + $0x21] sm:$0x7] }
 0x36e   : > { %v2966_v59 = vld [vmem:[#allocation5 + $0x22] sm:$0x7]  ;;  %2956 = vrot.lane.b32.xlu1 %v2948_v60, %s5281_s14  ;;  %s4312_s14 = sshll.u32 %s7759_s28, 6  ;;  %s5285_s28 = smov 3  }
 0x36f   : > { %v2942_v56 = vld [vmem:[#allocation5 + $0x20] sm:$0x7]  ;;  %2969 = vst.msk [vmem:[#allocation6 + $0x38] sm:$0x7] %vm2869_vm13, %v2966_v59  ;;  %v7461_v59 = vld [vmem:[%s7689_s6 + $0x128] sm:$0xff]  ;;  %s7577_s24 = scalar_lea.vmem %s7691_s8, %s4312_s14 }
 0x370   : > { %2945 = vst.msk [vmem:[#allocation6 + $0x34] sm:$0x7] %vm2869_vm13, %v2942_v56 }
 0x372   : > { %3028 = vperm.xlu1 %5206, %v3011_v17  }
 0x376   : > { %3033 = vperm.xlu1 %5206, %v3012_v19  }
 0x377   : > { %v2905_v37 = vpop.permute.xlu1 %2904 }
 0x378   : > { %v2929_v21 = vpop.permute.xlu0 %2928  ;;  %2913 = vst.msk [vmem:[#allocation6 + $0x4] sm:$0x7] %vm2888_vm14, %v2905_v37  ;;  %v3791_v37 = vld [vmem:[#allocation6 + $0x38] sm:$0x7] }
 0x379   : > { %2937 = vst.msk [vmem:[#allocation6 + $0x8] sm:$0x7] %vm2888_vm14, %v2929_v21 }
 0x37a   : > { %3043 = vperm.xlu1 %5206, %v3014_v32  }
 0x37c   : > { %v2882_v22 = vpop.permute.xlu0 %2881 }
 0x37d   : > { %2890 = vst.msk [vmem:[#allocation6 + $0x14] sm:$0x7] %vm2888_vm14, %v2882_v22 }
 0x37e   : > { %3053 = vperm.xlu1 %5206, %v3016_v18  }
 0x37f   : > { %v3018_v42 = vld [vmem:[#allocation6] sm:$0x77] }
 0x380   : > { %v3064_v2 = vcombine.high %v3018_v42, %v3018_v42 }
 0x382   : > { %3125 = vmatprep.subr.mxu0 %v3064_v2  ;;  %5188 = vmatprep.subr.mxu1 %v3064_v2 }
 0x383   : > { %3126 = vmatpush1.xpose.msra.mxu0 %v3018_v42  ;;  %5189 = vmatpush1.xpose.msra.mxu1 %v3018_v42 }
 0x384   : > { %5146 = vmatprep.subr.msk.mxu0 %vm3068_vm15, %v3020_v3 }
 0x386   : > { %3160 = vmatmul.mubr.f32.vlgmr.msra.gmra.mxu0 %v7221_v24  ;;  %3190 = vmatmul.mubr.f32.vlgmr.msra.gmra.mxu1 %v7226_v40 }
 0x387   : > { %5147 = vmatpush3.xpose.msk.msra.mxu0 %vm3068_vm15, %v3020_v3  ;;  %3164 = vmatprep.mubr.f32.mxu0 %v7232_v54 }
 0x388   : > { %3194 = vmatprep.mubr.f32.mxu1 %v7237_v62 }
 0x38a   : > { %3165 = vmatmul.mubr.f32.gmra.mxu0 %v7246_v16  ;;  %3195 = vmatmul.mubr.f32.gmra.mxu1 %v7251_v36 }
 0x38b   : > { %3169 = vmatprep.mubr.f32.mxu0 %v7256_v28  ;;  %3264 = vmatprep.mubr.f32.mxu1 %v7262_v39 }
 0x38e   : > { %3170 = vmatmul.mubr.f32.gmra.mxu0 %v7270_v48 }
 0x38f   : > { %3174 = vmatprep.mubr.f32.mxu0 %v7276_v49 }
 0x392   : > { %3175 = vmatmul.mubr.f32.gmra.mxu0 %v7283_v51 }
 0x393   : > { %3179 = vmatprep.mubr.f32.mxu0 %v7288_v52 }
 0x396   : > { %3180 = vmatmul.mubr.f32.gmra.mxu0 %v7295_v57 }
 0x397   : > { %3184 = vmatprep.mubr.f32.mxu0 %v7300_v58 }
 0x39a   : > { %3185 = vmatmul.mubr.f32.gmra.mxu0 %v7307_v63 }
 0x39b   : > { %v2953_v12 = vpop.permute.xlu1 %2952  ;;  %5148 = vmatprep.mubr.msk.f32.mxu0 %vm3068_vm15, %v7312_v9 }
 0x39c   : > { %v2931_v13 = vpop.permute.xlu0 %2930  ;;  %2961 = vst.msk [vmem:[#allocation6 + $0xc] sm:$0x7] %vm2888_vm14, %v2953_v12 }
 0x39d   : > { %2938 = vst.msk [vmem:[#allocation6 + $0x1c] sm:$0x7] %vm2888_vm14, %v2931_v13 }
 0x39e   : > { %5149 = vmatmul.mubr.msk.f32.vlgmr.msra.gmra.mxu0 %vm3068_vm15, %v7320_v15 }
 0x39f   : > { %5151 = vmatprep.mubr.msk.f32.mxu0 %vm3068_vm15, %v7327_v41 }
 0x3a2   : > { %v2907_v44 = vpop.permute.xlu1 %2906  ;;  %5152 = vmatmul.mubr.msk.f32.gmra.mxu0 %vm3068_vm15, %v7336_v1 }
 0x3a3   : > { %v2884_v45 = vpop.permute.xlu0 %2883  ;;  %2914 = vst.msk [vmem:[#allocation6 + $0x18] sm:$0x7] %vm2888_vm14, %v2907_v44  ;;  %v3019_v4 = vld [vmem:[#allocation6 + $0x8] sm:$0x77]  ;;  %5154 = vmatprep.mubr.msk.f32.mxu0 %vm3068_vm15, %v7343_v46 }
 0x3a4   : > { %2891 = vst.msk [vmem:[#allocation6 + $0x28] sm:$0x7] %vm2888_vm14, %v2884_v45  ;;  %v3065_v7 = vcombine.high %v3019_v4, %v3019_v4 }
 0x3a6   : > { %3230 = vmatprep.subr.mxu1 %v3065_v7  ;;  %5155 = vmatmul.mubr.msk.f32.gmra.mxu0 %vm3068_vm15, %v7352_v6 }
 0x3a7   : > { %3231 = vmatpush1.xpose.msra.mxu1 %v3019_v4  ;;  %5157 = vmatprep.mubr.msk.f32.mxu0 %vm3068_vm15, %v7357_v30 }
 0x3aa   : > { %v3420_v27 = vld [vmem:[#allocation6 + $0x14] sm:$0x77]  ;;  %3265 = vmatmul.mubr.f32.vlgmr.msra.gmra.mxu1 %v7364_v25  ;;  %5158 = vmatmul.mubr.msk.f32.gmra.mxu0 %vm3068_vm15, %v7376_v33 }
 0x3ab   : > { %v3426_v50 = vcombine.high %v3420_v27, %v3420_v27  ;;  %3269 = vmatprep.mubr.f32.mxu1 %v7371_v38  ;;  %3601 = vmatprep.mubr.f32.mxu0 %v7262_v39 }
 0x3ad   : > { %3462 = vmatprep.subr.mxu1 %v3426_v50 }
 0x3ae   : > { %3463 = vmatpush1.xpose.msra.mxu1 %v3420_v27 }
 0x3af   : > { %5160 = vmatprep.subr.msk.mxu1 %vm3068_vm15, %v3422_v43  ;;  %3270 = vmatmul.mubr.f32.gmra.mxu1 %v7383_v11 }
 0x3b0   : > { %3274 = vmatprep.mubr.f32.mxu1 %v7389_v29 }
 0x3b3   : > { %3275 = vmatmul.mubr.f32.gmra.mxu1 %v7399_v23 }
 0x3b4   : > { %3279 = vmatprep.mubr.f32.mxu1 %v7404_v35 }
 0x3b7   : > { %3280 = vmatmul.mubr.f32.gmra.mxu1 %v7411_v53 }
 0x3b8   : > { %3284 = vmatprep.mubr.f32.mxu1 %v7416_v20 }
 0x3bb   : > { %3285 = vmatmul.mubr.f32.gmra.mxu1 %v7423_v47 }
 0x3bc   : > { %3289 = vmatprep.mubr.f32.mxu1 %v7428_v8 }
 0x3bf   : > { %3290 = vmatmul.mubr.f32.gmra.mxu1 %v7435_v0  ;;  %v2955_v5 = vpop.permute.xlu1 %2954 }
 0x3c0   : > { %v2933_v10 = vpop.permute.xlu0 %2932  ;;  %3294 = vmatprep.mubr.f32.mxu1 %v7440_v34  ;;  %2962 = vst.msk [vmem:[#allocation6 + $0x20] sm:$0x7] %vm2888_vm14, %v2955_v5 }
 0x3c1   : > { %2939 = vst.msk [vmem:[#allocation6 + $0x30] sm:$0x7] %vm2888_vm14, %v2933_v10 }
 0x3c3   : > { %3295 = vmatmul.mubr.f32.gmra.mxu1 %v7447_v31 }
 0x3c4   : > { %v2909_v60 = vpop.permute.xlu1 %2908  ;;  %3299 = vmatprep.mubr.f32.mxu1 %v7454_v14 }
 0x3c5   : > { %2915 = vst.msk [vmem:[#allocation6 + $0x2c] sm:$0x7] %vm2888_vm14, %v2909_v60 }
 0x3c7   : > { %3300 = vmatmul.mubr.f32.gmra.mxu1 %v7461_v59  ;;  %v3421_v56 = vld [vmem:[#allocation6 + $0x1c] sm:$0x77] }
 0x3c8   : > { %3496 = vmatprep.mubr.f32.mxu1 %v7153_v26  ;;  %v3427_v17 = vcombine.high %v3421_v56, %v3421_v56 }
 0x3ca   : > { %3567 = vmatprep.subr.mxu0 %v3427_v17 }
 0x3cb   : > { %3497 = vmatmul.mubr.f32.vlgmr.msra.gmra.mxu1 %v7221_v24  ;;  %3568 = vmatpush1.xpose.msra.mxu0 %v3421_v56 }
 0x3cc   : > { %5161 = vmatpush3.xpose.msk.msra.mxu1 %vm3068_vm15, %v3422_v43  ;;  %v3789_v61 = vld [vmem:[#allocation6 + $0x28] sm:$0x77]  ;;  %3501 = vmatprep.mubr.f32.mxu1 %v7232_v54 }
 0x3cd   : > { %v3795_v19 = vcombine.high %v3789_v61, %v3789_v61 }
 0x3ce   : > { %3602 = vmatmul.mubr.f32.vlgmr.msra.gmra.mxu0 %v7364_v25 }
 0x3cf   : > { %3831 = vmatprep.subr.mxu0 %v3795_v19  ;;  %3606 = vmatprep.mubr.f32.mxu0 %v7371_v38 }
 0x3d0   : > { %3832 = vmatpush1.xpose.msra.mxu0 %v3789_v61  ;;  %3502 = vmatmul.mubr.f32.gmra.mxu1 %v7246_v16 }
 0x3d1   : > { %5174 = vmatprep.subr.msk.mxu0 %vm3068_vm15, %v3791_v37  ;;  %3506 = vmatprep.mubr.f32.mxu1 %v7256_v28 }
 0x3d2   : > { %3607 = vmatmul.mubr.f32.gmra.mxu0 %v7383_v11 }
 0x3d3   : > { %3611 = vmatprep.mubr.f32.mxu0 %v7389_v29 }
 0x3d4   : > { %3507 = vmatmul.mubr.f32.gmra.mxu1 %v7270_v48 }
 0x3d5   : > { %3511 = vmatprep.mubr.f32.mxu1 %v7276_v49 }
 0x3d6   : > { %3612 = vmatmul.mubr.f32.gmra.mxu0 %v7399_v23 }
 0x3d7   : > { %3616 = vmatprep.mubr.f32.mxu0 %v7404_v35 }
 0x3d8   : > { %3512 = vmatmul.mubr.f32.gmra.mxu1 %v7283_v51 }
 0x3d9   : > { %3516 = vmatprep.mubr.f32.mxu1 %v7288_v52 }
 0x3da   : > { %3617 = vmatmul.mubr.f32.gmra.mxu0 %v7411_v53 }
 0x3db   : > { %3621 = vmatprep.mubr.f32.mxu0 %v7416_v20 }
 0x3dc   : > { %3517 = vmatmul.mubr.f32.gmra.mxu1 %v7295_v57 }
 0x3dd   : > { %3521 = vmatprep.mubr.f32.mxu1 %v7300_v58 }
 0x3de   : > { %3622 = vmatmul.mubr.f32.gmra.mxu0 %v7423_v47 }
 0x3df   : > { %3626 = vmatprep.mubr.f32.mxu0 %v7428_v8 }
 0x3e0   : > { %v2957_v21 = vpop.permute.xlu1 %2956  ;;  %3522 = vmatmul.mubr.f32.gmra.mxu1 %v7307_v63 }
 0x3e1   : > { %2963 = vst.msk [vmem:[#allocation6 + $0x34] sm:$0x7] %vm2888_vm14, %v2957_v21  ;;  %3526 = vmatprep.mubr.f32.mxu1 %v7164_v55 }
 0x3e2   : > { %3627 = vmatmul.mubr.f32.gmra.mxu0 %v7435_v0 }
 0x3e3   : > { %3631 = vmatprep.mubr.f32.mxu0 %v7440_v34 }
 0x3e4   : > { %3527 = vmatmul.mubr.f32.gmra.mxu1 %v7226_v40 }
 0x3e5   : > { %3531 = vmatprep.mubr.f32.mxu1 %v7237_v62 }
 0x3e6   : > { %3632 = vmatmul.mubr.f32.gmra.mxu0 %v7447_v31 }
 0x3e7   : > { %3636 = vmatprep.mubr.f32.mxu0 %v7454_v14 }
 0x3e8   : > { %3532 = vmatmul.mubr.f32.gmra.mxu1 %v7251_v36  ;;  %v3790_v32 = vld [vmem:[#allocation6 + $0x30] sm:$0x77] }
 0x3e9   : > { %v3796_v22 = vcombine.high %v3790_v32, %v3790_v32  ;;  %5162 = vmatprep.mubr.msk.f32.mxu1 %vm3068_vm15, %v7312_v9 }
 0x3ea   : > { %3637 = vmatmul.mubr.f32.gmra.mxu0 %v7461_v59 }
 0x3eb   : > { %3936 = vmatprep.subr.mxu1 %v3796_v22  ;;  %3865 = vmatprep.mubr.f32.mxu0 %v7153_v26 }
 0x3ec   : > { %5163 = vmatmul.mubr.msk.f32.vlgmr.msra.gmra.mxu1 %vm3068_vm15, %v7320_v15 }
 0x3ed   : > { %3937 = vmatpush1.xpose.msra.mxu1 %v3790_v32  ;;  %5165 = vmatprep.mubr.msk.f32.mxu1 %vm3068_vm15, %v7327_v41 }
 0x3ee   : > { %3866 = vmatmul.mubr.f32.vlgmr.msra.gmra.mxu0 %v7221_v24 }
 0x3ef   : > { %5175 = vmatpush3.xpose.msk.msra.mxu0 %vm3068_vm15, %v3791_v37  ;;  %3870 = vmatprep.mubr.f32.mxu0 %v7232_v54 }
 0x3f0   : > { %5166 = vmatmul.mubr.msk.f32.gmra.mxu1 %vm3068_vm15, %v7336_v1 }
 0x3f1   : > { %5168 = vmatprep.mubr.msk.f32.mxu1 %vm3068_vm15, %v7343_v46 }
 0x3f2   : > { %3871 = vmatmul.mubr.f32.gmra.mxu0 %v7246_v16 }
 0x3f3   : > { %3875 = vmatprep.mubr.f32.mxu0 %v7256_v28 }
 0x3f4   : > { %5169 = vmatmul.mubr.msk.f32.gmra.mxu1 %vm3068_vm15, %v7352_v6 }
 0x3f5   : > { %5171 = vmatprep.mubr.msk.f32.mxu1 %vm3068_vm15, %v7357_v30 }
 0x3f6   : > { %3876 = vmatmul.mubr.f32.gmra.mxu0 %v7270_v48 }
 0x3f7   : > { %3880 = vmatprep.mubr.f32.mxu0 %v7276_v49 }
 0x3f8   : > { %5172 = vmatmul.mubr.msk.f32.gmra.mxu1 %vm3068_vm15, %v7376_v33 }
 0x3f9   : > { %3970 = vmatprep.mubr.f32.mxu1 %v7262_v39 }
 0x3fa   : > { %3881 = vmatmul.mubr.f32.gmra.mxu0 %v7283_v51 }
 0x3fb   : > { %3885 = vmatprep.mubr.f32.mxu0 %v7288_v52  ;;  %v7568_v52 = vpop.permute.xlu0 %3023 }
 0x3fc   : > { %3971 = vmatmul.mubr.f32.vlgmr.msra.gmra.mxu1 %v7364_v25 }
 0x3fd   : > { %3975 = vmatprep.mubr.f32.mxu1 %v7371_v38 }
 0x3fe   : > { %3886 = vmatmul.mubr.f32.gmra.mxu0 %v7295_v57  ;;  %v7570_v57 = vpop.permute.xlu1 %3028 }
 0x3ff   : > { %3890 = vmatprep.mubr.f32.mxu0 %v7300_v58  ;;  %v7587_v50 = vpop.permute.xlu0 %3038 }
 0x400   : > { %3976 = vmatmul.mubr.f32.gmra.mxu1 %v7383_v11 }
 0x401   : > { %3980 = vmatprep.mubr.f32.mxu1 %v7389_v29 }
 0x402   : > { %3891 = vmatmul.mubr.f32.gmra.mxu0 %v7307_v63 }
 0x403   : > { %3895 = vmatprep.mubr.f32.mxu0 %v7164_v55 }
 0x404   : > { %3981 = vmatmul.mubr.f32.gmra.mxu1 %v7399_v23 }
 0x405   : > { %3985 = vmatprep.mubr.f32.mxu1 %v7404_v35 }
 0x406   : > { %3896 = vmatmul.mubr.f32.gmra.mxu0 %v7226_v40 }
 0x407   : > { %3900 = vmatprep.mubr.f32.mxu0 %v7237_v62 }
 0x408   : > { %3986 = vmatmul.mubr.f32.gmra.mxu1 %v7411_v53 }
 0x409   : > { %3990 = vmatprep.mubr.f32.mxu1 %v7416_v20 }
 0x40a   : > { %3901 = vmatmul.mubr.f32.gmra.mxu0 %v7251_v36 }
 0x40b   : > { %5176 = vmatprep.mubr.msk.f32.mxu0 %vm3068_vm15, %v7312_v9 }
 0x40c   : > { %3991 = vmatmul.mubr.f32.gmra.mxu1 %v7423_v47 }
 0x40d   : > { %3995 = vmatprep.mubr.f32.mxu1 %v7428_v8 }
 0x40e   : > { %5177 = vmatmul.mubr.msk.f32.vlgmr.msra.gmra.mxu0 %vm3068_vm15, %v7320_v15 }
 0x40f   : > { %5179 = vmatprep.mubr.msk.f32.mxu0 %vm3068_vm15, %v7327_v41 }
 0x410   : > { %3996 = vmatmul.mubr.f32.gmra.mxu1 %v7435_v0 }
 0x411   : > { %4000 = vmatprep.mubr.f32.mxu1 %v7440_v34  ;;  %v7595_v34 = vpop.permute.xlu0 %3048 }
 0x412   : > { %5180 = vmatmul.mubr.msk.f32.gmra.mxu0 %vm3068_vm15, %v7336_v1 }
 0x413   : > { %5182 = vmatprep.mubr.msk.f32.mxu0 %vm3068_vm15, %v7343_v46  ;;  %v7582_v46 = vpop.permute.xlu1 %3033 }
 0x414   : > { %4001 = vmatmul.mubr.f32.gmra.mxu1 %v7447_v31 }
 0x415   : > { %4005 = vmatprep.mubr.f32.mxu1 %v7454_v14  ;;  %v7604_v19 = vpop.permute.xlu0 %3058 }
 0x416   : > { %5183 = vmatmul.mubr.msk.f32.gmra.mxu0 %vm3068_vm15, %v7352_v6 }
 0x417   : > { %5185 = vmatprep.mubr.msk.f32.mxu0 %vm3068_vm15, %v7357_v30  ;;  %v7590_v23 = vpop.permute.xlu1 %3043 }
 0x418   : > { %4006 = vmatmul.mubr.f32.gmra.mxu1 %v7461_v59 }
 0x41a   : > { %5186 = vmatmul.mubr.msk.f32.gmra.mxu0 %vm3068_vm15, %v7376_v33 }
 0x41b   : > { %v7599_v31 = vpop.permute.xlu1 %3053 }
 0x446   : > { %v3161_v26 = vpop.f32.mrf.mxu0  ;;  %v7564_v55 = vpop.f32.mrf.mxu1 }
 0x447   : > { %v3162_v58 = vadd.f32 %v3161_v26, %v7568_v52  ;;  %v3192_v21 = vadd.f32 %v7564_v55, %v7599_v31 }
 0x448   : > { %v3163_v18 = vpop.f32.mrf.mxu0  ;;  %v3193_v42 = vpop.f32.mrf.mxu1 }
 0x44a   : > { %v3166_v2 = vpop.f32.mrf.mxu0  ;;  %v7566_v3 = vpop.f32.mrf.mxu1 }
 0x44b   : > { %v3167_v15 = vadd.f32 %v3166_v2, %v7570_v57  ;;  %v3197_v2 = vadd.f32 %v7566_v3, %v7604_v19 }
 0x44c   : > { %v3168_v24 = vpop.f32.mrf.mxu0  ;;  %v3198_v40 = vpop.f32.mrf.mxu1 }
 0x44e   : > { %v3171_v54 = vpop.f32.mrf.mxu0 }
 0x44f   : > { %v3172_v7 = vadd.f32 %v3171_v54, %v7582_v46 }
 0x450   : > { %v3173_v62 = vpop.f32.mrf.mxu0 }
 0x452   : > { %v3176_v16 = vpop.f32.mrf.mxu0 }
 0x453   : > { %v3177_v33 = vadd.f32 %v3176_v16, %v7587_v50 }
 0x454   : > { %v3178_v36 = vpop.f32.mrf.mxu0 }
 0x456   : > { %v3181_v28 = vpop.f32.mrf.mxu0 }
 0x457   : > { %v3182_v47 = vadd.f32 %v3181_v28, %v7590_v23 }
 0x458   : > { %v3183_v39 = vpop.f32.mrf.mxu0 }
 0x45a   : > { %v3186_v48 = vpop.f32.mrf.mxu0 }
 0x45b   : > { %v3187_v14 = vadd.f32 %v3186_v48, %v7595_v34 }
 0x45c   : > { %v3188_v49 = vpop.f32.mrf.mxu0 }
 0x45e   : > { %v5150_v51 = vpop.f32.mrf.mxu0 }
 0x460   : > { %v3371_v9 = vpop.f32.mrf.mxu0 }
 0x462   : > { %v5153_v45 = vpop.f32.mrf.mxu0 }
 0x464   : > { %v3381_v25 = vpop.f32.mrf.mxu0 }
 0x466   : > { %v5156_v29 = vpop.f32.mrf.mxu0 }
 0x468   : > { %v3391_v0 = vpop.f32.mrf.mxu0 }
 0x46a   : > { %v3266_v63 = vpop.f32.mrf.mxu1  ;;  %v5159_v56 = vpop.f32.mrf.mxu0 }
 0x46b   : > { %v3267_v12 = vadd.f32 %v3266_v63, %v3162_v58 }
 0x46c   : > { %v3268_v13 = vpop.f32.mrf.mxu1  ;;  %v3401_v22 = vpop.f32.mrf.mxu0 }
 0x46d   : > { %v3372_v41 = vadd.f32 %v3371_v9, %v3267_v12 }
 0x46f   : > { %v3271_v44 = vpop.f32.mrf.mxu1  ;;  %3411 = vst.msk [vmem:[%s7577_s24] sm:$0xff] %vm3410_vm0, %v3372_v41 }
 0x470   : > { %v3272_v1 = vadd.f32 %v3271_v44, %v3167_v15 }
 0x471   : > { %v3273_v4 = vpop.f32.mrf.mxu1 }
 0x472   : > { %v3377_v6 = vadd.f32 %v5150_v51, %v3272_v1 }
 0x473   : > { %v3276_v30 = vpop.f32.mrf.mxu1 }
 0x474   : > { %3412 = vst.msk [vmem:[%s7577_s24 + $0x8] sm:$0xff] %vm3410_vm0, %v3377_v6  ;;  %v3277_v27 = vadd.f32 %v3276_v30, %v3172_v7 }
 0x475   : > { %v3278_v38 = vpop.f32.mrf.mxu1 }
 0x476   : > { %v3382_v43 = vadd.f32 %v3381_v25, %v3277_v27 }
 0x477   : > { %v3281_v11 = vpop.f32.mrf.mxu1 }
 0x478   : > { %v3282_v35 = vadd.f32 %v3281_v11, %v3177_v33  ;;  %3413 = vst.msk [vmem:[%s7577_s24 + $0x10] sm:$0xff] %vm3410_vm0, %v3382_v43 }
 0x479   : > { %v3283_v53 = vpop.f32.mrf.mxu1 }
 0x47a   : > { %v3387_v20 = vadd.f32 %v5153_v45, %v3282_v35 }
 0x47b   : > { %v3286_v8 = vpop.f32.mrf.mxu1 }
 0x47c   : > { %3414 = vst.msk [vmem:[%s7577_s24 + $0x18] sm:$0xff] %vm3410_vm0, %v3387_v20  ;;  %v3287_v5 = vadd.f32 %v3286_v8, %v3182_v47 }
 0x47d   : > { %v3288_v10 = vpop.f32.mrf.mxu1 }
 0x47e   : > { %v3392_v60 = vadd.f32 %v3391_v0, %v3287_v5 }
 0x47f   : > { %v3291_v59 = vpop.f32.mrf.mxu1 }
 0x480   : > { %v3292_v17 = vadd.f32 %v3291_v59, %v3187_v14  ;;  %3415 = vst.msk [vmem:[%s7577_s24 + $0x20] sm:$0xff] %vm3410_vm0, %v3392_v60 }
 0x481   : > { %v3293_v61 = vpop.f32.mrf.mxu1 }
 0x482   : > { %v3397_v37 = vadd.f32 %v5156_v29, %v3292_v17 }
 0x483   : > { %v3296_v32 = vpop.f32.mrf.mxu1 }
 0x484   : > { %3416 = vst.msk [vmem:[%s7577_s24 + $0x28] sm:$0xff] %vm3410_vm0, %v3397_v37  ;;  %v3297_v26 = vadd.f32 %v3296_v32, %v3192_v21 }
 0x485   : > { %v3298_v18 = vpop.f32.mrf.mxu1 }
 0x486   : > { %v3402_v42 = vadd.f32 %v3401_v22, %v3297_v26 }
 0x487   : > { %v3301_v24 = vpop.f32.mrf.mxu1 }
 0x488   : > { %3417 = vst.msk [vmem:[%s7577_s24 + $0x30] sm:$0xff] %vm3410_vm0, %v3402_v42  ;;  %v3302_v40 = vadd.f32 %v3301_v24, %v3197_v2 }
 0x489   : > { %v3303_v54 = vpop.f32.mrf.mxu1 }
 0x48a   : > { %v3407_v62 = vadd.f32 %v5159_v56, %v3302_v40 }
 0x48b   : > { %v3498_v16 = vpop.f32.mrf.mxu1 }
 0x48c   : > { %3418 = vst.msk [vmem:[%s7577_s24 + $0x38] sm:$0xff] %vm3410_vm0, %v3407_v62  ;;  %v3499_v35 = vadd.f32 %v3498_v16, %v7568_v52 }
 0x48d   : > { %v3500_v55 = vpop.f32.mrf.mxu1 }
 0x48e   : > { %v3603_v36 = vpop.f32.mrf.mxu0 }
 0x48f   : > { %v3604_v10 = vadd.f32 %v3603_v36, %v3499_v35 }
 0x490   : > { %v3605_v28 = vpop.f32.mrf.mxu0  ;;  %v3503_v39 = vpop.f32.mrf.mxu1 }
 0x491   : > { %v3504_v43 = vadd.f32 %v3503_v39, %v7570_v57 }
 0x492   : > { %v3608_v48 = vpop.f32.mrf.mxu0  ;;  %v3505_v49 = vpop.f32.mrf.mxu1 }
 0x493   : > { %v3609_v47 = vadd.f32 %v3608_v48, %v3504_v43 }
 0x494   : > { %v3610_v51 = vpop.f32.mrf.mxu0  ;;  %v3508_v58 = vpop.f32.mrf.mxu1 }
 0x495   : > { %v3509_v14 = vadd.f32 %v3508_v58, %v7582_v46 }
 0x496   : > { %v3613_v63 = vpop.f32.mrf.mxu0  ;;  %v3510_v9 = vpop.f32.mrf.mxu1 }
 0x497   : > { %v3614_v22 = vadd.f32 %v3613_v63, %v3509_v14 }
 0x498   : > { %v3615_v3 = vpop.f32.mrf.mxu0  ;;  %v3513_v12 = vpop.f32.mrf.mxu1 }
 0x499   : > { %v3514_v8 = vadd.f32 %v3513_v12, %v7587_v50 }
 0x49a   : > { %v3618_v13 = vpop.f32.mrf.mxu0  ;;  %v3515_v15 = vpop.f32.mrf.mxu1 }
 0x49b   : > { %v3619_v17 = vadd.f32 %v3618_v13, %v3514_v8 }
 0x49c   : > { %v3620_v41 = vpop.f32.mrf.mxu0  ;;  %v3518_v44 = vpop.f32.mrf.mxu1 }
 0x49d   : > { %v3519_v26 = vadd.f32 %v3518_v44, %v7590_v23 }
 0x49e   : > { %v3623_v45 = vpop.f32.mrf.mxu0  ;;  %v3520_v1 = vpop.f32.mrf.mxu1 }
 0x49f   : > { %v3624_v55 = vadd.f32 %v3623_v45, %v3519_v26 }
 0x4a0   : > { %v3625_v4 = vpop.f32.mrf.mxu0  ;;  %v3523_v6 = vpop.f32.mrf.mxu1 }
 0x4a1   : > { %v3524_v61 = vadd.f32 %v3523_v6, %v7595_v34 }
 0x4a2   : > { %v3628_v7 = vpop.f32.mrf.mxu0  ;;  %v3525_v30 = vpop.f32.mrf.mxu1 }
 0x4a3   : > { %v3629_v24 = vadd.f32 %v3628_v7, %v3524_v61 }
 0x4a4   : > { %v3630_v25 = vpop.f32.mrf.mxu0  ;;  %v3528_v27 = vpop.f32.mrf.mxu1 }
 0x4a5   : > { %v3529_v36 = vadd.f32 %v3528_v27, %v7599_v31 }
 0x4a6   : > { %v3633_v38 = vpop.f32.mrf.mxu0  ;;  %v3530_v33 = vpop.f32.mrf.mxu1 }
 0x4a7   : > { %v3634_v9 = vadd.f32 %v3633_v38, %v3529_v36 }
 0x4a8   : > { %v3635_v11 = vpop.f32.mrf.mxu0  ;;  %v3533_v29 = vpop.f32.mrf.mxu1 }
 0x4a9   : > { %v3534_v40 = vadd.f32 %v3533_v29, %v7604_v19 }
 0x4aa   : > { %v3638_v53 = vpop.f32.mrf.mxu0  ;;  %v3535_v20 = vpop.f32.mrf.mxu1 }
 0x4ab   : > { %v3639_v49 = vadd.f32 %v3638_v53, %v3534_v40 }
 0x4ac   : > { %v3640_v0 = vpop.f32.mrf.mxu0  ;;  %v5164_v5 = vpop.f32.mrf.mxu1 }
 0x4ad   : > { %v3714_v60 = vadd.f32 %v5164_v5, %v3609_v47 }
 0x4ae   : > { %v3867_v59 = vpop.f32.mrf.mxu0  ;;  %v3708_v56 = vpop.f32.mrf.mxu1 }
 0x4af   : > { %v3709_v37 = vadd.f32 %v3708_v56, %v3604_v10  ;;  %3757 = vrot.lane.b32.xlu0 %v3714_v60, %s5285_s28  ;;  %v3868_v8 = vadd.f32 %v3867_v59, %v7568_v52 }
 0x4b0   : > { %v3869_v21 = vpop.f32.mrf.mxu0  ;;  %v5167_v32 = vpop.f32.mrf.mxu1 }
 0x4b1   : > { %v3724_v18 = vadd.f32 %v5167_v32, %v3619_v17  ;;  %3755 = vrot.lane.b32.xlu1 %v3709_v37, %s5285_s28 }
 0x4b2   : > { %v3872_v42 = vpop.f32.mrf.mxu0  ;;  %v3718_v2 = vpop.f32.mrf.mxu1 }
 0x4b3   : > { %v3719_v54 = vadd.f32 %v3718_v2, %v3614_v22  ;;  %3761 = vrot.lane.b32.xlu0 %v3724_v18, %s5285_s28  ;;  %v3873_v53 = vadd.f32 %v3872_v42, %v7570_v57 }
 0x4b4   : > { %v3874_v62 = vpop.f32.mrf.mxu0  ;;  %v5170_v16 = vpop.f32.mrf.mxu1 }
 0x4b5   : > { %v3734_v28 = vadd.f32 %v5170_v16, %v3629_v24  ;;  %3759 = vrot.lane.b32.xlu1 %v3719_v54, %s5285_s28 }
 0x4b6   : > { %v3877_v39 = vpop.f32.mrf.mxu0  ;;  %v3728_v48 = vpop.f32.mrf.mxu1 }
 0x4b7   : > { %v3729_v51 = vadd.f32 %v3728_v48, %v3624_v55  ;;  %3765 = vrot.lane.b32.xlu0 %v3734_v28, %s5285_s28  ;;  %v3878_v37 = vadd.f32 %v3877_v39, %v7582_v46 }
 0x4b8   : > { %v3879_v58 = vpop.f32.mrf.mxu0  ;;  %v5173_v63 = vpop.f32.mrf.mxu1 }
 0x4b9   : > { %v3744_v3 = vadd.f32 %v5173_v63, %v3639_v49  ;;  %3763 = vrot.lane.b32.xlu1 %v3729_v51, %s5285_s28 }
 0x4ba   : > { %v3882_v12 = vpop.f32.mrf.mxu0  ;;  %v3738_v13 = vpop.f32.mrf.mxu1 }
 0x4bb   : > { %v3739_v15 = vadd.f32 %v3738_v13, %v3634_v9  ;;  %3769 = vrot.lane.b32.xlu0 %v3744_v3, %s5285_s28  ;;  %v3883_v14 = vadd.f32 %v3882_v12, %v7587_v50 }
 0x4bc   : > { %v3884_v41 = vpop.f32.mrf.mxu0  ;;  %v3972_v44 = vpop.f32.mrf.mxu1 }
 0x4bd   : > { %3767 = vrot.lane.b32.xlu1 %v3739_v15, %s5285_s28  ;;  %v3973_v60 = vadd.f32 %v3972_v44, %v3868_v8 }
 0x4be   : > { %v3887_v45 = vpop.f32.mrf.mxu0  ;;  %v3974_v1 = vpop.f32.mrf.mxu1 }
 0x4bf   : > { %v3888_v42 = vadd.f32 %v3887_v45, %v7590_v23 }
 0x4c0   : > { %v3889_v4 = vpop.f32.mrf.mxu0  ;;  %v3977_v6 = vpop.f32.mrf.mxu1 }
 0x4c1   : > { %v3978_v0 = vadd.f32 %v3977_v6, %v3873_v53 }
 0x4c2   : > { %v3892_v7 = vpop.f32.mrf.mxu0  ;;  %v3979_v30 = vpop.f32.mrf.mxu1 }
 0x4c3   : > { %v3893_v52 = vadd.f32 %v3892_v7, %v7595_v34 }
 0x4c4   : > { %v3894_v25 = vpop.f32.mrf.mxu0  ;;  %v3982_v27 = vpop.f32.mrf.mxu1 }
 0x4c5   : > { %v3983_v59 = vadd.f32 %v3982_v27, %v3878_v37 }
 0x4c6   : > { %v3897_v38 = vpop.f32.mrf.mxu0  ;;  %v3984_v33 = vpop.f32.mrf.mxu1 }
 0x4c7   : > { %v3898_v36 = vadd.f32 %v3897_v38, %v7599_v31 }
 0x4c8   : > { %v3899_v43 = vpop.f32.mrf.mxu0  ;;  %v3987_v11 = vpop.f32.mrf.mxu1 }
 0x4c9   : > { %v3988_v21 = vadd.f32 %v3987_v11, %v3883_v14 }
 0x4ca   : > { %v3902_v29 = vpop.f32.mrf.mxu0  ;;  %v3989_v35 = vpop.f32.mrf.mxu1 }
 0x4cb   : > { %v3903_v54 = vadd.f32 %v3902_v29, %v7604_v19 }
 0x4cc   : > { %v3904_v20 = vpop.f32.mrf.mxu0  ;;  %v3992_v47 = vpop.f32.mrf.mxu1 }
 0x4cd   : > { %v3993_v62 = vadd.f32 %v3992_v47, %v3888_v42 }
 0x4ce   : > { %v5178_v5 = vpop.f32.mrf.mxu0  ;;  %v3994_v10 = vpop.f32.mrf.mxu1 }
 0x4cf   : > { %v4083_v56 = vadd.f32 %v5178_v5, %v3978_v0 }
 0x4d0   : > { %v4077_v17 = vpop.f32.mrf.mxu0  ;;  %v3997_v61 = vpop.f32.mrf.mxu1 }
 0x4d1   : > { %v4078_v32 = vadd.f32 %v4077_v17, %v3973_v60  ;;  %4126 = vrot.lane.b32.xlu0 %v4083_v56, %s5286_s22  ;;  %v3998_v2 = vadd.f32 %v3997_v61, %v3893_v52 }
 0x4d2   : > { %v5181_v57 = vpop.f32.mrf.mxu0  ;;  %v3999_v22 = vpop.f32.mrf.mxu1 }
 0x4d3   : > { %v4093_v26 = vadd.f32 %v5181_v57, %v3988_v21  ;;  %4124 = vrot.lane.b32.xlu1 %v4078_v32, %s5286_s22 }
 0x4d4   : > { %v4087_v50 = vpop.f32.mrf.mxu0  ;;  %v4002_v18 = vpop.f32.mrf.mxu1 }
 0x4d5   : > { %v4088_v24 = vadd.f32 %v4087_v50, %v3983_v59  ;;  %4130 = vrot.lane.b32.xlu0 %v4093_v26, %s5286_s22  ;;  %v4003_v49 = vadd.f32 %v4002_v18, %v3898_v36 }
 0x4d6   : > { %v5184_v46 = vpop.f32.mrf.mxu0  ;;  %v4004_v40 = vpop.f32.mrf.mxu1 }
 0x4d7   : > { %v4103_v16 = vadd.f32 %v5184_v46, %v3998_v2  ;;  %4128 = vrot.lane.b32.xlu1 %v4088_v24, %s5286_s22 }
 0x4d8   : > { %v4097_v34 = vpop.f32.mrf.mxu0  ;;  %v4007_v55 = vpop.f32.mrf.mxu1 }
 0x4d9   : > { %v4098_v28 = vadd.f32 %v4097_v34, %v3993_v62  ;;  %4134 = vrot.lane.b32.xlu0 %v4103_v16, %s5286_s22  ;;  %v4008_v23 = vadd.f32 %v4007_v55, %v3903_v54 }
 0x4da   : > { %v5187_v39 = vpop.f32.mrf.mxu0  ;;  %v4009_v48 = vpop.f32.mrf.mxu1 }
 0x4db   : > { %v4113_v19 = vadd.f32 %v5187_v39, %v4008_v23  ;;  %4132 = vrot.lane.b32.xlu1 %v4098_v28, %s5286_s22 }
 0x4dc   : > { %v4107_v51 = vpop.f32.mrf.mxu0 }
 0x4dd   : > { %v4108_v58 = vadd.f32 %v4107_v51, %v4003_v49  ;;  %4138 = vrot.lane.b32.xlu0 %v4113_v19, %s5286_s22 }
 0x4df   : > { %4136 = vrot.lane.b32.xlu1 %v4108_v58, %s5286_s22 }
 0x521   : > { %v3758_v31 = vpop.permute.xlu0 %3757 }
 0x522   : > { %3781 = vst.msk [vmem:[%s7577_s24 + $0x8] sm:$0xff] %vm3779_vm1, %v3758_v31 }
 0x523   : > { %v3756_v63 = vpop.permute.xlu1 %3755 }
 0x524   : > { %3780 = vst.msk [vmem:[%s7577_s24] sm:$0xff] %vm3779_vm1, %v3756_v63 }
 0x525   : > { %v3762_v9 = vpop.permute.xlu0 %3761 }
 0x526   : > { %3783 = vst.msk [vmem:[%s7577_s24 + $0x18] sm:$0xff] %vm3779_vm1, %v3762_v9 }
 0x527   : > { %v3760_v3 = vpop.permute.xlu1 %3759 }
 0x528   : > { %3782 = vst.msk [vmem:[%s7577_s24 + $0x10] sm:$0xff] %vm3779_vm1, %v3760_v3 }
 0x529   : > { %v3766_v12 = vpop.permute.xlu0 %3765 }
 0x52a   : > { %3785 = vst.msk [vmem:[%s7577_s24 + $0x28] sm:$0xff] %vm3779_vm1, %v3766_v12 }
 0x52b   : > { %v3764_v13 = vpop.permute.xlu1 %3763 }
 0x52c   : > { %3784 = vst.msk [vmem:[%s7577_s24 + $0x20] sm:$0xff] %vm3779_vm1, %v3764_v13 }
 0x52d   : > { %v3770_v15 = vpop.permute.xlu0 %3769 }
 0x52e   : > { %3787 = vst.msk [vmem:[%s7577_s24 + $0x38] sm:$0xff] %vm3779_vm1, %v3770_v15 }
 0x52f   : > { %v3768_v41 = vpop.permute.xlu1 %3767 }
 0x530   : > { %3786 = vst.msk [vmem:[%s7577_s24 + $0x30] sm:$0xff] %vm3779_vm1, %v3768_v41 }
 0x543   : > { %v4127_v44 = vpop.permute.xlu0 %4126 }
 0x544   : > { %4150 = vst.msk [vmem:[%s7577_s24 + $0x8] sm:$0xff] %vm4148_vm2, %v4127_v44 }
 0x545   : > { %v4125_v45 = vpop.permute.xlu1 %4124 }
 0x546   : > { %4149 = vst.msk [vmem:[%s7577_s24] sm:$0xff] %vm4148_vm2, %v4125_v45 }
 0x547   : > { %v4131_v1 = vpop.permute.xlu0 %4130 }
 0x548   : > { %4152 = vst.msk [vmem:[%s7577_s24 + $0x18] sm:$0xff] %vm4148_vm2, %v4131_v1 }
 0x549   : > { %v4129_v4 = vpop.permute.xlu1 %4128 }
 0x54a   : > { %4151 = vst.msk [vmem:[%s7577_s24 + $0x10] sm:$0xff] %vm4148_vm2, %v4129_v4 }
 0x54b   : > { %v4135_v6 = vpop.permute.xlu0 %4134 }
 0x54c   : > { %4154 = vst.msk [vmem:[%s7577_s24 + $0x28] sm:$0xff] %vm4148_vm2, %v4135_v6 }
 0x54d   : > { %v4133_v7 = vpop.permute.xlu1 %4132 }
 0x54e   : > { %4153 = vst.msk [vmem:[%s7577_s24 + $0x20] sm:$0xff] %vm4148_vm2, %v4133_v7 }
 0x54f   : > { %v4139_v30 = vpop.permute.xlu0 %4138 }
 0x550   : > { %4156 = vst.msk [vmem:[%s7577_s24 + $0x38] sm:$0xff] %vm4148_vm2, %v4139_v30 }
 0x551   : > { %v4137_v25 = vpop.permute.xlu1 %4136 }
 0x552   : > { %4155 = vst.msk [vmem:[%s7577_s24 + $0x30] sm:$0xff] %vm4148_vm2, %v4137_v25 }
 0x553 PF: > { %s18_s27 = sadd.s32 1, %s5279_s27  }
 0x554   : > { %p15_p4 = scmp.ge.s32.totalorder %s18_s27, 4  }
 0x556   :  { %17 = sbr.rel (!%p15_p4) target bundleno = 1 (0x1), region = 113 }

</bundles_post_ra>
